<compile_context>
chip_gen: v7x
topology: tpu7x:2x2x1
jax: 0.10.0
libtpu: 0.0.40
codegen_flags: <defaults>
</compile_context>

<pallas_src>
import functools

import jax
import jax.numpy as jnp
from jax.experimental import pallas as pl
from jax.experimental.pallas import tpu as pltpu


# ----------------------------------------------------------------------------
# In-kernel helpers
# ----------------------------------------------------------------------------
def _build_padded_tile(x_ref, xpad_ref, *, H, W, pad):
    """Scatter the channel-major (Cin, H*W) input block into a zero-padded
    pixel-major (H+2p, W+2p, Cin) VMEM tile. Halo is built on-chip; no HBM pad.
    """
    # Re-zero every grid step: the batch axis is "parallel", so scratch
    # persistence across it is not guaranteed per-core. The fill is tiny.
    xpad_ref[...] = jnp.zeros_like(xpad_ref)
    xt = x_ref[0].T                                    # (H*W, Cin), one small 2-D transpose
    for h in range(H):                                 # static row scatter into the interior
        xpad_ref[pad + h, pad:pad + W, :] = xt[h * W:(h + 1) * W, :]


def _im2col_conv3x3_bn_silu(xpad_ref, w_ref, s_ref, b_ref, *, H, W, K):
    """3x3 conv (stride 1) via one im2col MXU matmul + folded BN + SiLU.
    Returns (H*W, Cout_of_this_conv) float32."""
    cin = xpad_ref.shape[-1]
    taps = [
        xpad_ref[kh:kh + H, kw:kw + W, :].reshape(H * W, cin)
        for kh in range(K) for kw in range(K)
    ]
    patches = jnp.concatenate(taps, axis=-1)           # (H*W, K*K*Cin)
    z = jnp.dot(patches.astype(w_ref.dtype), w_ref[...],
                preferred_element_type=jnp.float32)    # f32 accumulate on MXU
    z = z * s_ref[0, :] + b_ref[0, :]                  # folded BatchNorm (f32)
    return z * jax.nn.sigmoid(z)                       # SiLU (f32)


# ----------------------------------------------------------------------------
# Fused kernel, expansion path:
#   [3x3 conv + BN + SiLU] -> [1x1 conv + BN] (+ optional eval-mode residual
#   doubling); expanded activations never leave on-chip memory.
# ----------------------------------------------------------------------------
def _fused_expand_kernel(x_ref, w1_ref, s1_ref, b1_ref, w2_ref, s2_ref, b2_ref,
                         o_ref, xpad_ref, *, H, W, K, pad, double_out):
    _build_padded_tile(x_ref, xpad_ref, H=H, W=W, pad=pad)
    z = _im2col_conv3x3_bn_silu(xpad_ref, w1_ref, s1_ref, b1_ref, H=H, W=W, K=K)
    # Fused 1x1 projection + folded BN (Identity activation).
    y = jnp.dot(z.astype(w2_ref.dtype), w2_ref[...],
                preferred_element_type=jnp.float32)
    y = y * s2_ref[0, :] + b2_ref[0, :]
    if double_out:
        y = y + y                                      # eval-mode stochastic_depth(y) + y
    o_ref[0] = y.T.astype(o_ref.dtype)                 # (Cout, H*W): lane-dense store


# ----------------------------------------------------------------------------
# Fused kernel, no-expansion path: [3x3 conv + BN + SiLU] (+ optional doubling)
# ----------------------------------------------------------------------------
def _fused_noexp_kernel(x_ref, w_ref, s_ref, b_ref, o_ref, xpad_ref, *, H, W,
                        K, pad, double_out):
    _build_padded_tile(x_ref, xpad_ref, H=H, W=W, pad=pad)
    y = _im2col_conv3x3_bn_silu(xpad_ref, w_ref, s_ref, b_ref, H=H, W=W, K=K)
    if double_out:
        y = y + y
    o_ref[0] = y.T.astype(o_ref.dtype)                 # (Cout, H*W): lane-dense store


# ----------------------------------------------------------------------------
# Wrappers around pallas_call (inputs/outputs stay NCHW-collapsed: no HBM
# transposes, only free row-major reshapes)
# ----------------------------------------------------------------------------
def fused_expand_block(x_flat, w1_r, s1, b1, w2, s2, b2, *, H, W, K, pad,
                       double_out, compute_dtype=jnp.float32):
    N, Cin, HW = x_flat.shape
    Cexp = w1_r.shape[-1]
    Cout = w2.shape[-1]
    kernel = functools.partial(_fused_expand_kernel, H=H, W=W, K=K, pad=pad,
                               double_out=double_out)
    return pl.pallas_call(
        kernel,
        out_shape=jax.ShapeDtypeStruct((N, Cout, HW), x_flat.dtype),
        grid=(N,),
        in_specs=[
            pl.BlockSpec((1, Cin, HW), lambda n: (n, 0, 0)),
            pl.BlockSpec((K * K * Cin, Cexp), lambda n: (0, 0)),
            pl.BlockSpec((1, Cexp), lambda n: (0, 0)),
            pl.BlockSpec((1, Cexp), lambda n: (0, 0)),
            pl.BlockSpec((Cexp, Cout), lambda n: (0, 0)),
            pl.BlockSpec((1, Cout), lambda n: (0, 0)),
            pl.BlockSpec((1, Cout), lambda n: (0, 0)),
        ],
        out_specs=pl.BlockSpec((1, Cout, HW), lambda n: (n, 0, 0)),
        scratch_shapes=[
            pltpu.VMEM((H + 2 * pad, W + 2 * pad, Cin), x_flat.dtype)],
        compiler_params=pltpu.CompilerParams(
            dimension_semantics=("parallel",)),
    )(x_flat,
      w1_r.astype(compute_dtype), s1.reshape(1, -1), b1.reshape(1, -1),
      w2.astype(compute_dtype), s2.reshape(1, -1), b2.reshape(1, -1))


def fused_noexp_block(x_flat, w_r, s, b, *, H, W, K, pad, double_out,
                      compute_dtype=jnp.float32):
    N, Cin, HW = x_flat.shape
    Cout = w_r.shape[-1]
    kernel = functools.partial(_fused_noexp_kernel, H=H, W=W, K=K, pad=pad,
                               double_out=double_out)
    return pl.pallas_call(
        kernel,
        out_shape=jax.ShapeDtypeStruct((N, Cout, HW), x_flat.dtype),
        grid=(N,),
        in_specs=[
            pl.BlockSpec((1, Cin, HW), lambda n: (n, 0, 0)),
            pl.BlockSpec((K * K * Cin, Cout), lambda n: (0, 0)),
            pl.BlockSpec((1, Cout), lambda n: (0, 0)),
            pl.BlockSpec((1, Cout), lambda n: (0, 0)),
        ],
        out_specs=pl.BlockSpec((1, Cout, HW), lambda n: (n, 0, 0)),
        scratch_shapes=[
            pltpu.VMEM((H + 2 * pad, W + 2 * pad, Cin), x_flat.dtype)],
        compiler_params=pltpu.CompilerParams(
            dimension_semantics=("parallel",)),
    )(x_flat,
      w_r.astype(compute_dtype), s.reshape(1, -1), b.reshape(1, -1))


# ----------------------------------------------------------------------------
# Parameter setup (deterministic, synthetic) + BatchNorm folding
# ----------------------------------------------------------------------------
_BN_EPS = 1e-5


def _fold_bn(conv_bias, gamma, beta, mean, var):
    scale = gamma / jnp.sqrt(var + _BN_EPS)
    bias = (conv_bias - mean) * scale + beta
    return scale, bias


def init_fusembconv_params(key, in_channels, out_channels, expand_ratio,
                           kernel_size=3):
    expanded = in_channels * expand_ratio
    keys = jax.random.split(key, 12)

    def bn_params(k, c):
        k1, k2, k3, k4 = jax.random.split(k, 4)
        gamma = 1.0 + 0.1 * jax.random.normal(k1, (c,), jnp.float32)
        beta = 0.1 * jax.random.normal(k2, (c,), jnp.float32)
        mean = 0.1 * jax.random.normal(k3, (c,), jnp.float32)
        var = 0.5 + jnp.abs(jax.random.normal(k4, (c,), jnp.float32))
        return gamma, beta, mean, var

    if expand_ratio != 1:
        w1 = 0.1 * jax.random.normal(
            keys[0], (kernel_size, kernel_size, in_channels, expanded),
            jnp.float32)
        b1 = 0.01 * jax.random.normal(keys[1], (expanded,), jnp.float32)
        s1, fb1 = _fold_bn(b1, *bn_params(keys[2], expanded))
        w2 = 0.1 * jax.random.normal(
            keys[3], (expanded, out_channels), jnp.float32)
        b2 = 0.01 * jax.random.normal(keys[4], (out_channels,), jnp.float32)
        s2, fb2 = _fold_bn(b2, *bn_params(keys[5], out_channels))
        return dict(w1=w1, s1=s1, b1=fb1, w2=w2, s2=s2, b2=fb2)
    w = 0.1 * jax.random.normal(
        keys[0], (kernel_size, kernel_size, in_channels, out_channels),
        jnp.float32)
    b = 0.01 * jax.random.normal(keys[1], (out_channels,), jnp.float32)
    s, fb = _fold_bn(b, *bn_params(keys[2], out_channels))
    return dict(w=w, s=s, b=fb)


# ----------------------------------------------------------------------------
# Forward pass (eval mode) — single fused pallas_call per block, NCHW in/out
# ----------------------------------------------------------------------------
def fusembconv_forward(params, x_nchw, *, in_channels, out_channels,
                       expand_ratio, stride=1, compute_dtype=jnp.float32):
    # TODO(synk): stride=2 (downsampling 3x3 conv) not implemented in-kernel.
    assert stride == 1, "stride=2 not implemented in this kernel demo"
    use_residual = (in_channels == out_channels) and stride == 1
    N, C, H, W = x_nchw.shape
    x_flat = x_nchw.reshape(N, C, H * W)                 # free row-major collapse
    if expand_ratio != 1:
        K, _, cin, cexp = params["w1"].shape
        w1_r = params["w1"].reshape(K * K * cin, cexp)   # im2col weight layout
        y = fused_expand_block(
            x_flat, w1_r, params["s1"], params["b1"],
            params["w2"], params["s2"], params["b2"],
            H=H, W=W, K=K, pad=1, double_out=use_residual,
            compute_dtype=compute_dtype)
    else:
        K, _, cin, cout = params["w"].shape
        w_r = params["w"].reshape(K * K * cin, cout)
        y = fused_noexp_block(
            x_flat, w_r, params["s"], params["b"],
            H=H, W=W, K=K, pad=1, double_out=use_residual,
            compute_dtype=compute_dtype)
    return y.reshape(N, -1, H, W)                        # free un-collapse to NCHW


# ----------------------------------------------------------------------------
# Pure-JAX reference (correctness check only)
# ----------------------------------------------------------------------------
def reference_forward(params, x_nchw, *, in_channels, out_channels,
                      expand_ratio, stride=1):
    use_residual = (in_channels == out_channels) and stride == 1
    x = jnp.transpose(x_nchw, (0, 2, 3, 1))
    if expand_ratio != 1:
        y = jax.lax.conv_general_dilated(
            x, params["w1"], window_strides=(1, 1), padding=[(1, 1), (1, 1)],
            dimension_numbers=("NHWC", "HWIO", "NHWC"))
        y = y * params["s1"] + params["b1"]
        y = y * jax.nn.sigmoid(y)
        y = jnp.einsum("nhwc,co->nhwo", y, params["w2"])
        y = y * params["s2"] + params["b2"]
    else:
        y = jax.lax.conv_general_dilated(
            x, params["w"], window_strides=(1, 1), padding=[(1, 1), (1, 1)],
            dimension_numbers=("NHWC", "HWIO", "NHWC"))
        y = y * params["s"] + params["b"]
        y = y * jax.nn.sigmoid(y)
    if use_residual:
        y = y + y
    return jnp.transpose(y, (0, 3, 1, 2))


if __name__ == "__main__":
    key = jax.random.PRNGKey(0)
    kx, kp1, kp2 = jax.random.split(key, 3)

    # Config 1: expansion + residual path (the standard FuseMBConv shape).
    N, C_IN, H, W = 2, 4, 16, 16
    C_OUT, EXPAND, KSIZE, STRIDE = 4, 4, 3, 1
    x = jax.random.normal(kx, (N, C_IN, H, W), jnp.float32)   # NCHW like PyTorch
    params = init_fusembconv_params(kp1, C_IN, C_OUT, EXPAND, KSIZE)

    out = jax.block_until_ready(fusembconv_forward(
        params, x, in_channels=C_IN, out_channels=C_OUT,
        expand_ratio=EXPAND, stride=STRIDE))
    ref = jax.block_until_ready(reference_forward(
        params, x, in_channels=C_IN, out_channels=C_OUT,
        expand_ratio=EXPAND, stride=STRIDE))
    assert out.shape == (N, C_OUT, H, W), out.shape
    assert jnp.allclose(out, ref, atol=1e-4, rtol=1e-4), (
        float(jnp.max(jnp.abs(out - ref))))

    # Config 1b: same block with bf16 MXU operands (v6e/v7x fast path);
    # accumulation and the BN/SiLU epilogue remain f32.
    out_bf16 = jax.block_until_ready(fusembconv_forward(
        params, x, in_channels=C_IN, out_channels=C_OUT,
        expand_ratio=EXPAND, stride=STRIDE, compute_dtype=jnp.bfloat16))
    assert jnp.allclose(out_bf16, ref, atol=5e-2, rtol=5e-2), (
        float(jnp.max(jnp.abs(out_bf16 - ref))))

    # Config 2: no-expansion path (expand_ratio=1) + residual.
    params1 = init_fusembconv_params(kp2, C_IN, C_OUT, 1, KSIZE)
    out1 = jax.block_until_ready(fusembconv_forward(
        params1, x, in_channels=C_IN, out_channels=C_OUT,
        expand_ratio=1, stride=STRIDE))
    ref1 = jax.block_until_ready(reference_forward(
        params1, x, in_channels=C_IN, out_channels=C_OUT,
        expand_ratio=1, stride=STRIDE))
    assert jnp.allclose(out1, ref1, atol=1e-4, rtol=1e-4), (
        float(jnp.max(jnp.abs(out1 - ref1))))

    print("KERNEL_OK")
</pallas_src>

<mosaic_0001>
module attributes {stable_mosaic.version = 11 : i64} {
  func.func @_fused_expand_kernel(%arg0: i32, %arg1: memref<1x4x256xf32, #tpu.memory_space<vmem>>, %arg2: memref<36x16xf32, #tpu.memory_space<vmem>>, %arg3: memref<1x16xf32, #tpu.memory_space<vmem>>, %arg4: memref<1x16xf32, #tpu.memory_space<vmem>>, %arg5: memref<16x4xf32, #tpu.memory_space<vmem>>, %arg6: memref<1x4xf32, #tpu.memory_space<vmem>>, %arg7: memref<1x4xf32, #tpu.memory_space<vmem>>, %arg8: memref<1x4x256xf32, #tpu.memory_space<vmem>>, %arg9: memref<18x18x4xf32, #tpu.memory_space<vmem>>) attributes {dimension_semantics = [#tpu.dimension_semantics<parallel>], iteration_bounds = array<i64: 2>, scalar_prefetch = 0 : i64, scratch_operands = 1 : i64, tpu.core_type = #tpu.core_type<tc>, window_params = [{transform_indices = @transform_0, window_bounds = array<i64: 1, 4, 256>}, {pipeline_mode = #tpu.pipeline_mode<synchronous>, transform_indices = @transform_1, window_bounds = array<i64: 36, 16>}, {pipeline_mode = #tpu.pipeline_mode<synchronous>, transform_indices = @transform_2, window_bounds = array<i64: 1, 16>}, {pipeline_mode = #tpu.pipeline_mode<synchronous>, transform_indices = @transform_3, window_bounds = array<i64: 1, 16>}, {pipeline_mode = #tpu.pipeline_mode<synchronous>, transform_indices = @transform_4, window_bounds = array<i64: 16, 4>}, {pipeline_mode = #tpu.pipeline_mode<synchronous>, transform_indices = @transform_5, window_bounds = array<i64: 1, 4>}, {pipeline_mode = #tpu.pipeline_mode<synchronous>, transform_indices = @transform_6, window_bounds = array<i64: 1, 4>}, {transform_indices = @transform_7, window_bounds = array<i64: 1, 4, 256>}]} {
    %cst = arith.constant 0.000000e+00 : f32
    %0 = vector.broadcast %cst : f32 to vector<18x18x4xf32>
    %c0 = arith.constant 0 : index
    %c0_0 = arith.constant 0 : index
    %c0_1 = arith.constant 0 : index
    %1 = vector.load %arg9[%c0, %c0_0, %c0_1] : memref<18x18x4xf32, #tpu.memory_space<vmem>>, vector<18x18x4xf32>
    tpu.vector_store %arg9[%c0, %c0_0, %c0_1], %0 {strides = array<i32>} : memref<18x18x4xf32, #tpu.memory_space<vmem>>, vector<18x18x4xf32>,
    %c0_2 = arith.constant 0 : index
    %c0_3 = arith.constant 0 : index
    %c0_4 = arith.constant 0 : index
    %2 = vector.load %arg1[%c0_2, %c0_3, %c0_4] : memref<1x4x256xf32, #tpu.memory_space<vmem>>, vector<1x4x256xf32>
    %3 = vector.shape_cast %2 : vector<1x4x256xf32> to vector<4x256xf32>
    %4 = tpu.transpose %3, [1, 0] : vector<4x256xf32> -> vector<256x4xf32>
    %5 = vector.extract_strided_slice %4 {offsets = [0, 0], sizes = [16, 4], strides = [1, 1]} : vector<256x4xf32> to vector<16x4xf32>
    %c1 = arith.constant 1 : index
    %c1_5 = arith.constant 1 : index
    %c0_6 = arith.constant 0 : index
    %6 = vector.load %arg9[%c1, %c1_5, %c0_6] : memref<18x18x4xf32, #tpu.memory_space<vmem>>, vector<1x16x4xf32>
    %7 = vector.shape_cast %6 : vector<1x16x4xf32> to vector<16x4xf32>
    %8 = vector.shape_cast %5 : vector<16x4xf32> to vector<1x16x4xf32>
    tpu.vector_store %arg9[%c1, %c1_5, %c0_6], %8 {strides = array<i32>} : memref<18x18x4xf32, #tpu.memory_space<vmem>>, vector<1x16x4xf32>,
    %9 = vector.extract_strided_slice %4 {offsets = [16, 0], sizes = [16, 4], strides = [1, 1]} : vector<256x4xf32> to vector<16x4xf32>
    %c2 = arith.constant 2 : index
    %c1_7 = arith.constant 1 : index
    %c0_8 = arith.constant 0 : index
    %10 = vector.load %arg9[%c2, %c1_7, %c0_8] : memref<18x18x4xf32, #tpu.memory_space<vmem>>, vector<1x16x4xf32>
    %11 = vector.shape_cast %10 : vector<1x16x4xf32> to vector<16x4xf32>
    %12 = vector.shape_cast %9 : vector<16x4xf32> to vector<1x16x4xf32>
    tpu.vector_store %arg9[%c2, %c1_7, %c0_8], %12 {strides = array<i32>} : memref<18x18x4xf32, #tpu.memory_space<vmem>>, vector<1x16x4xf32>,
    %13 = vector.extract_strided_slice %4 {offsets = [32, 0], sizes = [16, 4], strides = [1, 1]} : vector<256x4xf32> to vector<16x4xf32>
    %c3 = arith.constant 3 : index
    %c1_9 = arith.constant 1 : index
    %c0_10 = arith.constant 0 : index
    %14 = vector.load %arg9[%c3, %c1_9, %c0_10] : memref<18x18x4xf32, #tpu.memory_space<vmem>>, vector<1x16x4xf32>
    %15 = vector.shape_cast %14 : vector<1x16x4xf32> to vector<16x4xf32>
    %16 = vector.shape_cast %13 : vector<16x4xf32> to vector<1x16x4xf32>
    tpu.vector_store %arg9[%c3, %c1_9, %c0_10], %16 {strides = array<i32>} : memref<18x18x4xf32, #tpu.memory_space<vmem>>, vector<1x16x4xf32>,
    %17 = vector.extract_strided_slice %4 {offsets = [48, 0], sizes = [16, 4], strides = [1, 1]} : vector<256x4xf32> to vector<16x4xf32>
    %c4 = arith.constant 4 : index
    %c1_11 = arith.constant 1 : index
    %c0_12 = arith.constant 0 : index
    %18 = vector.load %arg9[%c4, %c1_11, %c0_12] : memref<18x18x4xf32, #tpu.memory_space<vmem>>, vector<1x16x4xf32>
    %19 = vector.shape_cast %18 : vector<1x16x4xf32> to vector<16x4xf32>
    %20 = vector.shape_cast %17 : vector<16x4xf32> to vector<1x16x4xf32>
    tpu.vector_store %arg9[%c4, %c1_11, %c0_12], %20 {strides = array<i32>} : memref<18x18x4xf32, #tpu.memory_space<vmem>>, vector<1x16x4xf32>,
    %21 = vector.extract_strided_slice %4 {offsets = [64, 0], sizes = [16, 4], strides = [1, 1]} : vector<256x4xf32> to vector<16x4xf32>
    %c5 = arith.constant 5 : index
    %c1_13 = arith.constant 1 : index
    %c0_14 = arith.constant 0 : index
    %22 = vector.load %arg9[%c5, %c1_13, %c0_14] : memref<18x18x4xf32, #tpu.memory_space<vmem>>, vector<1x16x4xf32>
    %23 = vector.shape_cast %22 : vector<1x16x4xf32> to vector<16x4xf32>
    %24 = vector.shape_cast %21 : vector<16x4xf32> to vector<1x16x4xf32>
    tpu.vector_store %arg9[%c5, %c1_13, %c0_14], %24 {strides = array<i32>} : memref<18x18x4xf32, #tpu.memory_space<vmem>>, vector<1x16x4xf32>,
    %25 = vector.extract_strided_slice %4 {offsets = [80, 0], sizes = [16, 4], strides = [1, 1]} : vector<256x4xf32> to vector<16x4xf32>
    %c6 = arith.constant 6 : index
    %c1_15 = arith.constant 1 : index
    %c0_16 = arith.constant 0 : index
    %26 = vector.load %arg9[%c6, %c1_15, %c0_16] : memref<18x18x4xf32, #tpu.memory_space<vmem>>, vector<1x16x4xf32>
    %27 = vector.shape_cast %26 : vector<1x16x4xf32> to vector<16x4xf32>
    %28 = vector.shape_cast %25 : vector<16x4xf32> to vector<1x16x4xf32>
    tpu.vector_store %arg9[%c6, %c1_15, %c0_16], %28 {strides = array<i32>} : memref<18x18x4xf32, #tpu.memory_space<vmem>>, vector<1x16x4xf32>,
    %29 = vector.extract_strided_slice %4 {offsets = [96, 0], sizes = [16, 4], strides = [1, 1]} : vector<256x4xf32> to vector<16x4xf32>
    %c7 = arith.constant 7 : index
    %c1_17 = arith.constant 1 : index
    %c0_18 = arith.constant 0 : index
    %30 = vector.load %arg9[%c7, %c1_17, %c0_18] : memref<18x18x4xf32, #tpu.memory_space<vmem>>, vector<1x16x4xf32>
    %31 = vector.shape_cast %30 : vector<1x16x4xf32> to vector<16x4xf32>
    %32 = vector.shape_cast %29 : vector<16x4xf32> to vector<1x16x4xf32>
    tpu.vector_store %arg9[%c7, %c1_17, %c0_18], %32 {strides = array<i32>} : memref<18x18x4xf32, #tpu.memory_space<vmem>>, vector<1x16x4xf32>,
    %33 = vector.extract_strided_slice %4 {offsets = [112, 0], sizes = [16, 4], strides = [1, 1]} : vector<256x4xf32> to vector<16x4xf32>
    %c8 = arith.constant 8 : index
    %c1_19 = arith.constant 1 : index
    %c0_20 = arith.constant 0 : index
    %34 = vector.load %arg9[%c8, %c1_19, %c0_20] : memref<18x18x4xf32, #tpu.memory_space<vmem>>, vector<1x16x4xf32>
    %35 = vector.shape_cast %34 : vector<1x16x4xf32> to vector<16x4xf32>
    %36 = vector.shape_cast %33 : vector<16x4xf32> to vector<1x16x4xf32>
    tpu.vector_store %arg9[%c8, %c1_19, %c0_20], %36 {strides = array<i32>} : memref<18x18x4xf32, #tpu.memory_space<vmem>>, vector<1x16x4xf32>,
    %37 = vector.extract_strided_slice %4 {offsets = [128, 0], sizes = [16, 4], strides = [1, 1]} : vector<256x4xf32> to vector<16x4xf32>
    %c9 = arith.constant 9 : index
    %c1_21 = arith.constant 1 : index
    %c0_22 = arith.constant 0 : index
    %38 = vector.load %arg9[%c9, %c1_21, %c0_22] : memref<18x18x4xf32, #tpu.memory_space<vmem>>, vector<1x16x4xf32>
    %39 = vector.shape_cast %38 : vector<1x16x4xf32> to vector<16x4xf32>
    %40 = vector.shape_cast %37 : vector<16x4xf32> to vector<1x16x4xf32>
    tpu.vector_store %arg9[%c9, %c1_21, %c0_22], %40 {strides = array<i32>} : memref<18x18x4xf32, #tpu.memory_space<vmem>>, vector<1x16x4xf32>,
    %41 = vector.extract_strided_slice %4 {offsets = [144, 0], sizes = [16, 4], strides = [1, 1]} : vector<256x4xf32> to vector<16x4xf32>
    %c10 = arith.constant 10 : index
    %c1_23 = arith.constant 1 : index
    %c0_24 = arith.constant 0 : index
    %42 = vector.load %arg9[%c10, %c1_23, %c0_24] : memref<18x18x4xf32, #tpu.memory_space<vmem>>, vector<1x16x4xf32>
    %43 = vector.shape_cast %42 : vector<1x16x4xf32> to vector<16x4xf32>
    %44 = vector.shape_cast %41 : vector<16x4xf32> to vector<1x16x4xf32>
    tpu.vector_store %arg9[%c10, %c1_23, %c0_24], %44 {strides = array<i32>} : memref<18x18x4xf32, #tpu.memory_space<vmem>>, vector<1x16x4xf32>,
    %45 = vector.extract_strided_slice %4 {offsets = [160, 0], sizes = [16, 4], strides = [1, 1]} : vector<256x4xf32> to vector<16x4xf32>
    %c11 = arith.constant 11 : index
    %c1_25 = arith.constant 1 : index
    %c0_26 = arith.constant 0 : index
    %46 = vector.load %arg9[%c11, %c1_25, %c0_26] : memref<18x18x4xf32, #tpu.memory_space<vmem>>, vector<1x16x4xf32>
    %47 = vector.shape_cast %46 : vector<1x16x4xf32> to vector<16x4xf32>
    %48 = vector.shape_cast %45 : vector<16x4xf32> to vector<1x16x4xf32>
    tpu.vector_store %arg9[%c11, %c1_25, %c0_26], %48 {strides = array<i32>} : memref<18x18x4xf32, #tpu.memory_space<vmem>>, vector<1x16x4xf32>,
    %49 = vector.extract_strided_slice %4 {offsets = [176, 0], sizes = [16, 4], strides = [1, 1]} : vector<256x4xf32> to vector<16x4xf32>
    %c12 = arith.constant 12 : index
    %c1_27 = arith.constant 1 : index
    %c0_28 = arith.constant 0 : index
    %50 = vector.load %arg9[%c12, %c1_27, %c0_28] : memref<18x18x4xf32, #tpu.memory_space<vmem>>, vector<1x16x4xf32>
    %51 = vector.shape_cast %50 : vector<1x16x4xf32> to vector<16x4xf32>
    %52 = vector.shape_cast %49 : vector<16x4xf32> to vector<1x16x4xf32>
    tpu.vector_store %arg9[%c12, %c1_27, %c0_28], %52 {strides = array<i32>} : memref<18x18x4xf32, #tpu.memory_space<vmem>>, vector<1x16x4xf32>,
    %53 = vector.extract_strided_slice %4 {offsets = [192, 0], sizes = [16, 4], strides = [1, 1]} : vector<256x4xf32> to vector<16x4xf32>
    %c13 = arith.constant 13 : index
    %c1_29 = arith.constant 1 : index
    %c0_30 = arith.constant 0 : index
    %54 = vector.load %arg9[%c13, %c1_29, %c0_30] : memref<18x18x4xf32, #tpu.memory_space<vmem>>, vector<1x16x4xf32>
    %55 = vector.shape_cast %54 : vector<1x16x4xf32> to vector<16x4xf32>
    %56 = vector.shape_cast %53 : vector<16x4xf32> to vector<1x16x4xf32>
    tpu.vector_store %arg9[%c13, %c1_29, %c0_30], %56 {strides = array<i32>} : memref<18x18x4xf32, #tpu.memory_space<vmem>>, vector<1x16x4xf32>,
    %57 = vector.extract_strided_slice %4 {offsets = [208, 0], sizes = [16, 4], strides = [1, 1]} : vector<256x4xf32> to vector<16x4xf32>
    %c14 = arith.constant 14 : index
    %c1_31 = arith.constant 1 : index
    %c0_32 = arith.constant 0 : index
    %58 = vector.load %arg9[%c14, %c1_31, %c0_32] : memref<18x18x4xf32, #tpu.memory_space<vmem>>, vector<1x16x4xf32>
    %59 = vector.shape_cast %58 : vector<1x16x4xf32> to vector<16x4xf32>
    %60 = vector.shape_cast %57 : vector<16x4xf32> to vector<1x16x4xf32>
    tpu.vector_store %arg9[%c14, %c1_31, %c0_32], %60 {strides = array<i32>} : memref<18x18x4xf32, #tpu.memory_space<vmem>>, vector<1x16x4xf32>,
    %61 = vector.extract_strided_slice %4 {offsets = [224, 0], sizes = [16, 4], strides = [1, 1]} : vector<256x4xf32> to vector<16x4xf32>
    %c15 = arith.constant 15 : index
    %c1_33 = arith.constant 1 : index
    %c0_34 = arith.constant 0 : index
    %62 = vector.load %arg9[%c15, %c1_33, %c0_34] : memref<18x18x4xf32, #tpu.memory_space<vmem>>, vector<1x16x4xf32>
    %63 = vector.shape_cast %62 : vector<1x16x4xf32> to vector<16x4xf32>
    %64 = vector.shape_cast %61 : vector<16x4xf32> to vector<1x16x4xf32>
    tpu.vector_store %arg9[%c15, %c1_33, %c0_34], %64 {strides = array<i32>} : memref<18x18x4xf32, #tpu.memory_space<vmem>>, vector<1x16x4xf32>,
    %65 = vector.extract_strided_slice %4 {offsets = [240, 0], sizes = [16, 4], strides = [1, 1]} : vector<256x4xf32> to vector<16x4xf32>
    %c16 = arith.constant 16 : index
    %c1_35 = arith.constant 1 : index
    %c0_36 = arith.constant 0 : index
    %66 = vector.load %arg9[%c16, %c1_35, %c0_36] : memref<18x18x4xf32, #tpu.memory_space<vmem>>, vector<1x16x4xf32>
    %67 = vector.shape_cast %66 : vector<1x16x4xf32> to vector<16x4xf32>
    %68 = vector.shape_cast %65 : vector<16x4xf32> to vector<1x16x4xf32>
    tpu.vector_store %arg9[%c16, %c1_35, %c0_36], %68 {strides = array<i32>} : memref<18x18x4xf32, #tpu.memory_space<vmem>>, vector<1x16x4xf32>,
    %c0_37 = arith.constant 0 : index
    %c0_38 = arith.constant 0 : index
    %c0_39 = arith.constant 0 : index
    %69 = vector.load %arg9[%c0_37, %c0_38, %c0_39] : memref<18x18x4xf32, #tpu.memory_space<vmem>>, vector<16x16x4xf32>
    %70 = vector.shape_cast %69 : vector<16x16x4xf32> to vector<256x4xf32>
    %c0_40 = arith.constant 0 : index
    %c1_41 = arith.constant 1 : index
    %c0_42 = arith.constant 0 : index
    %71 = vector.load %arg9[%c0_40, %c1_41, %c0_42] : memref<18x18x4xf32, #tpu.memory_space<vmem>>, vector<16x16x4xf32>
    %72 = vector.shape_cast %71 : vector<16x16x4xf32> to vector<256x4xf32>
    %c0_43 = arith.constant 0 : index
    %c2_44 = arith.constant 2 : index
    %c0_45 = arith.constant 0 : index
    %73 = vector.load %arg9[%c0_43, %c2_44, %c0_45] : memref<18x18x4xf32, #tpu.memory_space<vmem>>, vector<16x16x4xf32>
    %74 = vector.shape_cast %73 : vector<16x16x4xf32> to vector<256x4xf32>
    %c1_46 = arith.constant 1 : index
    %c0_47 = arith.constant 0 : index
    %c0_48 = arith.constant 0 : index
    %75 = vector.load %arg9[%c1_46, %c0_47, %c0_48] : memref<18x18x4xf32, #tpu.memory_space<vmem>>, vector<16x16x4xf32>
    %76 = vector.shape_cast %75 : vector<16x16x4xf32> to vector<256x4xf32>
    %c1_49 = arith.constant 1 : index
    %c1_50 = arith.constant 1 : index
    %c0_51 = arith.constant 0 : index
    %77 = vector.load %arg9[%c1_49, %c1_50, %c0_51] : memref<18x18x4xf32, #tpu.memory_space<vmem>>, vector<16x16x4xf32>
    %78 = vector.shape_cast %77 : vector<16x16x4xf32> to vector<256x4xf32>
    %c1_52 = arith.constant 1 : index
    %c2_53 = arith.constant 2 : index
    %c0_54 = arith.constant 0 : index
    %79 = vector.load %arg9[%c1_52, %c2_53, %c0_54] : memref<18x18x4xf32, #tpu.memory_space<vmem>>, vector<16x16x4xf32>
    %80 = vector.shape_cast %79 : vector<16x16x4xf32> to vector<256x4xf32>
    %c2_55 = arith.constant 2 : index
    %c0_56 = arith.constant 0 : index
    %c0_57 = arith.constant 0 : index
    %81 = vector.load %arg9[%c2_55, %c0_56, %c0_57] : memref<18x18x4xf32, #tpu.memory_space<vmem>>, vector<16x16x4xf32>
    %82 = vector.shape_cast %81 : vector<16x16x4xf32> to vector<256x4xf32>
    %c2_58 = arith.constant 2 : index
    %c1_59 = arith.constant 1 : index
    %c0_60 = arith.constant 0 : index
    %83 = vector.load %arg9[%c2_58, %c1_59, %c0_60] : memref<18x18x4xf32, #tpu.memory_space<vmem>>, vector<16x16x4xf32>
    %84 = vector.shape_cast %83 : vector<16x16x4xf32> to vector<256x4xf32>
    %c2_61 = arith.constant 2 : index
    %c2_62 = arith.constant 2 : index
    %c0_63 = arith.constant 0 : index
    %85 = vector.load %arg9[%c2_61, %c2_62, %c0_63] : memref<18x18x4xf32, #tpu.memory_space<vmem>>, vector<16x16x4xf32>
    %86 = vector.shape_cast %85 : vector<16x16x4xf32> to vector<256x4xf32>
    %87 = tpu.concatenate %70, %72, %74, %76, %78, %80, %82, %84, %86 in 1 : vector<256x4xf32>, vector<256x4xf32>, vector<256x4xf32>, vector<256x4xf32>, vector<256x4xf32>, vector<256x4xf32>, vector<256x4xf32>, vector<256x4xf32>, vector<256x4xf32> -> vector<256x36xf32>
    %c0_64 = arith.constant 0 : index
    %c0_65 = arith.constant 0 : index
    %88 = vector.load %arg2[%c0_64, %c0_65] : memref<36x16xf32, #tpu.memory_space<vmem>>, vector<36x16xf32>
    %cst_66 = arith.constant dense<0.000000e+00> : vector<256x16xf32>
    %89 = tpu.matmul %87, %88, %cst_66 {dimension_numbers = #tpu.dot_dimension_numbers<[1], [0], [0], [1], [0, 0, 1, 1], [], []>} : vector<256x36xf32>, vector<36x16xf32>, vector<256x16xf32> -> vector<256x16xf32>
    %c0_67 = arith.constant 0 : index
    %c0_68 = arith.constant 0 : index
    %90 = vector.load %arg3[%c0_67, %c0_68] : memref<1x16xf32, #tpu.memory_space<vmem>>, vector<1x16xf32>
    %91 = vector.shape_cast %90 : vector<1x16xf32> to vector<16xf32>
    %92 = vector.shape_cast %91 : vector<16xf32> to vector<1x16xf32>
    %93 = vector.broadcast %92 : vector<1x16xf32> to vector<256x16xf32>
    %94 = arith.mulf %89, %93 : vector<256x16xf32>
    %c0_69 = arith.constant 0 : index
    %c0_70 = arith.constant 0 : index
    %95 = vector.load %arg4[%c0_69, %c0_70] : memref<1x16xf32, #tpu.memory_space<vmem>>, vector<1x16xf32>
    %96 = vector.shape_cast %95 : vector<1x16xf32> to vector<16xf32>
    %97 = vector.shape_cast %96 : vector<16xf32> to vector<1x16xf32>
    %98 = vector.broadcast %97 : vector<1x16xf32> to vector<256x16xf32>
    %99 = arith.addf %94, %98 : vector<256x16xf32>
    %100 = arith.negf %99 : vector<256x16xf32>
    %101 = math.exp %100 : vector<256x16xf32>
    %cst_71 = arith.constant 1.000000e+00 : f32
    %102 = vector.broadcast %cst_71 : f32 to vector<256x16xf32>
    %103 = arith.addf %102, %101 : vector<256x16xf32>
    %104 = arith.divf %102, %103 : vector<256x16xf32>
    %105 = arith.mulf %99, %104 : vector<256x16xf32>
    %c0_72 = arith.constant 0 : index
    %c0_73 = arith.constant 0 : index
    %106 = vector.load %arg5[%c0_72, %c0_73] : memref<16x4xf32, #tpu.memory_space<vmem>>, vector<16x4xf32>
    %cst_74 = arith.constant dense<0.000000e+00> : vector<256x4xf32>
    %107 = tpu.matmul %105, %106, %cst_74 {dimension_numbers = #tpu.dot_dimension_numbers<[1], [0], [0], [1], [0, 0, 1, 1], [], []>} : vector<256x16xf32>, vector<16x4xf32>, vector<256x4xf32> -> vector<256x4xf32>
    %c0_75 = arith.constant 0 : index
    %c0_76 = arith.constant 0 : index
    %108 = vector.load %arg6[%c0_75, %c0_76] : memref<1x4xf32, #tpu.memory_space<vmem>>, vector<1x4xf32>
    %109 = vector.shape_cast %108 : vector<1x4xf32> to vector<4xf32>
    %110 = vector.shape_cast %109 : vector<4xf32> to vector<1x4xf32>
    %111 = vector.broadcast %110 : vector<1x4xf32> to vector<256x4xf32>
    %112 = arith.mulf %107, %111 : vector<256x4xf32>
    %c0_77 = arith.constant 0 : index
    %c0_78 = arith.constant 0 : index
    %113 = vector.load %arg7[%c0_77, %c0_78] : memref<1x4xf32, #tpu.memory_space<vmem>>, vector<1x4xf32>
    %114 = vector.shape_cast %113 : vector<1x4xf32> to vector<4xf32>
    %115 = vector.shape_cast %114 : vector<4xf32> to vector<1x4xf32>
    %116 = vector.broadcast %115 : vector<1x4xf32> to vector<256x4xf32>
    %117 = arith.addf %112, %116 : vector<256x4xf32>
    %118 = arith.addf %117, %117 : vector<256x4xf32>
    %119 = tpu.transpose %118, [1, 0] : vector<256x4xf32> -> vector<4x256xf32>
    %c0_79 = arith.constant 0 : index
    %c0_80 = arith.constant 0 : index
    %c0_81 = arith.constant 0 : index
    %120 = vector.load %arg8[%c0_79, %c0_80, %c0_81] : memref<1x4x256xf32, #tpu.memory_space<vmem>>, vector<1x4x256xf32>
    %121 = vector.shape_cast %120 : vector<1x4x256xf32> to vector<4x256xf32>
    %122 = vector.shape_cast %119 : vector<4x256xf32> to vector<1x4x256xf32>
    tpu.vector_store %arg8[%c0_79, %c0_80, %c0_81], %122 {strides = array<i32>} : memref<1x4x256xf32, #tpu.memory_space<vmem>>, vector<1x4x256xf32>,
    return
  }
  func.func @transform_0(%arg0: i32) -> (i32, i32, i32) {
    %c0_i32 = arith.constant 0 : i32
    %c0_i32_0 = arith.constant 0 : i32
    %c0_i32_1 = arith.constant 0 : i32
    return %arg0, %c0_i32, %c0_i32_0 : i32, i32, i32
  }
  func.func @transform_1(%arg0: i32) -> (i32, i32) {
    %c0_i32 = arith.constant 0 : i32
    %c0_i32_0 = arith.constant 0 : i32
    %c0_i32_1 = arith.constant 0 : i32
    return %c0_i32, %c0_i32_0 : i32, i32
  }
  func.func @transform_2(%arg0: i32) -> (i32, i32) {
    %c0_i32 = arith.constant 0 : i32
    %c0_i32_0 = arith.constant 0 : i32
    %c0_i32_1 = arith.constant 0 : i32
    return %c0_i32, %c0_i32_0 : i32, i32
  }
  func.func @transform_3(%arg0: i32) -> (i32, i32) {
    %c0_i32 = arith.constant 0 : i32
    %c0_i32_0 = arith.constant 0 : i32
    %c0_i32_1 = arith.constant 0 : i32
    return %c0_i32, %c0_i32_0 : i32, i32
  }
  func.func @transform_4(%arg0: i32) -> (i32, i32) {
    %c0_i32 = arith.constant 0 : i32
    %c0_i32_0 = arith.constant 0 : i32
    %c0_i32_1 = arith.constant 0 : i32
    return %c0_i32, %c0_i32_0 : i32, i32
  }
  func.func @transform_5(%arg0: i32) -> (i32, i32) {
    %c0_i32 = arith.constant 0 : i32
    %c0_i32_0 = arith.constant 0 : i32
    %c0_i32_1 = arith.constant 0 : i32
    return %c0_i32, %c0_i32_0 : i32, i32
  }
  func.func @transform_6(%arg0: i32) -> (i32, i32) {
    %c0_i32 = arith.constant 0 : i32
    %c0_i32_0 = arith.constant 0 : i32
    %c0_i32_1 = arith.constant 0 : i32
    return %c0_i32, %c0_i32_0 : i32, i32
  }
  func.func @transform_7(%arg0: i32) -> (i32, i32, i32) {
    %c0_i32 = arith.constant 0 : i32
    %c0_i32_0 = arith.constant 0 : i32
    %c0_i32_1 = arith.constant 0 : i32
    return %arg0, %c0_i32, %c0_i32_0 : i32, i32, i32
  }
}

</mosaic_0001>

<bundles_post_ra>
// kernel: tpu_custom_call.1
= control target key start
LH: loop header
LB: loop body
LE: loop exit
PB: predicated region body
PF: predicated region fallthrough
CT: control target
= control target key end

     0   :  { %12 = vsyncpa [#allocation4], 0  ;;  %s5580_s0 = inlined_call_operand.vmem [shape: f32[2,4,256], index: 0, kind: input, shape index: {}]   ;;  %s5581_s1 = inlined_call_operand.vmem [shape: f32[36,16], index: 1, kind: input, shape index: {}]   ;;  %s5582_s2 = inlined_call_operand.vmem [shape: f32[1,16], index: 2, kind: input, shape index: {}]   ;;  %s5583_s3 = inlined_call_operand.vmem [shape: f32[1,16], index: 3, kind: input, shape index: {}]   ;;  %s5584_s4 = inlined_call_operand.vmem [shape: f32[16,4], index: 4, kind: input, shape index: {}]   ;;  %s5585_s5 = inlined_call_operand.vmem [shape: f32[1,4], index: 5, kind: input, shape index: {}]   ;;  %s5586_s6 = inlined_call_operand.vmem [shape: f32[1,4], index: 6, kind: input, shape index: {}]   ;;  %s5587_s7 = inlined_call_operand.hbm [shape: f32[2,4,256], index: 7, kind: output, shape index: {}]  }
   0x1   :  { %14 = vsyncpa [#allocation4 + $0x1], 0  ;;  %s3834_s24 = smov 0   ;;  %s3836_s25 = smov 0  }
   0x2   :  { %s3838_s26 = smov 0   ;;  %s3840_s27 = smov 0  }
   0x3 LB: > { %s3855_s28 = sadd.s32 4294967295, %s3782_s27   ;;  %s3233_s29 = sadd.s32 4294967294, %s3782_s27   ;;  %s3782_s27 = sphi %s3840_s27, %s5648_s27   ;;  %s3778_s26 = sphi %s3838_s26, %s5647_s26   ;;  %s3774_s25 = sphi %s3836_s25, %s5646_s25   ;;  %s3770_s24 = sphi %s3834_s24, %s5645_s24  }
   0x4   : > { %s3859_s30 = sadd.s32 1, %s3782_s27   ;;  %s179_s8 = sadd.s32 1, %s3778_s26 }
   0x5   : > { %s176_s9 = ssub.s32 %s3782_s27, %s3859_s30  ;;  %p189_p0 = scmp.ne.s32.totalorder %s3778_s26, %s3774_s25 }
   0x6   : > { %p177_p1 = scmp.eq.s32.totalorder %s176_s9, 0  ;;  %p190_p2 = scmp.eq.s32.totalorder %s3855_s28, 1 }
   0x7   : > { %p195_p3 = scmp.ne.s32.totalorder %s3774_s25, %s3770_s24  ;;  %p196_p4 = scmp.eq.s32.totalorder %s3233_s29, 1 }
   0x8   : > { %s3870_s10 = scalar_select %p177_p1, %s3778_s26, %s179_s8  }
   0x9   : > { %p3872_p5 = por %p190_p2, %p189_p0  ;;  %p3876_p6 = por %p196_p4, %p195_p3 }
   0xa   : > { %p3236_p7 = scmp.ge.s32.totalorder %s3782_s27, 1  ;;  %p240_p8 = scmp.lt.s32.totalorder %s3782_s27, 3 }
   0xc   : > { %p241_p9 = pnand %p3236_p7, %p240_p8 }
   0xe   : > { %244 = sbr.rel (%p241_p9) target bundleno = 1410 (0x582), region = 48 }
  0x15   : > { %p272_p10 = scmp.lt.s32.totalorder %s3855_s28, 1  ;;  %vm277_vm0 = vcmask 31744   ;;  %vm280_vm1 = vcmask 25600   ;;  %v3784_v0 = vmov 0.0   ;;  %s3785_s18 = smov 4   ;;  %v2024_v39 = vld [vmem:[%s5581_s1] sm:$0xff] }
  0x16   : > { %278 = vst.msk [vmem:[#allocation2] sm:$0xff] %vm277_vm0, %v3784_v0  ;;  %279 = vst.msk [vmem:[#allocation2 + $0x8] sm:$0xff] %vm277_vm0, %v3784_v0  ;;  %s3786_s19 = smov 8   ;;  %s3787_s20 = smov 12   ;;  %v2025_v40 = vld [vmem:[%s5581_s1 + $0x8] sm:$0xff]  ;;  %v2026_v43 = vld [vmem:[%s5581_s1 + $0x10] sm:$0xff] }
  0x17   : > { %282 = vst.msk [vmem:[#allocation2 + $0x18] sm:$0xff] %vm277_vm0, %v3784_v0  ;;  %283 = vst.msk [vmem:[#allocation2 + $0x20] sm:$0xff] %vm277_vm0, %v3784_v0  ;;  %s273_s13 = scalar_select %p272_p10, %s3855_s28, 1  ;;  %v3529_v41 = vpack.c.bf16 %v2025_v40, %v2024_v39  ;;  %v2027_v44 = vld [vmem:[%s5581_s1 + $0x18] sm:$0xff]  ;;  %v2028_v49 = vld [vmem:[%s5581_s1 + $0x20] sm:$0xf] }
  0x18   : > { %285 = vst.msk [vmem:[#allocation2 + $0x30] sm:$0xff] %vm277_vm0, %v3784_v0  ;;  %286 = vst.msk [vmem:[#allocation2 + $0x38] sm:$0xff] %vm277_vm0, %v3784_v0  ;;  %s3788_s21 = smov 16   ;;  %s3789_s22 = smov 20   ;;  %v3533_v45 = vpack.c.bf16 %v2027_v44, %v2026_v43  ;;  %vm2126_vm2 = vcmask 1043456   ;;  %vm1793_vm3 = vcmask 64512  }
  0x19   : > { %288 = vst.msk [vmem:[#allocation2 + $0x48] sm:$0xff] %vm277_vm0, %v3784_v0  ;;  %289 = vst.msk [vmem:[#allocation2 + $0x50] sm:$0xff] %vm277_vm0, %v3784_v0  ;;  %s3346_s14 = sshll.u32 %s273_s13, 3  ;;  %s3790_s23 = smov 28   ;;  %3530 = vmatprep.subr.bf16.mxu0 %v3529_v41  ;;  %vm1826_vm4 = vcmask 97280   ;;  %vm1859_vm5 = vcmask 130048  }
  0x1a   : > { %291 = vst.msk [vmem:[#allocation2 + $0x60] sm:$0xff] %vm277_vm0, %v3784_v0  ;;  %292 = vst.msk [vmem:[#allocation2 + $0x68] sm:$0xff] %vm277_vm0, %v3784_v0  ;;  %s276_s17 = scalar_lea.vmem %s5580_s0, %s3346_s14  ;;  %s3791_s29 = smov 24   ;;  %3532 = vmatpush3.bf16.msra.mxu0 %v3529_v41  ;;  %vm1892_vm6 = vcmask 162816   ;;  %vm1925_vm7 = vcmask 195584   ;;  %vm1958_vm8 = vcmask 228352  }
  0x1b   : > { %294 = vst.msk [vmem:[#allocation2 + $0x78] sm:$0xff] %vm277_vm0, %v3784_v0  ;;  %295 = vst.msk [vmem:[#allocation2 + $0x80] sm:$0xff] %vm277_vm0, %v3784_v0  ;;  %v333_v1 = vld [vmem:[%s276_s17] sm:$0xff]  ;;  %s3792_s8 = smov 32   ;;  %3534 = vmatprep.subr.bf16.mxu0 %v3533_v45  ;;  %vm1991_vm9 = vcmask 261120   ;;  %vm2029_vm10 = vcmask 293888  }
  0x1c   : > { %297 = vst.msk [vmem:[#allocation2 + $0x90] sm:$0xff] %vm277_vm0, %v3784_v0  ;;  %298 = vst.msk [vmem:[#allocation2 + $0x98] sm:$0xff] %vm277_vm0, %v3784_v0  ;;  %337 = vxpose.xlu0.b32.start.end [1/1] (short) %v333_v1, 128  ;;  %v335_v6 = vcombine.high %v333_v1, %v333_v1  ;;  %s269_s9 = sand.u32 1, %s3774_s25   ;;  %s3347_s14 = sshll.u32 %s3855_s28, 7 }
  0x1d   : > { %300 = vst.msk [vmem:[#allocation2 + $0xa8] sm:$0xff] %vm277_vm0, %v3784_v0  ;;  %301 = vst.msk [vmem:[#allocation2 + $0xb0] sm:$0xff] %vm277_vm0, %v3784_v0  ;;  %v481_v2 = vld [vmem:[#allocation2 + $0x1] sm:$0xff]  ;;  %s3237_s13 = sshll.u32 %s269_s9, 3  ;;  %s3793_s28 = smov [#allocation3]  }
  0x1e   : > { %303 = vst.msk [vmem:[#allocation2 + $0xc0] sm:$0xff] %vm277_vm0, %v3784_v0  ;;  %304 = vst.msk [vmem:[#allocation2 + $0xc8] sm:$0xff] %vm277_vm0, %v3784_v0  ;;  %769 = vrot.lane.b32.xlu1 %v481_v2, %s3785_s18  ;;  %v513_v4 = vld [vmem:[#allocation2 + $0x2] sm:$0xff]  ;;  %3536 = vmatpush3.bf16.msra.mxu0 %v3533_v45  ;;  %s271_s15 = scalar_lea.vmem [#allocation3], %s3237_s13 }
  0x1f   : > { %306 = vst.msk [vmem:[#allocation2 + $0xd8] sm:$0xff] %vm277_vm0, %v3784_v0  ;;  %307 = vst.msk [vmem:[#allocation2 + $0xe0] sm:$0xff] %vm277_vm0, %v3784_v0  ;;  %3427 = vmatprep.subr.msk.mxu0 %vm2126_vm2, %v2028_v49  ;;  %s3174_s16 = sshll.u32 %s271_s15, 4  ;;  %s5540_s16 = int_to_ptr.vmem [resolvable:$true] %s3174_s16 }
  0x20   : > { %309 = vst.msk [vmem:[#allocation2 + $0xf0] sm:$0xff] %vm277_vm0, %v3784_v0  ;;  %310 = vst.msk [vmem:[#allocation2 + $0xf8] sm:$0xff] %vm277_vm0, %v3784_v0 }
  0x21   : > { %312 = vst.msk [vmem:[#allocation2 + $0x108] sm:$0xff] %vm277_vm0, %v3784_v0  ;;  %313 = vst.msk [vmem:[#allocation2 + $0x110] sm:$0xff] %vm277_vm0, %v3784_v0 }
  0x22   : > { %315 = vst.msk [vmem:[#allocation2 + $0x120] sm:$0xff] %vm277_vm0, %v3784_v0  ;;  %316 = vst.msk [vmem:[#allocation2 + $0x128] sm:$0xff] %vm277_vm0, %v3784_v0  ;;  %3428 = vmatpush3.msk.msra.mxu0 %vm2126_vm2, %v2028_v49 }
  0x23   : > { %318 = vst.msk [vmem:[#allocation2 + $0x138] sm:$0xff] %vm277_vm0, %v3784_v0  ;;  %319 = vst.msk [vmem:[#allocation2 + $0x140] sm:$0xff] %vm277_vm0, %v3784_v0 }
  0x24   : > { %321 = vst.msk [vmem:[#allocation2 + $0x150] sm:$0xff] %vm277_vm0, %v3784_v0  ;;  %322 = vst.msk [vmem:[#allocation2 + $0x158] sm:$0xff] %vm277_vm0, %v3784_v0 }
  0x25   : > { %324 = vst.msk [vmem:[#allocation2 + $0x168] sm:$0xff] %vm277_vm0, %v3784_v0  ;;  %325 = vst.msk [vmem:[#allocation2 + $0x170] sm:$0xff] %vm277_vm0, %v3784_v0 }
  0x26   : > { %327 = vst.msk [vmem:[#allocation2 + $0x180] sm:$0xff] %vm277_vm0, %v3784_v0  ;;  %328 = vst.msk [vmem:[#allocation2 + $0x188] sm:$0xff] %vm277_vm0, %v3784_v0 }
  0x27   : > { %330 = vst.msk [vmem:[#allocation2 + $0x198] sm:$0xff] %vm277_vm0, %v3784_v0  ;;  %331 = vst.msk [vmem:[#allocation2 + $0x1a0] sm:$0xff] %vm277_vm0, %v3784_v0 }
  0x28   : > { %281 = vst.msk [vmem:[#allocation2 + $0x10] sm:$0x3] %vm280_vm1, %v3784_v0  ;;  %284 = vst.msk [vmem:[#allocation2 + $0x28] sm:$0x3] %vm280_vm1, %v3784_v0 }
  0x29   : > { %287 = vst.msk [vmem:[#allocation2 + $0x40] sm:$0x3] %vm280_vm1, %v3784_v0  ;;  %290 = vst.msk [vmem:[#allocation2 + $0x58] sm:$0x3] %vm280_vm1, %v3784_v0 }
  0x2a   : > { %293 = vst.msk [vmem:[#allocation2 + $0x70] sm:$0x3] %vm280_vm1, %v3784_v0  ;;  %296 = vst.msk [vmem:[#allocation2 + $0x88] sm:$0x3] %vm280_vm1, %v3784_v0 }
  0x2b   : > { %299 = vst.msk [vmem:[#allocation2 + $0xa0] sm:$0x3] %vm280_vm1, %v3784_v0  ;;  %302 = vst.msk [vmem:[#allocation2 + $0xb8] sm:$0x3] %vm280_vm1, %v3784_v0 }
  0x2c   : > { %305 = vst.msk [vmem:[#allocation2 + $0xd0] sm:$0x3] %vm280_vm1, %v3784_v0  ;;  %308 = vst.msk [vmem:[#allocation2 + $0xe8] sm:$0x3] %vm280_vm1, %v3784_v0 }
  0x2d   : > { %311 = vst.msk [vmem:[#allocation2 + $0x100] sm:$0x3] %vm280_vm1, %v3784_v0  ;;  %314 = vst.msk [vmem:[#allocation2 + $0x118] sm:$0x3] %vm280_vm1, %v3784_v0 }
  0x2e   : > { %317 = vst.msk [vmem:[#allocation2 + $0x130] sm:$0x3] %vm280_vm1, %v3784_v0  ;;  %320 = vst.msk [vmem:[#allocation2 + $0x148] sm:$0x3] %vm280_vm1, %v3784_v0 }
  0x2f   : > { %323 = vst.msk [vmem:[#allocation2 + $0x160] sm:$0x3] %vm280_vm1, %v3784_v0  ;;  %326 = vst.msk [vmem:[#allocation2 + $0x178] sm:$0x3] %vm280_vm1, %v3784_v0  ;;  %v482_v3 = vld [vmem:[#allocation2 + $0x9] sm:$0xff] }
  0x30   : > { %329 = vst.msk [vmem:[#allocation2 + $0x190] sm:$0x3] %vm280_vm1, %v3784_v0  ;;  %332 = vst.msk [vmem:[#allocation2 + $0x1a8] sm:$0x3] %vm280_vm1, %v3784_v0  ;;  %771 = vrot.lane.b32.xlu1 %v482_v3, %s3785_s18  ;;  %v514_v5 = vld [vmem:[#allocation2 + $0xa] sm:$0xff] }
  0x34   : > { %897 = vrot.lane.b32.xlu1 %v513_v4, %s3786_s19 }
  0x38   : > { %899 = vrot.lane.b32.xlu1 %v514_v5, %s3786_s19 }
  0x59   : > { %369 = vxpose.xlu0.b32.start.end [1/1] (short) %v335_v6, 128 }
  0x90   : > { %v4079_v63 = vpop.permute.xlu1 %769 }
  0x9c   : > { %v353_v7 = vpop.trf.xlu0 }
  0x9d   : > { %402 = vst.msk [vmem:[#allocation2 + $0x19] sm:$0xff] %vm277_vm0, %v353_v7 }
  0xa0   : > { %v354_v8 = vpop.trf.xlu0 }
  0xa1   : > { %403 = vst.msk [vmem:[#allocation2 + $0x21] sm:$0xff] %vm277_vm0, %v354_v8 }
  0xa2   : > { %v4091_v3 = vpop.permute.xlu1 %771 }
  0xa4   : > { %v3949_v9 = vld [vmem:[#allocation2 + $0x18] sm:$0xff]  ;;  %v355_v10 = vpop.trf.xlu0 }
  0xa5   : > { %1025 = vrot.lane.b32.xlu1 %v3949_v9, %s3787_s20  ;;  %405 = vst.msk [vmem:[#allocation2 + $0x31] sm:$0xff] %vm277_vm0, %v355_v10  ;;  %v577_v11 = vld [vmem:[#allocation2 + $0x19] sm:$0xff] }
  0xa6   : > { %v4098_v7 = vpop.permute.xlu1 %897 }
  0xa8   : > { %v356_v12 = vpop.trf.xlu0  ;;  %v3958_v14 = vld [vmem:[#allocation2 + $0x20] sm:$0xff] }
  0xa9   : > { %1153 = vrot.lane.b32.xlu1 %v577_v11, %s3788_s21  ;;  %406 = vst.msk [vmem:[#allocation2 + $0x39] sm:$0xff] %vm277_vm0, %v356_v12  ;;  %v578_v16 = vld [vmem:[#allocation2 + $0x21] sm:$0xff] }
  0xaa   : > { %v609_v18 = vld [vmem:[#allocation2 + $0x1a] sm:$0xff]  ;;  %v610_v25 = vld [vmem:[#allocation2 + $0x22] sm:$0xff] }
  0xac   : > { %v357_v13 = vpop.trf.xlu0  ;;  %v673_v20 = vld [vmem:[#allocation2 + $0x31] sm:$0xff] }
  0xad   : > { %773 = vrot.lane.b32.xlu1 %v577_v11, %s3785_s18  ;;  %408 = vst.msk [vmem:[#allocation2 + $0x49] sm:$0xff] %vm277_vm0, %v357_v13  ;;  %v3986_v28 = vld [vmem:[#allocation2 + $0x30] sm:$0xff]  ;;  %v4112_v11 = vpop.permute.xlu1 %899 }
  0xb0   : > { %v358_v15 = vpop.trf.xlu0  ;;  %v4014_v37 = vld [vmem:[#allocation2 + $0x38] sm:$0xff] }
  0xb1   : > { %1027 = vrot.lane.b32.xlu1 %v3958_v14, %s3787_s20  ;;  %409 = vst.msk [vmem:[#allocation2 + $0x51] sm:$0xff] %vm277_vm0, %v358_v15  ;;  %v674_v47 = vld [vmem:[#allocation2 + $0x39] sm:$0xff] }
  0xb2   : > { %v705_v50 = vld [vmem:[#allocation2 + $0x32] sm:$0xff]  ;;  %v706_v56 = vld [vmem:[#allocation2 + $0x3a] sm:$0xff] }
  0xb4   : > { %v359_v17 = vpop.trf.xlu0  ;;  %v4085_v0 = vld [vmem:[#allocation2 + $0x48] sm:$0xff] }
  0xb5   : > { %1155 = vrot.lane.b32.xlu1 %v578_v16, %s3788_s21  ;;  %411 = vst.msk [vmem:[#allocation2 + $0x61] sm:$0xff] %vm277_vm0, %v359_v17  ;;  %v675_v13 = vld [vmem:[#allocation2 + $0x49] sm:$0xff] }
  0xb8   : > { %v360_v19 = vpop.trf.xlu0  ;;  %v3970_v22 = vld [vmem:[#allocation2 + $0x4a] sm:$0xff]  ;;  %v708_v41 = vld [vmem:[#allocation2 + $0x52] sm:$0xff] }
  0xb9   : > { %1281 = vrot.lane.b32.xlu1 %v609_v18, %s3789_s22  ;;  %412 = vst.msk [vmem:[#allocation2 + $0x69] sm:$0xff] %vm277_vm0, %v360_v19  ;;  %v4105_v8 = vld [vmem:[#allocation2 + $0x50] sm:$0xff] }
  0xbc   : > { %v361_v21 = vpop.trf.xlu0  ;;  %v3976_v24 = vld [vmem:[#allocation2 + $0x60] sm:$0xff] }
  0xbd   : > { %775 = vrot.lane.b32.xlu1 %v578_v16, %s3785_s18  ;;  %414 = vst.msk [vmem:[#allocation2 + $0x79] sm:$0xff] %vm277_vm0, %v361_v21  ;;  %v3988_v29 = vld [vmem:[#allocation2 + $0x61] sm:$0xff] }
  0xbe   : > { %1537 = vrot.lane.b32.xlu0 %v673_v20, %s3790_s23 }
  0xc0   : > { %v362_v23 = vpop.trf.xlu0  ;;  %v4000_v32 = vld [vmem:[#allocation2 + $0x62] sm:$0xff]  ;;  %v4012_v36 = vld [vmem:[#allocation2 + $0x6a] sm:$0xff] }
  0xc1   : > { %901 = vrot.lane.b32.xlu1 %v609_v18, %s3786_s19  ;;  %415 = vst.msk [vmem:[#allocation2 + $0x81] sm:$0xff] %vm277_vm0, %v362_v23  ;;  %v4006_v34 = vld [vmem:[#allocation2 + $0x69] sm:$0xff]  ;;  %v676_v23 = vld [vmem:[#allocation2 + $0x51] sm:$0xff] }
  0xc2   : > { %909 = vrot.lane.b32.xlu0 %v3970_v22, %s3786_s19 }
  0xc4   : > { %v363_v26 = vpop.trf.xlu0  ;;  %v4038_v46 = vld [vmem:[#allocation2 + $0x78] sm:$0xff] }
  0xc5   : > { %1283 = vrot.lane.b32.xlu1 %v610_v25, %s3789_s22  ;;  %417 = vst.msk [vmem:[#allocation2 + $0x91] sm:$0xff] %vm277_vm0, %v363_v26  ;;  %5605 = vst [vmem:[#allocation6_spill] sm:$0xff] %v4038_v46  ;;  %v4051_v52 = vld [vmem:[#allocation2 + $0x79] sm:$0xff] }
  0xc6   : > { %1417 = vrot.lane.b32.xlu0 %v3976_v24, %s3791_s29 }
  0xc8   : > { %v364_v27 = vpop.trf.xlu0  ;;  %v4061_v55 = vld [vmem:[#allocation2 + $0x7a] sm:$0xff]  ;;  %v4073_v60 = vld [vmem:[#allocation2 + $0x82] sm:$0xff] }
  0xc9   : > { %903 = vrot.lane.b32.xlu1 %v610_v25, %s3786_s19  ;;  %418 = vst.msk [vmem:[#allocation2 + $0x99] sm:$0xff] %vm277_vm0, %v364_v27  ;;  %v4067_v58 = vld [vmem:[#allocation2 + $0x81] sm:$0xff] }
  0xca   : > { %1037 = vrot.lane.b32.xlu0 %v3976_v24, %s3787_s20 }
  0xcc   : > { %v365_v30 = vpop.trf.xlu0  ;;  %v649_v1 = vld [vmem:[#allocation2 + $0x90] sm:$0xff] }
  0xcd   : > { %1409 = vrot.lane.b32.xlu1 %v3986_v28, %s3791_s29  ;;  %420 = vst.msk [vmem:[#allocation2 + $0xa9] sm:$0xff] %vm277_vm0, %v365_v30  ;;  %v4096_v5 = vld [vmem:[#allocation2 + $0x91] sm:$0xff] }
  0xce   : > { %1545 = vrot.lane.b32.xlu0 %v3988_v29, %s3790_s23 }
  0xd0   : > { %v366_v31 = vpop.trf.xlu0  ;;  %v4114_v12 = vld [vmem:[#allocation2 + $0x92] sm:$0xff] }
  0xd1   : > { %1029 = vrot.lane.b32.xlu1 %v3986_v28, %s3787_s20  ;;  %421 = vst.msk [vmem:[#allocation2 + $0xb1] sm:$0xff] %vm277_vm0, %v366_v31  ;;  %v4122_v17 = vld [vmem:[#allocation2 + $0x99] sm:$0xff] }
  0xd2   : > { %1165 = vrot.lane.b32.xlu0 %v3988_v29, %s3788_s21 }
  0xd4   : > { %v367_v33 = vpop.trf.xlu0  ;;  %v651_v26 = vld [vmem:[#allocation2 + $0xa8] sm:$0xff] }
  0xd5   : > { %1157 = vrot.lane.b32.xlu1 %v673_v20, %s3788_s21  ;;  %423 = vst.msk [vmem:[#allocation2 + $0xc1] sm:$0xff] %vm277_vm0, %v367_v33  ;;  %v4152_v31 = vld [vmem:[#allocation2 + $0xa9] sm:$0xff] }
  0xd6   : > { %1673 = vrot.lane.b32.xlu0 %v4000_v32, %s3792_s8 }
  0xd8   : > { %v368_v35 = vpop.trf.xlu0  ;;  %v4167_v39 = vld [vmem:[#allocation2 + $0xaa] sm:$0xff]  ;;  %v4185_v45 = vld [vmem:[#allocation2 + $0xb2] sm:$0xff] }
  0xd9   : > { %777 = vrot.lane.b32.xlu1 %v673_v20, %s3785_s18  ;;  %424 = vst.msk [vmem:[#allocation2 + $0xc9] sm:$0xff] %vm277_vm0, %v368_v35  ;;  %v4131_v20 = vld [vmem:[#allocation2 + $0x9a] sm:$0xff]  ;;  %v4176_v43 = vld [vmem:[#allocation2 + $0xb1] sm:$0xff] }
  0xda   : > { %1167 = vrot.lane.b32.xlu0 %v4006_v34, %s3788_s21 }
  0xdc   : > { %v385_v38 = vpop.trf.xlu0 }
  0xdd   : > { %1411 = vrot.lane.b32.xlu1 %v4014_v37, %s3791_s29  ;;  %426 = vst.msk [vmem:[#allocation2 + $0xd9] sm:$0xff] %vm277_vm0, %v385_v38 }
  0xde   : > { %1675 = vrot.lane.b32.xlu0 %v4012_v36, %s3792_s8 }
  0xe0   : > { %v386_v42 = vpop.trf.xlu0 }
  0xe1   : > { %1031 = vrot.lane.b32.xlu1 %v4014_v37, %s3787_s20  ;;  %427 = vst.msk [vmem:[#allocation2 + $0xe1] sm:$0xff] %vm277_vm0, %v386_v42 }
  0xe2   : > { %913 = vrot.lane.b32.xlu0 %v4000_v32, %s3786_s19 }
  0xe4   : > { %v387_v48 = vpop.trf.xlu0 }
  0xe5   : > { %1539 = vrot.lane.b32.xlu1 %v674_v47, %s3790_s23  ;;  %429 = vst.msk [vmem:[#allocation2 + $0xf1] sm:$0xff] %vm277_vm0, %v387_v48 }
  0xe6   : > { %1421 = vrot.lane.b32.xlu0 %v4038_v46, %s3791_s29 }
  0xe8   : > { %v388_v51 = vpop.trf.xlu0 }
  0xe9   : > { %1665 = vrot.lane.b32.xlu1 %v705_v50, %s3792_s8  ;;  %430 = vst.msk [vmem:[#allocation2 + $0xf9] sm:$0xff] %vm277_vm0, %v388_v51  ;;  %v653_v51 = vld [vmem:[#allocation2 + $0xc0] sm:$0xff] }
  0xea   : > { %1041 = vrot.lane.b32.xlu0 %v4038_v46, %s3787_s20 }
  0xec   : > { %v389_v53 = vpop.trf.xlu0 }
  0xed   : > { %1159 = vrot.lane.b32.xlu1 %v674_v47, %s3788_s21  ;;  %432 = vst.msk [vmem:[#allocation2 + $0x109] sm:$0xff] %vm277_vm0, %v389_v53 }
  0xee   : > { %1549 = vrot.lane.b32.xlu0 %v4051_v52, %s3790_s23 }
  0xf0   : > { %v390_v54 = vpop.trf.xlu0 }
  0xf1   : > { %1285 = vrot.lane.b32.xlu1 %v705_v50, %s3789_s22  ;;  %433 = vst.msk [vmem:[#allocation2 + $0x111] sm:$0xff] %vm277_vm0, %v390_v54  ;;  %v4201_v54 = vld [vmem:[#allocation2 + $0x68] sm:$0xff] }
  0xf2   : > { %1169 = vrot.lane.b32.xlu0 %v4051_v52, %s3788_s21  ;;  %5606 = vst [vmem:[#allocation7_spill] sm:$0xff] %v4201_v54 }
  0xf4   : > { %v391_v57 = vpop.trf.xlu0 }
  0xf5   : > { %1667 = vrot.lane.b32.xlu1 %v706_v56, %s3792_s8  ;;  %435 = vst.msk [vmem:[#allocation2 + $0x121] sm:$0xff] %vm277_vm0, %v391_v57 }
  0xf6   : > { %1677 = vrot.lane.b32.xlu0 %v4061_v55, %s3792_s8 }
  0xf8   : > { %v392_v59 = vpop.trf.xlu0 }
  0xf9   : > { %779 = vrot.lane.b32.xlu1 %v674_v47, %s3785_s18  ;;  %436 = vst.msk [vmem:[#allocation2 + $0x129] sm:$0xff] %vm277_vm0, %v392_v59 }
  0xfa   : > { %1171 = vrot.lane.b32.xlu0 %v4067_v58, %s3788_s21 }
  0xfc   : > { %v393_v61 = vpop.trf.xlu0 }
  0xfd   : > { %905 = vrot.lane.b32.xlu1 %v705_v50, %s3786_s19  ;;  %438 = vst.msk [vmem:[#allocation2 + $0x139] sm:$0xff] %vm277_vm0, %v393_v61  ;;  %v4215_v61 = vld [vmem:[#allocation2 + $0xc1] sm:$0xff] }
  0xfe   : > { %1679 = vrot.lane.b32.xlu0 %v4073_v60, %s3792_s8 }
 0x100   : > { %v394_v62 = vpop.trf.xlu0 }
 0x101   : > { %1287 = vrot.lane.b32.xlu1 %v706_v56, %s3789_s22  ;;  %439 = vst.msk [vmem:[#allocation2 + $0x141] sm:$0xff] %vm277_vm0, %v394_v62 }
 0x102   : > { %917 = vrot.lane.b32.xlu0 %v4061_v55, %s3786_s19 }
 0x104   : > { %v395_v2 = vpop.trf.xlu0 }
 0x105   : > { %1413 = vrot.lane.b32.xlu1 %v4085_v0, %s3791_s29  ;;  %441 = vst.msk [vmem:[#allocation2 + $0x151] sm:$0xff] %vm277_vm0, %v395_v2 }
 0x106   : > { %1425 = vrot.lane.b32.xlu0 %v649_v1, %s3791_s29 }
 0x108   : > { %v396_v4 = vpop.trf.xlu0 }
 0x109   : > { %907 = vrot.lane.b32.xlu1 %v706_v56, %s3786_s19  ;;  %442 = vst.msk [vmem:[#allocation2 + $0x159] sm:$0xff] %vm277_vm0, %v396_v4 }
 0x10a   : > { %1045 = vrot.lane.b32.xlu0 %v649_v1, %s3787_s20  ;;  %v449_v1 = vld [vmem:[#allocation2] sm:$0xff] }
 0x10c   : > { %v397_v6 = vpop.trf.xlu0 }
 0x10d   : > { %1033 = vrot.lane.b32.xlu1 %v4085_v0, %s3787_s20  ;;  %444 = vst.msk [vmem:[#allocation2 + $0x169] sm:$0xff] %vm277_vm0, %v397_v6  ;;  %v1761_v6 = vsel %vm277_vm0, %v449_v1, %v4079_v63 }
 0x10e   : > { %1553 = vrot.lane.b32.xlu0 %v4096_v5, %s3790_s23 }
 0x110   : > { %v398_v10 = vpop.trf.xlu0 }
 0x111   : > { %1415 = vrot.lane.b32.xlu1 %v4105_v8, %s3791_s29  ;;  %445 = vst.msk [vmem:[#allocation2 + $0x171] sm:$0xff] %vm277_vm0, %v398_v10 }
 0x112   : > { %1173 = vrot.lane.b32.xlu0 %v4096_v5, %s3788_s21 }
 0x114   : > { %v399_v15 = vpop.trf.xlu0 }
 0x115   : > { %1541 = vrot.lane.b32.xlu1 %v675_v13, %s3790_s23  ;;  %447 = vst.msk [vmem:[#allocation2 + $0x181] sm:$0xff] %vm277_vm0, %v399_v15  ;;  %v1794_v15 = vsel %vm1793_vm3, %v1761_v6, %v4098_v7 }
 0x116   : > { %1681 = vrot.lane.b32.xlu0 %v4114_v12, %s3792_s8 }
 0x117   : > { %v4120_v16 = vpop.permute.xlu1 %1025 }
 0x118   : > { %v400_v18 = vpop.trf.xlu0  ;;  %v1827_v63 = vsel %vm1826_vm4, %v1794_v15, %v4120_v16 }
 0x119   : > { %1035 = vrot.lane.b32.xlu1 %v4105_v8, %s3787_s20  ;;  %448 = vst.msk [vmem:[#allocation2 + $0x189] sm:$0xff] %vm277_vm0, %v400_v18 }
 0x11a   : > { %1175 = vrot.lane.b32.xlu0 %v4122_v17, %s3788_s21 }
 0x11b   : > { %v4129_v19 = vpop.permute.xlu1 %1153 }
 0x11d   : > { %1161 = vrot.lane.b32.xlu1 %v675_v13, %s3788_s21 }
 0x11e   : > { %1683 = vrot.lane.b32.xlu0 %v4131_v20, %s3792_s8 }
 0x11f   : > { %v4136_v21 = vpop.permute.xlu1 %773 }
 0x121   : > { %1543 = vrot.lane.b32.xlu1 %v676_v23, %s3790_s23 }
 0x122   : > { %921 = vrot.lane.b32.xlu0 %v4114_v12, %s3786_s19 }
 0x123   : > { %v4141_v25 = vpop.permute.xlu1 %1027 }
 0x125   : > { %1669 = vrot.lane.b32.xlu1 %v3970_v22, %s3792_s8 }
 0x126   : > { %1429 = vrot.lane.b32.xlu0 %v651_v26, %s3791_s29 }
 0x127   : > { %v4146_v27 = vpop.permute.xlu1 %1155 }
 0x129   : > { %781 = vrot.lane.b32.xlu1 %v675_v13, %s3785_s18  ;;  %v4233_v13 = vld [vmem:[#allocation2 + $0xc2] sm:$0xff] }
 0x12a   : > { %1049 = vrot.lane.b32.xlu0 %v651_v26, %s3787_s20  ;;  %v4249_v26 = vld [vmem:[#allocation2 + $0xc9] sm:$0xff] }
 0x12b   : > { %v4150_v30 = vpop.permute.xlu1 %1281 }
 0x12d   : > { %1163 = vrot.lane.b32.xlu1 %v676_v23, %s3788_s21 }
 0x12e   : > { %1557 = vrot.lane.b32.xlu0 %v4152_v31, %s3790_s23 }
 0x12f   : > { %v4157_v33 = vpop.permute.xlu1 %775 }
 0x130   : > { %v4159_v35 = vpop.permute.xlu0 %1537 }
 0x131   : > { %1289 = vrot.lane.b32.xlu1 %v3970_v22, %s3789_s22 }
 0x132   : > { %1177 = vrot.lane.b32.xlu0 %v4152_v31, %s3788_s21 }
 0x133   : > { %v4165_v38 = vpop.permute.xlu1 %901 }
 0x134   : > { %v4169_v40 = vpop.permute.xlu0 %909 }
 0x135   : > { %1671 = vrot.lane.b32.xlu1 %v708_v41, %s3792_s8 }
 0x136   : > { %1685 = vrot.lane.b32.xlu0 %v4167_v39, %s3792_s8 }
 0x137   : > { %v4174_v42 = vpop.permute.xlu1 %1283 }
 0x138   : > { %v4178_v22 = vpop.permute.xlu0 %1417 }
 0x139   : > { %783 = vrot.lane.b32.xlu1 %v676_v23, %s3785_s18 }
 0x13a   : > { %1179 = vrot.lane.b32.xlu0 %v4176_v43, %s3788_s21 }
 0x13b   : > { %v4183_v44 = vpop.permute.xlu1 %903 }
 0x13c   : > { %v4187_v47 = vpop.permute.xlu0 %1037 }
 0x13d   : > { %1291 = vrot.lane.b32.xlu1 %v708_v41, %s3789_s22 }
 0x13e   : > { %1687 = vrot.lane.b32.xlu0 %v4185_v45, %s3792_s8 }
 0x13f   : > { %v1410_v48 = vpop.permute.xlu1 %1409 }
 0x140   : > { %v4192_v49 = vpop.permute.xlu0 %1545 }
 0x141   : > { %911 = vrot.lane.b32.xlu1 %v708_v41, %s3786_s19 }
 0x142   : > { %925 = vrot.lane.b32.xlu0 %v4167_v39, %s3786_s19 }
 0x143   : > { %v4197_v50 = vpop.permute.xlu1 %1029 }
 0x144   : > { %v4199_v53 = vpop.permute.xlu0 %1165 }
 0x145   : > { %1419 = vrot.lane.b32.xlu1 %v4201_v54, %s3791_s29 }
 0x146   : > { %1433 = vrot.lane.b32.xlu0 %v653_v51, %s3791_s29 }
 0x147   : > { %v4206_v56 = vpop.permute.xlu1 %1157 }
 0x148   : > { %v4208_v57 = vpop.permute.xlu0 %1673 }
 0x149   : > { %1039 = vrot.lane.b32.xlu1 %v4201_v54, %s3787_s20 }
 0x14a   : > { %1053 = vrot.lane.b32.xlu0 %v653_v51, %s3787_s20  ;;  %v450_v51 = vld [vmem:[#allocation2 + $0x8] sm:$0xff] }
 0x14b   : > { %v4213_v59 = vpop.permute.xlu1 %777 }
 0x14c   : > { %v4217_v62 = vpop.permute.xlu0 %1167 }
 0x14d   : > { %1547 = vrot.lane.b32.xlu1 %v4006_v34, %s3790_s23 }
 0x14e   : > { %1561 = vrot.lane.b32.xlu0 %v4215_v61, %s3790_s23 }
 0x14f   : > { %v1412_v2 = vpop.permute.xlu1 %1411 }
 0x150   : > { %v4223_v4 = vpop.permute.xlu0 %1675 }
 0x151   : > { %785 = vrot.lane.b32.xlu1 %v3988_v29, %s3785_s18  ;;  %v1860_v29 = vsel %vm1859_vm5, %v1827_v63, %v4129_v19 }
 0x152   : > { %1181 = vrot.lane.b32.xlu0 %v4215_v61, %s3788_s21  ;;  %v1893_v23 = vsel %vm1892_vm6, %v1860_v29, %v4150_v30  ;;  %v4260_v30 = vld [vmem:[#allocation2 + $0xca] sm:$0xff] }
 0x153   : > { %v4231_v10 = vpop.permute.xlu1 %1031  ;;  %v1926_v41 = vsel %vm1925_vm7, %v1893_v23, %v1410_v48  ;;  %v655_v23 = vld [vmem:[#allocation2 + $0xd8] sm:$0xff] }
 0x154   : > { %v4237_v18 = vpop.permute.xlu0 %913  ;;  %v1959_v19 = vsel %vm1958_vm8, %v1926_v41, %v4159_v35 }
 0x155   : > { %1293 = vrot.lane.b32.xlu1 %v4000_v32, %s3789_s22 }
 0x156   : > { %1689 = vrot.lane.b32.xlu0 %v4233_v13, %s3792_s8 }
 0x157   : > { %v1540_v7 = vpop.permute.xlu1 %1539 }
 0x158   : > { %v4252_v16 = vpop.permute.xlu0 %1421 }
 0x159   : > { %787 = vrot.lane.b32.xlu1 %v4006_v34, %s3785_s18  ;;  %v1762_v34 = vsel %vm277_vm0, %v450_v51, %v4091_v3 }
 0x15a   : > { %1183 = vrot.lane.b32.xlu0 %v4249_v26, %s3788_s21  ;;  %v1795_v15 = vsel %vm1793_vm3, %v1762_v34, %v4112_v11 }
 0x15b   : > { %v1666_v32 = vpop.permute.xlu1 %1665  ;;  %v1828_v63 = vsel %vm1826_vm4, %v1795_v15, %v4141_v25 }
 0x15c   : > { %v4262_v1 = vpop.permute.xlu0 %1041  ;;  %v1992_v48 = vsel %vm1991_vm9, %v1959_v19, %v1666_v32  ;;  %v1861_v3 = vsel %vm1859_vm5, %v1828_v63, %v4146_v27  ;;  %v4290_v32 = vld [vmem:[#allocation2 + $0x80] sm:$0xff] }
 0x15d   : > { %1295 = vrot.lane.b32.xlu1 %v4012_v36, %s3789_s22  ;;  %3429 = vmatprep.mubr.msk.f32.mxu0 %vm2029_vm10, %v1992_v48  ;;  %5607 = vst [vmem:[#allocation8_spill] sm:$0xff] %v4290_v32  ;;  %v4308_v48 = vld [vmem:[#allocation2 + $0xd9] sm:$0xff] }
 0x15e   : > { %1691 = vrot.lane.b32.xlu0 %v4260_v30, %s3792_s8  ;;  %5608 = vst [vmem:[#allocation9_spill] sm:$0xff] %v4308_v48 }
 0x15f   : > { %v4272_v6 = vpop.permute.xlu1 %1159 }
 0x160   : > { %v4274_v35 = vpop.permute.xlu0 %1549 }
 0x161   : > { %915 = vrot.lane.b32.xlu1 %v4012_v36, %s3786_s19  ;;  %v1894_v36 = vsel %vm1892_vm6, %v1861_v3, %v4174_v42 }
 0x162   : > { %929 = vrot.lane.b32.xlu0 %v4233_v13, %s3786_s19  ;;  %v1927_v11 = vsel %vm1925_vm7, %v1894_v36, %v1412_v2 }
 0x163   : > { %v4284_v29 = vpop.permute.xlu1 %1285  ;;  %v1960_v25 = vsel %vm1958_vm8, %v1927_v11, %v1540_v7 }
 0x164   : > { %v4288_v41 = vpop.permute.xlu0 %1169 }
 0x165   : > { %1423 = vrot.lane.b32.xlu1 %v4290_v32, %s3791_s29 }
 0x166   : > { %1437 = vrot.lane.b32.xlu0 %v655_v23, %s3791_s29 }
 0x167   : > { %v1668_v19 = vpop.permute.xlu1 %1667 }
 0x168   : > { %v1993_v51 = vsel %vm1991_vm9, %v1960_v25, %v1668_v19  ;;  %v4300_v27 = vpop.permute.xlu0 %1677 }
 0x169   : > { %1043 = vrot.lane.b32.xlu1 %v4290_v32, %s3787_s20  ;;  %3430 = vmatmul.mubr.msk.f32.vlgmr.msra.gmra.mrb[0].mxu0 %vm2029_vm10, %v1993_v51 }
 0x16a   : > { %1057 = vrot.lane.b32.xlu0 %v655_v23, %s3787_s20  ;;  %v4330_v23 = vld [vmem:[#allocation2 + $0xda] sm:$0xff] }
 0x16b   : > { %v4306_v42 = vpop.permute.xlu1 %779  ;;  %5611 = vst [vmem:[#allocation12_spill] sm:$0xff] %v4330_v23 }
 0x16c   : > { %v4310_v2 = vpop.permute.xlu0 %1171 }
 0x16d   : > { %5609 = vst [vmem:[#allocation10_spill] sm:$0xff] %v4310_v2  ;;  %1551 = vrot.lane.b32.xlu1 %v4067_v58, %s3790_s23 }
 0x16e   : > { %1565 = vrot.lane.b32.xlu0 %v4308_v48, %s3790_s23 }
 0x16f   : > { %v4316_v7 = vpop.permute.xlu1 %905 }
 0x170   : > { %v4318_v34 = vpop.permute.xlu0 %1679 }
 0x171   : > { %789 = vrot.lane.b32.xlu1 %v4051_v52, %s3785_s18  ;;  %v4338_v52 = vld [vmem:[#allocation2 + $0xe1] sm:$0xff] }
 0x172   : > { %1185 = vrot.lane.b32.xlu0 %v4308_v48, %s3788_s21  ;;  %5612 = vst [vmem:[#allocation13_spill] sm:$0xff] %v4338_v52 }
 0x173   : > { %v4324_v15 = vpop.permute.xlu1 %1287 }
 0x174   : > { %v4326_v63 = vpop.permute.xlu0 %917 }
 0x175   : > { %5610 = vst [vmem:[#allocation11_spill] sm:$0xff] %v4326_v63  ;;  %1297 = vrot.lane.b32.xlu1 %v4061_v55, %s3789_s22  ;;  %v4348_v55 = vld [vmem:[#allocation2 + $0xe2] sm:$0xff]  ;;  %v657_v63 = vld [vmem:[#allocation2 + $0xf0] sm:$0xff] }
 0x176   : > { %1693 = vrot.lane.b32.xlu0 %v4330_v23, %s3792_s8  ;;  %5614 = vst [vmem:[#allocation15_spill] sm:$0xff] %v4348_v55 }
 0x177   : > { %v1414_v3 = vpop.permute.xlu1 %1413 }
 0x178   : > { %v4334_v36 = vpop.permute.xlu0 %1425 }
 0x179   : > { %791 = vrot.lane.b32.xlu1 %v4067_v58, %s3785_s18 }
 0x17a   : > { %1187 = vrot.lane.b32.xlu0 %v4338_v52, %s3788_s21 }
 0x17b   : > { %v4342_v11 = vpop.permute.xlu1 %907 }
 0x17c   : > { %v4344_v25 = vpop.permute.xlu0 %1045 }
 0x17d   : > { %5613 = vst [vmem:[#allocation14_spill] sm:$0xff] %v4344_v25  ;;  %1299 = vrot.lane.b32.xlu1 %v4073_v60, %s3789_s22  ;;  %v4362_v25 = vld [vmem:[#allocation2 + $0x98] sm:$0xff] }
 0x17e   : > { %1695 = vrot.lane.b32.xlu0 %v4348_v55, %s3792_s8  ;;  %5616 = vst [vmem:[#allocation17_spill] sm:$0xff] %v4362_v25 }
 0x17f   : > { %v1034_v19 = vpop.permute.xlu1 %1033 }
 0x180   : > { %v4352_v51 = vpop.permute.xlu0 %1553 }
 0x181   : > { %919 = vrot.lane.b32.xlu1 %v4073_v60, %s3786_s19 }
 0x182   : > { %933 = vrot.lane.b32.xlu0 %v4330_v23, %s3786_s19 }
 0x183   : > { %v4358_v58 = vpop.permute.xlu1 %1415 }
 0x184   : > { %v4360_v32 = vpop.permute.xlu0 %1173 }
 0x185   : > { %5615 = vst [vmem:[#allocation16_spill] sm:$0xff] %v4360_v32  ;;  %1427 = vrot.lane.b32.xlu1 %v4362_v25, %s3791_s29  ;;  %v4378_v32 = vld [vmem:[#allocation2 + $0xf1] sm:$0xff] }
 0x186   : > { %1441 = vrot.lane.b32.xlu0 %v657_v63, %s3791_s29 }
 0x187   : > { %v1542_v46 = vpop.permute.xlu1 %1541 }
 0x188   : > { %v4367_v55 = vpop.permute.xlu0 %1681 }
 0x189   : > { %1047 = vrot.lane.b32.xlu1 %v4362_v25, %s3787_s20  ;;  %v1763_v25 = vsel %vm277_vm0, %v3949_v9, %v4136_v21 }
 0x18a   : > { %1061 = vrot.lane.b32.xlu0 %v657_v63, %s3787_s20  ;;  %v1796_v63 = vsel %vm1793_vm3, %v1763_v25, %v4165_v38 }
 0x18b   : > { %v4372_v60 = vpop.permute.xlu1 %1035 }
 0x18c   : > { %v4374_v2 = vpop.permute.xlu0 %1175 }
 0x18d   : > { %5617 = vst [vmem:[#allocation18_spill] sm:$0xff] %v4374_v2  ;;  %1555 = vrot.lane.b32.xlu1 %v4122_v17, %s3790_s23  ;;  %v1829_v2 = vsel %vm1826_vm4, %v1796_v63, %v4197_v50  ;;  %v1764_v63 = vsel %vm277_vm0, %v3958_v14, %v4157_v33 }
 0x18e   : > { %1569 = vrot.lane.b32.xlu0 %v4378_v32, %s3790_s23 }
 0x18f   : > { %v1162_v54 = vpop.permute.xlu1 %1161 }
 0x190   : > { %v4382_v23 = vpop.permute.xlu0 %1683 }
 0x191   : > { %5618 = vst [vmem:[#allocation19_spill] sm:$0xff] %v4382_v23  ;;  %793 = vrot.lane.b32.xlu1 %v4096_v5, %s3785_s18  ;;  %v1862_v23 = vsel %vm1859_vm5, %v1829_v2, %v4206_v56  ;;  %v4403_v5 = vld [vmem:[#allocation2 + $0xf2] sm:$0xff] }
 0x192   : > { %1189 = vrot.lane.b32.xlu0 %v4378_v32, %s3788_s21  ;;  %v1895_v9 = vsel %vm1892_vm6, %v1862_v23, %v4284_v29 }
 0x193   : > { %v1544_v48 = vpop.permute.xlu1 %1543  ;;  %v1928_v21 = vsel %vm1925_vm7, %v1895_v9, %v1414_v3  ;;  %v1765_v3 = vsel %vm277_vm0, %v3986_v28, %v4213_v59 }
 0x194   : > { %v4397_v52 = vpop.permute.xlu0 %921  ;;  %v1961_v38 = vsel %vm1958_vm8, %v1928_v21, %v1542_v46  ;;  %v4425_v46 = vld [vmem:[#allocation2 + $0xfa] sm:$0xff]  ;;  %v1798_v9 = vsel %vm1793_vm3, %v1765_v3, %v4316_v7  ;;  %v1797_v21 = vsel %vm1793_vm3, %v1764_v63, %v4183_v44 }
 0x195   : > { %1301 = vrot.lane.b32.xlu1 %v4114_v12, %s3789_s22  ;;  %v4415_v12 = vld [vmem:[#allocation2 + $0xf9] sm:$0xff]  ;;  %v1830_v28 = vsel %vm1826_vm4, %v1797_v21, %v4231_v10 }
 0x196   : > { %1697 = vrot.lane.b32.xlu0 %v4403_v5, %s3792_s8  ;;  %v1863_v33 = vsel %vm1859_vm5, %v1830_v28, %v4272_v6  ;;  %v4500_v28 = vld [vmem:[#allocation2 + $0x10a] sm:$0xff] }
 0x197   : > { %v1670_v50 = vpop.permute.xlu1 %1669  ;;  %v1896_v44 = vsel %vm1892_vm6, %v1863_v33, %v4324_v15  ;;  %v1766_v33 = vsel %vm277_vm0, %v4014_v37, %v4306_v42 }
 0x198   : > { %v1994_v56 = vsel %vm1991_vm9, %v1961_v38, %v1670_v50  ;;  %v4410_v2 = vpop.permute.xlu0 %1429  ;;  %v1831_v38 = vsel %vm1826_vm4, %v1798_v9, %v1034_v19  ;;  %v4454_v50 = vld [vmem:[#allocation2 + $0xb0] sm:$0xff]  ;;  %v1929_v10 = vsel %vm1925_vm7, %v1896_v44, %v4358_v58 }
 0x199   : > { %795 = vrot.lane.b32.xlu1 %v4122_v17, %s3785_s18  ;;  %3432 = vmatprep.mubr.msk.f32.mxu0 %vm2029_vm10, %v1994_v56  ;;  %v1864_v59 = vsel %vm1859_vm5, %v1831_v38, %v1162_v54  ;;  %v659_v54 = vld [vmem:[#allocation2 + $0x108] sm:$0xff]  ;;  %v1962_v56 = vsel %vm1958_vm8, %v1929_v10, %v1544_v48 }
 0x19a   : > { %1191 = vrot.lane.b32.xlu0 %v4415_v12, %s3788_s21  ;;  %v4484_v58 = vld [vmem:[#allocation2 + $0x109] sm:$0xff] }
 0x19b   : > { %v4419_v29 = vpop.permute.xlu1 %781 }
 0x19c   : > { %v4421_v23 = vpop.permute.xlu0 %1049  ;;  %v1767_v37 = vsel %vm277_vm0, %v4085_v0, %v4419_v29 }
 0x19d   : > { %1303 = vrot.lane.b32.xlu1 %v4131_v20, %s3789_s22 }
 0x19e   : > { %1699 = vrot.lane.b32.xlu0 %v4425_v46, %s3792_s8 }
 0x19f   : > { %v1164_v17 = vpop.permute.xlu1 %1163 }
 0x1a0   : > { %v4432_v25 = vpop.permute.xlu0 %1557 }
 0x1a1   : > { %923 = vrot.lane.b32.xlu1 %v4131_v20, %s3786_s19 }
 0x1a2   : > { %937 = vrot.lane.b32.xlu0 %v4403_v5, %s3786_s19 }
 0x1a3   : > { %v1290_v14 = vpop.permute.xlu1 %1289 }
 0x1a4   : > { %v1897_v7 = vsel %vm1892_vm6, %v1864_v59, %v1290_v14  ;;  %v4452_v20 = vpop.permute.xlu0 %1177 }
 0x1a5   : > { %v1930_v19 = vsel %vm1925_vm7, %v1897_v7, %v4178_v22  ;;  %1431 = vrot.lane.b32.xlu1 %v4454_v50, %s3791_s29 }
 0x1a6   : > { %1445 = vrot.lane.b32.xlu0 %v659_v54, %s3791_s29  ;;  %v1963_v6 = vsel %vm1958_vm8, %v1930_v19, %v4192_v49 }
 0x1a7   : > { %v1672_v3 = vpop.permute.xlu1 %1671  ;;  %v1996_v22 = vsel %vm1991_vm9, %v1963_v6, %v4208_v57  ;;  %v1800_v6 = vsel %vm1793_vm3, %v1767_v37, %v4169_v40  ;;  %v661_v40 = vld [vmem:[#allocation2 + $0x120] sm:$0xff] }
 0x1a8   : > { %v1995_v15 = vsel %vm1991_vm9, %v1962_v56, %v1672_v3  ;;  %v4469_v63 = vpop.permute.xlu0 %1685  ;;  %v4547_v3 = vld [vmem:[#allocation2 + $0xc8] sm:$0xff] }
 0x1a9   : > { %1051 = vrot.lane.b32.xlu1 %v4454_v50, %s3787_s20  ;;  %3433 = vmatmul.mubr.msk.f32.gmra.mrb[2].mxu0 %vm2029_vm10, %v1995_v15  ;;  %v1833_v15 = vsel %vm1826_vm4, %v1800_v6, %v4187_v47  ;;  %v4591_v37 = vld [vmem:[#allocation2 + $0x122] sm:$0xff] }
 0x1aa   : > { %3435 = vmatprep.mubr.msk.f32.mxu0 %vm2029_vm10, %v1996_v22  ;;  %1065 = vrot.lane.b32.xlu0 %v659_v54, %s3787_s20  ;;  %v4524_v54 = vld [vmem:[#allocation2 + $0x112] sm:$0xff]  ;;  %v4610_v6 = vld [vmem:[#allocation2 + $0x129] sm:$0xff] }
 0x1ab   : > { %v4478_v49 = vpop.permute.xlu1 %783 }
 0x1ac   : > { %v4480_v48 = vpop.permute.xlu0 %1179 }
 0x1ad   : > { %1559 = vrot.lane.b32.xlu1 %v4176_v43, %s3790_s23 }
 0x1ae   : > { %1573 = vrot.lane.b32.xlu0 %v4484_v58, %s3790_s23 }
 0x1af   : > { %v1292_v9 = vpop.permute.xlu1 %1291 }
 0x1b0   : > { %v4488_v21 = vpop.permute.xlu0 %1687 }
 0x1b1   : > { %797 = vrot.lane.b32.xlu1 %v4152_v31, %s3785_s18  ;;  %v4508_v31 = vld [vmem:[#allocation2 + $0x111] sm:$0xff] }
 0x1b2   : > { %1193 = vrot.lane.b32.xlu0 %v4484_v58, %s3788_s21 }
 0x1b3   : > { %v4494_v57 = vpop.permute.xlu1 %911 }
 0x1b4   : > { %v4496_v38 = vpop.permute.xlu0 %925 }
 0x1b5   : > { %1305 = vrot.lane.b32.xlu1 %v4167_v39, %s3789_s22  ;;  %v1799_v39 = vsel %vm1793_vm3, %v1766_v33, %v4342_v11 }
 0x1b6   : > { %1701 = vrot.lane.b32.xlu0 %v4500_v28, %s3792_s8  ;;  %v1832_v44 = vsel %vm1826_vm4, %v1799_v39, %v4372_v60 }
 0x1b7   : > { %v1420_v59 = vpop.permute.xlu1 %1419 }
 0x1b8   : > { %v4504_v14 = vpop.permute.xlu0 %1433 }
 0x1b9   : > { %799 = vrot.lane.b32.xlu1 %v4176_v43, %s3785_s18  ;;  %v1865_v43 = vsel %vm1859_vm5, %v1832_v44, %v1164_v17 }
 0x1ba   : > { %1195 = vrot.lane.b32.xlu0 %v4508_v31, %s3788_s21  ;;  %v1898_v42 = vsel %vm1892_vm6, %v1865_v43, %v1292_v9 }
 0x1bb   : > { %v1040_v7 = vpop.permute.xlu1 %1039  ;;  %v1931_v11 = vsel %vm1925_vm7, %v1898_v42, %v1420_v59 }
 0x1bc   : > { %v4519_v19 = vpop.permute.xlu0 %1053 }
 0x1bd   : > { %1307 = vrot.lane.b32.xlu1 %v4185_v45, %s3789_s22 }
 0x1be   : > { %1703 = vrot.lane.b32.xlu0 %v4524_v54, %s3792_s8 }
 0x1bf   : > { %v1548_v60 = vpop.permute.xlu1 %1547 }
 0x1c0   : > { %v1964_v10 = vsel %vm1958_vm8, %v1931_v11, %v1548_v60  ;;  %v4534_v17 = vpop.permute.xlu0 %1561  ;;  %v2657_v60 = vld [vmem:[%s5584_s4] sm:$0xff] }
 0x1c1   : > { %927 = vrot.lane.b32.xlu1 %v4185_v45, %s3786_s19  ;;  %v1997_v0 = vsel %vm1991_vm9, %v1964_v10, %v4223_v4  ;;  %v1866_v4 = vsel %vm1859_vm5, %v1833_v15, %v4199_v53 }
 0x1c2   : > { %3436 = vmatmul.mubr.msk.f32.gmra.mrb[4].mxu0 %vm2029_vm10, %v1997_v0  ;;  %941 = vrot.lane.b32.xlu0 %v4500_v28, %s3786_s19 }
 0x1c3   : > { %v786_v29 = vpop.permute.xlu1 %785 }
 0x1c4   : > { %v4545_v56 = vpop.permute.xlu0 %1181 }
 0x1c5   : > { %1435 = vrot.lane.b32.xlu1 %v4547_v3, %s3791_s29 }
 0x1c6   : > { %1449 = vrot.lane.b32.xlu0 %v661_v40, %s3791_s29 }
 0x1c7   : > { %v1294_v45 = vpop.permute.xlu1 %1293 }
 0x1c8   : > { %v1899_v22 = vsel %vm1892_vm6, %v1866_v4, %v1294_v45  ;;  %v4557_v9 = vpop.permute.xlu0 %1689 }
 0x1c9   : > { %v1932_v59 = vsel %vm1925_vm7, %v1899_v22, %v4252_v16  ;;  %1055 = vrot.lane.b32.xlu1 %v4547_v3, %s3787_s20  ;;  %v4575_v16 = vld [vmem:[#allocation2 + $0x121] sm:$0xff] }
 0x1ca   : > { %1069 = vrot.lane.b32.xlu0 %v661_v40, %s3787_s20  ;;  %v1965_v47 = vsel %vm1958_vm8, %v1932_v59, %v4274_v35 }
 0x1cb   : > { %v4566_v33 = vpop.permute.xlu1 %787  ;;  %v1998_v53 = vsel %vm1991_vm9, %v1965_v47, %v4300_v27 }
 0x1cc   : > { %3438 = vmatprep.mubr.msk.f32.mxu0 %vm2029_vm10, %v1998_v53  ;;  %v4571_v39 = vpop.permute.xlu0 %1183  ;;  %v4643_v53 = vld [vmem:[#allocation2 + $0xe0] sm:$0xff] }
 0x1cd   : > { %1563 = vrot.lane.b32.xlu1 %v4249_v26, %s3790_s23 }
 0x1ce   : > { %1577 = vrot.lane.b32.xlu0 %v4575_v16, %s3790_s23 }
 0x1cf   : > { %v1296_v44 = vpop.permute.xlu1 %1295 }
 0x1d0   : > { %v4579_v43 = vpop.permute.xlu0 %1691 }
 0x1d1   : > { %801 = vrot.lane.b32.xlu1 %v4215_v61, %s3785_s18  ;;  %v1768_v61 = vsel %vm277_vm0, %v4105_v8, %v4478_v49 }
 0x1d2   : > { %1197 = vrot.lane.b32.xlu0 %v4575_v16, %s3788_s21  ;;  %v1801_v10 = vsel %vm1793_vm3, %v1768_v61, %v4494_v57  ;;  %v1769_v57 = vsel %vm277_vm0, %v3976_v24, %v786_v29 }
 0x1d3   : > { %v4585_v35 = vpop.permute.xlu1 %915  ;;  %v1834_v8 = vsel %vm1826_vm4, %v1801_v10, %v1040_v7 }
 0x1d4   : > { %v4587_v27 = vpop.permute.xlu0 %929  ;;  %v1867_v40 = vsel %vm1859_vm5, %v1834_v8, %v4217_v62  ;;  %v1802_v62 = vsel %vm1793_vm3, %v1769_v57, %v4237_v18  ;;  %v663_v18 = vld [vmem:[#allocation2 + $0x138] sm:$0xff] }
 0x1d5   : > { %1309 = vrot.lane.b32.xlu1 %v4233_v13, %s3789_s22  ;;  %v2658_v13 = vld [vmem:[%s5584_s4 + $0x8] sm:$0xff]  ;;  %v1900_v7 = vsel %vm1892_vm6, %v1867_v40, %v1296_v44  ;;  %v1835_v44 = vsel %vm1826_vm4, %v1802_v62, %v4262_v1 }
 0x1d6   : > { %1705 = vrot.lane.b32.xlu0 %v4591_v37, %s3792_s8  ;;  %v3537_v0 = vpack.c.bf16 %v2658_v13, %v2657_v60 }
 0x1d7   : > { %v1424_v42 = vpop.permute.xlu1 %1423 }
 0x1d8   : > { %v4598_v11 = vpop.permute.xlu0 %1437  ;;  %3538 = vmatprep.subr.bf16.mxu1 %v3537_v0  ;;  %v1933_v45 = vsel %vm1925_vm7, %v1900_v7, %v1424_v42  ;;  %v5621_v7 = vld [vmem:[#allocation12_spill] sm:$0xff] }
 0x1d9   : > { %803 = vrot.lane.b32.xlu1 %v4249_v26, %s3785_s18  ;;  %3540 = vmatpush3.bf16.msra.mxu1 %v3537_v0  ;;  %v4621_v26 = vld [vmem:[#allocation2 + $0x12a] sm:$0xff]  ;;  %v5619_v0 = vld [vmem:[#allocation13_spill] sm:$0xff] }
 0x1da   : > { %1199 = vrot.lane.b32.xlu0 %v4610_v6, %s3788_s21 }
 0x1db   : > { %v1044_v49 = vpop.permute.xlu1 %1043 }
 0x1dc   : > { %v4615_v15 = vpop.permute.xlu0 %1057 }
 0x1dd   : > { %1311 = vrot.lane.b32.xlu1 %v4260_v30, %s3789_s22 }
 0x1de   : > { %1707 = vrot.lane.b32.xlu0 %v4621_v26, %s3792_s8 }
 0x1df   : > { %v1552_v4 = vpop.permute.xlu1 %1551 }
 0x1e0   : > { %v1966_v22 = vsel %vm1958_vm8, %v1933_v45, %v1552_v4  ;;  %v4630_v59 = vpop.permute.xlu0 %1565  ;;  %v4687_v45 = vld [vmem:[#allocation2 + $0x13a] sm:$0xff] }
 0x1e1   : > { %931 = vrot.lane.b32.xlu1 %v4260_v30, %s3786_s19  ;;  %v1999_v24 = vsel %vm1991_vm9, %v1966_v22, %v4318_v34  ;;  %v1868_v34 = vsel %vm1859_vm5, %v1835_v44, %v4288_v41  ;;  %v5622_v22 = vld [vmem:[#allocation7_spill] sm:$0xff] }
 0x1e2   : > { %3439 = vmatmul.mubr.msk.f32.gmra.mrb[6].mxu0 %vm2029_vm10, %v1999_v24  ;;  %945 = vrot.lane.b32.xlu0 %v4591_v37, %s3786_s19  ;;  %v1770_v62 = vsel %vm277_vm0, %v5622_v22, %v4566_v33 }
 0x1e3   : > { %v790_v29 = vpop.permute.xlu1 %789  ;;  %v1803_v44 = vsel %vm1793_vm3, %v1770_v62, %v4585_v35  ;;  %v4711_v35 = vld [vmem:[#allocation2 + $0x142] sm:$0xff] }
 0x1e4   : > { %v4641_v47 = vpop.permute.xlu0 %1185 }
 0x1e5   : > { %1439 = vrot.lane.b32.xlu1 %v4643_v53, %s3791_s29 }
 0x1e6   : > { %1453 = vrot.lane.b32.xlu0 %v663_v18, %s3791_s29 }
 0x1e7   : > { %v1298_v30 = vpop.permute.xlu1 %1297 }
 0x1e8   : > { %v1901_v42 = vsel %vm1892_vm6, %v1868_v34, %v1298_v30  ;;  %v4653_v61 = vpop.permute.xlu0 %1693  ;;  %v1836_v30 = vsel %vm1826_vm4, %v1803_v44, %v1044_v49  ;;  %v5626_v44 = vld [vmem:[#allocation11_spill] sm:$0xff] }
 0x1e9   : > { %v1934_v60 = vsel %vm1925_vm7, %v1901_v42, %v4334_v36  ;;  %1059 = vrot.lane.b32.xlu1 %v4643_v53, %s3787_s20  ;;  %v4671_v36 = vld [vmem:[#allocation2 + $0x139] sm:$0xff] }
 0x1ea   : > { %1073 = vrot.lane.b32.xlu0 %v663_v18, %s3787_s20  ;;  %v1967_v1 = vsel %vm1958_vm8, %v1934_v60, %v4352_v51  ;;  %v5620_v51 = vld [vmem:[#allocation9_spill] sm:$0xff]  ;;  %v4700_v18 = vld [vmem:[#allocation2 + $0x141] sm:$0xff] }
 0x1eb   : > { %v4662_v13 = vpop.permute.xlu1 %791  ;;  %v2000_v41 = vsel %vm1991_vm9, %v1967_v1, %v4367_v55  ;;  %v5623_v60 = vld [vmem:[#allocation10_spill] sm:$0xff]  ;;  %v5624_v1 = vld [vmem:[#allocation15_spill] sm:$0xff] }
 0x1ec   : > { %3441 = vmatprep.mubr.msk.f32.mxu0 %vm2029_vm10, %v2000_v41  ;;  %v4667_v10 = vpop.permute.xlu0 %1187  ;;  %v1869_v33 = vsel %vm1859_vm5, %v1836_v30, %v5623_v60  ;;  %v5625_v41 = vld [vmem:[#allocation6_spill] sm:$0xff]  ;;  %v5627_v60 = vld [vmem:[#allocation19_spill] sm:$0xff] }
 0x1ed   : > { %1567 = vrot.lane.b32.xlu1 %v5619_v0, %s3790_s23 }
 0x1ee   : > { %1581 = vrot.lane.b32.xlu0 %v4671_v36, %s3790_s23 }
 0x1ef   : > { %v1300_v8 = vpop.permute.xlu1 %1299 }
 0x1f0   : > { %v4675_v40 = vpop.permute.xlu0 %1695 }
 0x1f1   : > { %805 = vrot.lane.b32.xlu1 %v5620_v51, %s3785_s18  ;;  %v1902_v51 = vsel %vm1892_vm6, %v1869_v33, %v1300_v8  ;;  %v4733_v33 = vld [vmem:[#allocation2 + $0xf8] sm:$0xff] }
 0x1f2   : > { %1201 = vrot.lane.b32.xlu0 %v4671_v36, %s3788_s21  ;;  %5628 = vst [vmem:[#allocation13_spill] sm:$0xff] %v4733_v33 }
 0x1f3   : > { %v4681_v55 = vpop.permute.xlu1 %919 }
 0x1f4   : > { %v4683_v57 = vpop.permute.xlu0 %933 }
 0x1f5   : > { %1313 = vrot.lane.b32.xlu1 %v5621_v7, %s3789_s22 }
 0x1f6   : > { %1709 = vrot.lane.b32.xlu0 %v4687_v45, %s3792_s8 }
 0x1f7   : > { %v1428_v4 = vpop.permute.xlu1 %1427 }
 0x1f8   : > { %v4694_v24 = vpop.permute.xlu0 %1441  ;;  %v1935_v49 = vsel %vm1925_vm7, %v1902_v51, %v1428_v4 }
 0x1f9   : > { %807 = vrot.lane.b32.xlu1 %v5619_v0, %s3785_s18  ;;  %v1771_v0 = vsel %vm277_vm0, %v5625_v41, %v790_v29  ;;  %v5629_v41 = vld [vmem:[#allocation14_spill] sm:$0xff] }
 0x1fa   : > { %1203 = vrot.lane.b32.xlu0 %v4700_v18, %s3788_s21  ;;  %v1804_v30 = vsel %vm1793_vm3, %v1771_v0, %v5626_v44 }
 0x1fb   : > { %v1048_v34 = vpop.permute.xlu1 %1047  ;;  %v1837_v51 = vsel %vm1826_vm4, %v1804_v30, %v5629_v41 }
 0x1fc   : > { %v4705_v42 = vpop.permute.xlu0 %1061 }
 0x1fd   : > { %1315 = vrot.lane.b32.xlu1 %v5624_v1, %s3789_s22 }
 0x1fe   : > { %1711 = vrot.lane.b32.xlu0 %v4711_v35, %s3792_s8 }
 0x1ff   : > { %v1556_v7 = vpop.permute.xlu1 %1555 }
 0x200   : > { %v1968_v22 = vsel %vm1958_vm8, %v1935_v49, %v1556_v7  ;;  %v4720_v62 = vpop.permute.xlu0 %1569  ;;  %v5630_v49 = vld [vmem:[#allocation16_spill] sm:$0xff] }
 0x201   : > { %935 = vrot.lane.b32.xlu1 %v5624_v1, %s3786_s19  ;;  %v2001_v29 = vsel %vm1991_vm9, %v1968_v22, %v5627_v60  ;;  %v665_v1 = vld [vmem:[#allocation2 + $0x150] sm:$0xff]  ;;  %v1870_v7 = vsel %vm1859_vm5, %v1837_v51, %v5630_v49 }
 0x202   : > { %3442 = vmatmul.mubr.msk.f32.gmra.mrb[8].mxu0 %vm2029_vm10, %v2001_v29  ;;  %949 = vrot.lane.b32.xlu0 %v4687_v45, %s3786_s19 }
 0x203   : > { %v794_v8 = vpop.permute.xlu1 %793 }
 0x204   : > { %v4731_v4 = vpop.permute.xlu0 %1189 }
 0x205   : > { %1443 = vrot.lane.b32.xlu1 %v4733_v33, %s3791_s29 }
 0x206   : > { %1457 = vrot.lane.b32.xlu0 %v665_v1, %s3791_s29 }
 0x207   : > { %v1302_v0 = vpop.permute.xlu1 %1301 }
 0x208   : > { %v1903_v22 = vsel %vm1892_vm6, %v1870_v7, %v1302_v0  ;;  %v4747_v60 = vpop.permute.xlu0 %1697  ;;  %v5632_v7 = vld [vmem:[#allocation8_spill] sm:$0xff] }
 0x209   : > { %v1936_v44 = vsel %vm1925_vm7, %v1903_v22, %v4410_v2  ;;  %1063 = vrot.lane.b32.xlu1 %v4733_v33, %s3787_s20  ;;  %v4759_v2 = vld [vmem:[#allocation2 + $0x151] sm:$0xff]  ;;  %v1772_v22 = vsel %vm277_vm0, %v5632_v7, %v4662_v13 }
 0x20a   : > { %1077 = vrot.lane.b32.xlu0 %v665_v1, %s3787_s20  ;;  %v1969_v30 = vsel %vm1958_vm8, %v1936_v44, %v4432_v25  ;;  %v4784_v44 = vld [vmem:[#allocation2 + $0x159] sm:$0xff]  ;;  %v461_v33 = vld [vmem:[#allocation2 + $0x90] sm:$0xff] }
 0x20b   : > { %v4752_v29 = vpop.permute.xlu1 %795  ;;  %v2002_v41 = vsel %vm1991_vm9, %v1969_v30, %v4469_v63  ;;  %v4771_v63 = vld [vmem:[#allocation2 + $0x152] sm:$0xff] }
 0x20c   : > { %3444 = vmatprep.mubr.msk.f32.mxu0 %vm2029_vm10, %v2002_v41  ;;  %v4763_v1 = vpop.permute.xlu0 %1191 }
 0x20d   : > { %1571 = vrot.lane.b32.xlu1 %v4415_v12, %s3790_s23  ;;  %5631 = vst [vmem:[#allocation9_spill] sm:$0xff] %v4763_v1  ;;  %v5633_v1 = vld [vmem:[#allocation18_spill] sm:$0xff] }
 0x20e   : > { %1585 = vrot.lane.b32.xlu0 %v4759_v2, %s3790_s23 }
 0x20f   : > { %v1304_v51 = vpop.permute.xlu1 %1303 }
 0x210   : > { %v4773_v0 = vpop.permute.xlu0 %1699 }
 0x211   : > { %809 = vrot.lane.b32.xlu1 %v4378_v32, %s3785_s18  ;;  %v1805_v32 = vsel %vm1793_vm3, %v1772_v22, %v4681_v55  ;;  %v4795_v55 = vld [vmem:[#allocation2 + $0x15a] sm:$0xff] }
 0x212   : > { %1205 = vrot.lane.b32.xlu0 %v4759_v2, %s3788_s21 }
 0x213   : > { %v924_v25 = vpop.permute.xlu1 %923 }
 0x214   : > { %v4789_v41 = vpop.permute.xlu0 %937 }
 0x215   : > { %1317 = vrot.lane.b32.xlu1 %v4403_v5, %s3789_s22  ;;  %v1838_v5 = vsel %vm1826_vm4, %v1805_v32, %v1048_v34 }
 0x216   : > { %1713 = vrot.lane.b32.xlu0 %v4771_v63, %s3792_s8  ;;  %v1871_v13 = vsel %vm1859_vm5, %v1838_v5, %v5633_v1 }
 0x217   : > { %v1432_v49 = vpop.permute.xlu1 %1431  ;;  %v1904_v7 = vsel %vm1892_vm6, %v1871_v13, %v1304_v51  ;;  %v4814_v51 = vld [vmem:[#allocation2 + $0x110] sm:$0xff] }
 0x218   : > { %v1937_v34 = vsel %vm1925_vm7, %v1904_v7, %v1432_v49  ;;  %5634 = vst [vmem:[#allocation12_spill] sm:$0xff] %v4814_v51 }
 0x219   : > { %811 = vrot.lane.b32.xlu1 %v4415_v12, %s3785_s18  ;;  %v1773_v12 = vsel %vm277_vm0, %v461_v33, %v794_v8  ;;  %v4809_v8 = vpop.permute.xlu0 %1445 }
 0x21a   : > { %1207 = vrot.lane.b32.xlu0 %v4784_v44, %s3788_s21  ;;  %v1806_v1 = vsel %vm1793_vm3, %v1773_v12, %v4397_v52  ;;  %v667_v52 = vld [vmem:[#allocation2 + $0x168] sm:$0xff] }
 0x21b   : > { %v1052_v30 = vpop.permute.xlu1 %1051  ;;  %v1839_v49 = vsel %vm1826_vm4, %v1806_v1, %v4421_v23  ;;  %v4856_v1 = vld [vmem:[#allocation2 + $0x16a] sm:$0xff] }
 0x21d   : > { %1319 = vrot.lane.b32.xlu1 %v4425_v46, %s3789_s22  ;;  %v4823_v13 = vpop.permute.xlu0 %1065 }
 0x21e   : > { %1715 = vrot.lane.b32.xlu0 %v4795_v55, %s3792_s8 }
 0x21f   : > { %v1560_v22 = vpop.permute.xlu1 %1559 }
 0x220   : > { %v1970_v32 = vsel %vm1958_vm8, %v1937_v34, %v1560_v22  ;;  %v4840_v22 = vld [vmem:[#allocation2 + $0x169] sm:$0xff] }
 0x221   : > { %939 = vrot.lane.b32.xlu1 %v4425_v46, %s3786_s19  ;;  %v2003_v5 = vsel %vm1991_vm9, %v1970_v32, %v4488_v21  ;;  %v1872_v21 = vsel %vm1859_vm5, %v1839_v49, %v4452_v20  ;;  %5635 = vst [vmem:[#allocation7_spill] sm:$0xff] %v4840_v22  ;;  %v5637_v49 = vld [vmem:[#allocation17_spill] sm:$0xff] }
 0x222   : > { %3445 = vmatmul.mubr.msk.f32.gmra.mrb[10].mxu0 %vm2029_vm10, %v2003_v5  ;;  %953 = vrot.lane.b32.xlu0 %v4771_v63, %s3786_s19 }
 0x223   : > { %v798_v33 = vpop.permute.xlu1 %797 }
 0x225   : > { %1447 = vrot.lane.b32.xlu1 %v4814_v51, %s3791_s29 }
 0x226   : > { %1461 = vrot.lane.b32.xlu0 %v667_v52, %s3791_s29 }
 0x227   : > { %v1306_v46 = vpop.permute.xlu1 %1305 }
 0x228   : > { %v1905_v12 = vsel %vm1892_vm6, %v1872_v21, %v1306_v46  ;;  %v4866_v46 = vld [vmem:[#allocation2 + $0x171] sm:$0xff] }
 0x229   : > { %v1938_v7 = vsel %vm1925_vm7, %v1905_v12, %v4504_v14  ;;  %1067 = vrot.lane.b32.xlu1 %v4814_v51, %s3787_s20  ;;  %v4842_v14 = vpop.permute.xlu0 %1573  ;;  %5638 = vst [vmem:[#allocation15_spill] sm:$0xff] %v4866_v46  ;;  %v4876_v12 = vld [vmem:[%s5582_s2] ss:$0 sm:$0xff] }
 0x22a   : > { %1081 = vrot.lane.b32.xlu0 %v667_v52, %s3787_s20  ;;  %v1971_v23 = vsel %vm1958_vm8, %v1938_v7, %v4534_v17  ;;  %v463_v7 = vld [vmem:[#allocation2 + $0xa8] sm:$0xff] }
 0x22b   : > { %v4833_v34 = vpop.permute.xlu1 %799  ;;  %v2004_v20 = vsel %vm1991_vm9, %v1971_v23, %v4557_v9 }
 0x22c   : > { %3447 = vmatprep.mubr.msk.f32.mxu0 %vm2029_vm10, %v2004_v20 }
 0x22d   : > { %1575 = vrot.lane.b32.xlu1 %v4508_v31, %s3790_s23  ;;  %v4852_v9 = vpop.permute.xlu0 %1193 }
 0x22e   : > { %1589 = vrot.lane.b32.xlu0 %v4840_v22, %s3790_s23  ;;  %5636 = vst [vmem:[#allocation10_spill] sm:$0xff] %v4852_v9 }
 0x22f   : > { %v1308_v32 = vpop.permute.xlu1 %1307 }
 0x231   : > { %813 = vrot.lane.b32.xlu1 %v4484_v58, %s3785_s18  ;;  %v1774_v58 = vsel %vm277_vm0, %v5637_v49, %v4752_v29  ;;  %v4890_v49 = vld [vmem:[#allocation2 + $0x172] sm:$0xff] }
 0x232   : > { %1209 = vrot.lane.b32.xlu0 %v4840_v22, %s3788_s21  ;;  %v1807_v52 = vsel %vm1793_vm3, %v1774_v58, %v924_v25  ;;  %v1775_v58 = vsel %vm277_vm0, %v463_v7, %v798_v33 }
 0x233   : > { %v4850_v17 = vpop.permute.xlu1 %927  ;;  %v1840_v21 = vsel %vm1826_vm4, %v1807_v52, %v1052_v30  ;;  %v1808_v33 = vsel %vm1793_vm3, %v1775_v58, %v4496_v38 }
 0x234   : > { %v1873_v30 = vsel %vm1859_vm5, %v1840_v21, %v4480_v48  ;;  %v1841_v38 = vsel %vm1826_vm4, %v1808_v33, %v4519_v19 }
 0x235   : > { %1321 = vrot.lane.b32.xlu1 %v4500_v28, %s3789_s22  ;;  %v4869_v28 = vpop.permute.xlu0 %1701  ;;  %v1906_v52 = vsel %vm1892_vm6, %v1873_v30, %v1308_v32 }
 0x236   : > { %1717 = vrot.lane.b32.xlu0 %v4856_v1, %s3792_s8 }
 0x237   : > { %v1436_v5 = vpop.permute.xlu1 %1435 }
 0x238   : > { %v1939_v22 = vsel %vm1925_vm7, %v1906_v52, %v1436_v5 }
 0x239   : > { %815 = vrot.lane.b32.xlu1 %v4508_v31, %s3785_s18  ;;  %v4883_v31 = vld [vmem:[%s5583_s3] ss:$0 sm:$0xff] }
 0x23a   : > { %1211 = vrot.lane.b32.xlu0 %v4866_v46, %s3788_s21 }
 0x23b   : > { %v4878_v29 = vpop.permute.xlu1 %1055 }
 0x23c   : > { %v3431_v25 = vpop.f32.mrb[0].mxu0 }
 0x23d   : > { %v2363_v23 = vmul.f32 %v3431_v25, %v4876_v12  ;;  %1323 = vrot.lane.b32.xlu1 %v4524_v54, %s3789_s22  ;;  %v2196_v20 = vpop.f32.mrb[1].mxu0  ;;  %v4899_v25 = vpop.permute.xlu0 %1195 }
 0x23e   : > { %v2362_v51 = vmul.f32 %v4876_v12, %v2196_v20  ;;  %1719 = vrot.lane.b32.xlu0 %v4890_v49, %s3792_s8 }
 0x23f   : > { %v2402_v48 = vadd.f32 %v4883_v31, %v2363_v23  ;;  %v1564_v21 = vpop.permute.xlu1 %1563 }
 0x240   : > { %v2401_v46 = vadd.f32 %v4883_v31, %v2362_v51  ;;  %v1972_v9 = vsel %vm1958_vm8, %v1939_v22, %v1564_v21  ;;  %v4912_v22 = vld [vmem:[#allocation2 + $0x128] sm:$0xff] }
 0x241   : > { %v3276_v32 = vmul.f32 -1.442695, %v2402_v48  ;;  %943 = vrot.lane.b32.xlu1 %v4524_v54, %s3786_s19  ;;  %v2005_v7 = vsel %vm1991_vm9, %v1972_v9, %v4579_v43  ;;  %v669_v54 = vld [vmem:[#allocation2 + $0x180] sm:$0xff]  ;;  %v4918_v30 = vpop.permute.xlu0 %1703  ;;  %v1874_v9 = vsel %vm1859_vm5, %v1841_v38, %v4545_v56 }
 0x242   : > { %v3275_v5 = vmul.f32 -1.442695, %v2401_v46  ;;  %3448 = vmatmul.mubr.msk.f32.gmra.mrb[12].mxu0 %vm2029_vm10, %v2005_v7  ;;  %957 = vrot.lane.b32.xlu0 %v4856_v1, %s3786_s19  ;;  %v733_v38 = vld [vmem:[#allocation2 + $0x182] sm:$0xff] }
 0x243   : > { %3590 = vpow2.f32 %v3276_v32  ;;  %v802_v51 = vpop.permute.xlu1 %801 }
 0x244   : > { %3592 = vpow2.f32 %v3275_v5 }
 0x245   : > { %1451 = vrot.lane.b32.xlu1 %v4912_v22, %s3791_s29  ;;  %v4935_v21 = vpop.permute.xlu0 %941 }
 0x246   : > { %1465 = vrot.lane.b32.xlu0 %v669_v54, %s3791_s29 }
 0x247   : > { %v1310_v43 = vpop.permute.xlu1 %1309 }
 0x248   : > { %v1907_v23 = vsel %vm1892_vm6, %v1874_v9, %v1310_v43  ;;  %v1776_v43 = vsel %vm277_vm0, %v4454_v50, %v4833_v34  ;;  %v4967_v34 = vld [vmem:[#allocation2 + $0x18a] sm:$0xff] }
 0x249   : > { %v1940_v20 = vsel %vm1925_vm7, %v1907_v23, %v4598_v11  ;;  %1071 = vrot.lane.b32.xlu1 %v4912_v22, %s3787_s20  ;;  %v701_v11 = vld [vmem:[#allocation2 + $0x181] sm:$0xff] }
 0x24a   : > { %1085 = vrot.lane.b32.xlu0 %v669_v54, %s3787_s20  ;;  %v1973_v19 = vsel %vm1958_vm8, %v1940_v20, %v4630_v59 }
 0x24b   : > { %v4931_v58 = vpop.permute.xlu1 %803  ;;  %v2006_v52 = vsel %vm1991_vm9, %v1973_v19, %v4653_v61  ;;  %v4943_v61 = vpop.permute.xlu0 %1449 }
 0x24c   : > { %3450 = vmatprep.mubr.msk.f32.mxu0 %vm2029_vm10, %v2006_v52 }
 0x24d   : > { %v3591_v56 = vpop.eup %3590  ;;  %1579 = vrot.lane.b32.xlu1 %v4610_v6, %s3790_s23 }
 0x24e   : > { %v3593_v33 = vpop.eup %3592  ;;  %v2530_v32 = vadd.f32 1.0, %v3591_v56  ;;  %1593 = vrot.lane.b32.xlu0 %v701_v11, %s3790_s23 }
 0x24f   : > { %v2529_v7 = vadd.f32 1.0, %v3593_v33  ;;  %v1312_v59 = vpop.permute.xlu1 %1311  ;;  %v4954_v9 = vpop.permute.xlu0 %1069 }
 0x250   : > { %3594 = vrcp.f32 %v2530_v32 }
 0x251   : > { %3596 = vrcp.f32 %v2529_v7  ;;  %817 = vrot.lane.b32.xlu1 %v4575_v16, %s3785_s18  ;;  %v1809_v16 = vsel %vm1793_vm3, %v1776_v43, %v4850_v17 }
 0x252   : > { %1213 = vrot.lane.b32.xlu0 %v701_v11, %s3788_s21  ;;  %v465_v11 = vld [vmem:[#allocation2 + $0xc0] sm:$0xff] }
 0x253   : > { %v4946_v5 = vpop.permute.xlu1 %931  ;;  %v1777_v17 = vsel %vm277_vm0, %v465_v11, %v802_v51 }
 0x254   : > { %v1810_v32 = vsel %vm1793_vm3, %v1777_v17, %v4587_v27 }
 0x255   : > { %1325 = vrot.lane.b32.xlu1 %v4591_v37, %s3789_s22  ;;  %v1842_v37 = vsel %vm1826_vm4, %v1809_v16, %v4878_v29  ;;  %v1843_v43 = vsel %vm1826_vm4, %v1810_v32, %v4615_v15 }
 0x256   : > { %1721 = vrot.lane.b32.xlu0 %v733_v38, %s3792_s8  ;;  %v1875_v50 = vsel %vm1859_vm5, %v1842_v37, %v4571_v39  ;;  %v672_v39 = vld [vmem:[#allocation2 + $0x1a0] sm:$0xff] }
 0x257   : > { %v1440_v54 = vpop.permute.xlu1 %1439  ;;  %v1908_v29 = vsel %vm1892_vm6, %v1875_v50, %v1312_v59  ;;  %v704_v59 = vld [vmem:[#allocation2 + $0x1a1] sm:$0xff] }
 0x259   : > { %819 = vrot.lane.b32.xlu1 %v4610_v6, %s3785_s18  ;;  %v4969_v6 = vpop.permute.xlu0 %1577 }
 0x25a   : > { %v3595_v23 = vpop.eup %3594  ;;  %1341 = vrot.lane.b32.xlu0 %v733_v38, %s3789_s22 }
 0x25b   : > { %v3597_v20 = vpop.eup %3596  ;;  %v1060_v19 = vpop.permute.xlu1 %1059  ;;  %v2626_v56 = vmul.f32 %v3595_v23, %v2402_v48 }
 0x25c   : > { %v2625_v52 = vmul.f32 %v3597_v20, %v2401_v46  ;;  %v1941_v46 = vsel %vm1925_vm7, %v1908_v29, %v1440_v54  ;;  %v4989_v54 = vld [vmem:[#allocation2 + $0x140] sm:$0xff] }
 0x25d   : > { %1327 = vrot.lane.b32.xlu1 %v4621_v26, %s3789_s22  ;;  %v4987_v38 = vpop.permute.xlu0 %1197 }
 0x25e   : > { %3481 = vmatprep.mubr.msk.f32.mxu1 %vm1859_vm5, %v2625_v52  ;;  %1343 = vrot.lane.b32.xlu0 %v4967_v34, %s3789_s22 }
 0x25f   : > { %v1568_v48 = vpop.permute.xlu1 %1567  ;;  %3482 = vmatmul.mubr.msk.f32.vlgmr.msra.gmra.mrb[0].mxu1 %vm1859_vm5, %v2626_v56 }
 0x260   : > { %v1974_v33 = vsel %vm1958_vm8, %v1941_v46, %v1568_v48  ;;  %v467_v46 = vld [vmem:[#allocation2 + $0xd8] sm:$0xff] }
 0x261   : > { %947 = vrot.lane.b32.xlu1 %v4621_v26, %s3786_s19  ;;  %v2007_v51 = vsel %vm1991_vm9, %v1974_v33, %v4675_v40  ;;  %v1876_v26 = vsel %vm1859_vm5, %v1843_v43, %v4641_v47  ;;  %v736_v40 = vld [vmem:[#allocation2 + $0x1a2] sm:$0xff]  ;;  %v5003_v37 = vpop.permute.xlu0 %1705 }
 0x262   : > { %3451 = vmatmul.mubr.msk.f32.gmra.mrb[14].mxu0 %vm2029_vm10, %v2007_v51  ;;  %1471 = vrot.lane.b32.xlu0 %v672_v39, %s3791_s29 }
 0x263   : > { %v806_v7 = vpop.permute.xlu1 %805 }
 0x265   : > { %1455 = vrot.lane.b32.xlu1 %v4989_v54, %s3791_s29  ;;  %v5015_v52 = vpop.permute.xlu0 %1199 }
 0x266   : > { %1599 = vrot.lane.b32.xlu0 %v704_v59, %s3790_s23 }
 0x267   : > { %v1314_v27 = vpop.permute.xlu1 %1313 }
 0x268   : > { %v1909_v16 = vsel %vm1892_vm6, %v1876_v26, %v1314_v27 }
 0x269   : > { %v1942_v23 = vsel %vm1925_vm7, %v1909_v16, %v4694_v24  ;;  %1075 = vrot.lane.b32.xlu1 %v4989_v54, %s3787_s20  ;;  %v5058_v16 = vld [vmem:[#allocation2 + $0x158] sm:$0xff] }
 0x26a   : > { %v1975_v15 = vsel %vm1958_vm8, %v1942_v23, %v4720_v62  ;;  %1727 = vrot.lane.b32.xlu0 %v736_v40, %s3792_s8  ;;  %v5023_v62 = vpop.permute.xlu0 %1707 }
 0x26b   : > { %v5008_v20 = vpop.permute.xlu1 %807  ;;  %v2008_v47 = vsel %vm1991_vm9, %v1975_v15, %v4747_v60  ;;  %v1778_v60 = vsel %vm277_vm0, %v4547_v3, %v4931_v58  ;;  %v1779_v58 = vsel %vm277_vm0, %v467_v46, %v806_v7 }
 0x26c   : > { %3453 = vmatprep.mubr.msk.f32.mxu0 %vm2029_vm10, %v2008_v47  ;;  %v1811_v50 = vsel %vm1793_vm3, %v1778_v60, %v4946_v5  ;;  %v1812_v59 = vsel %vm1793_vm3, %v1779_v58, %v4683_v57 }
 0x26d   : > { %1583 = vrot.lane.b32.xlu1 %v4700_v18, %s3790_s23  ;;  %v1845_v57 = vsel %vm1826_vm4, %v1812_v59, %v4705_v42 }
 0x26e   : > { %v5035_v29 = vpop.permute.xlu0 %945 }
 0x26f   : > { %v1316_v24 = vpop.permute.xlu1 %1315 }
 0x271   : > { %821 = vrot.lane.b32.xlu1 %v4671_v36, %s3785_s18  ;;  %v1844_v36 = vsel %vm1826_vm4, %v1811_v50, %v1060_v19 }
 0x272   : > { %v1877_v48 = vsel %vm1859_vm5, %v1844_v36, %v4667_v10  ;;  %v5055_v27 = vpop.permute.xlu0 %1453 }
 0x273   : > { %v5019_v56 = vpop.permute.xlu1 %935 }
 0x275   : > { %1329 = vrot.lane.b32.xlu1 %v4687_v45, %s3789_s22 }
 0x276   : > { %v5066_v23 = vpop.permute.xlu0 %1073 }
 0x277   : > { %v1444_v11 = vpop.permute.xlu1 %1443 }
 0x279   : > { %823 = vrot.lane.b32.xlu1 %v4700_v18, %s3785_s18  ;;  %v1910_v18 = vsel %vm1892_vm6, %v1877_v48, %v1316_v24 }
 0x27a   : > { %v1943_v19 = vsel %vm1925_vm7, %v1910_v18, %v1444_v11  ;;  %v5082_v50 = vpop.permute.xlu0 %1581  ;;  %v1780_v18 = vsel %vm277_vm0, %v4643_v53, %v5008_v20 }
 0x27b   : > { %v5033_v17 = vpop.permute.xlu1 %1063 }
 0x27c   : > { %v3434_v45 = vpop.f32.mrb[2].mxu0 }
 0x27d   : > { %v2365_v39 = vmul.f32 %v3434_v45, %v4876_v12  ;;  %1331 = vrot.lane.b32.xlu1 %v4711_v35, %s3789_s22  ;;  %v2206_v3 = vpop.f32.mrb[3].mxu0 }
 0x27e   : > { %v2364_v5 = vmul.f32 %v4876_v12, %v2206_v3 }
 0x27f   : > { %v2404_v33 = vadd.f32 %v4883_v31, %v2365_v39  ;;  %v1572_v32 = vpop.permute.xlu1 %1571 }
 0x280   : > { %v2403_v51 = vadd.f32 %v4883_v31, %v2364_v5  ;;  %v1976_v10 = vsel %vm1958_vm8, %v1943_v19, %v1572_v32  ;;  %v1813_v5 = vsel %vm1793_vm3, %v1780_v18, %v5019_v56  ;;  %v469_v56 = vld [vmem:[#allocation2 + $0xf0] sm:$0xff] }
 0x281   : > { %v3278_v43 = vmul.f32 -1.442695, %v2404_v33  ;;  %951 = vrot.lane.b32.xlu1 %v4711_v35, %s3786_s19  ;;  %v2009_v7 = vsel %vm1991_vm9, %v1976_v10, %v4773_v0  ;;  %v1878_v0 = vsel %vm1859_vm5, %v1845_v57, %v4731_v4  ;;  %v1846_v10 = vsel %vm1826_vm4, %v1813_v5, %v5033_v17  ;;  %v5639_v57 = vld [vmem:[#allocation9_spill] sm:$0xff]  ;;  %v5641_v5 = vld [vmem:[#allocation15_spill] sm:$0xff] }
 0x282   : > { %v3277_v26 = vmul.f32 -1.442695, %v2403_v51  ;;  %3454 = vmatmul.mubr.msk.f32.gmra.mrb[16].mxu0 %vm2029_vm10, %v2009_v7 }
 0x283   : > { %3598 = vpow2.f32 %v3278_v43  ;;  %v810_v40 = vpop.permute.xlu1 %809 }
 0x284   : > { %3600 = vpow2.f32 %v3277_v26 }
 0x285   : > { %1459 = vrot.lane.b32.xlu1 %v5058_v16, %s3791_s29 }
 0x287   : > { %v1318_v35 = vpop.permute.xlu1 %1317 }
 0x288   : > { %v1911_v15 = vsel %vm1892_vm6, %v1878_v0, %v1318_v35  ;;  %v1879_v35 = vsel %vm1859_vm5, %v1846_v10, %v5639_v57 }
 0x289   : > { %v1944_v47 = vsel %vm1925_vm7, %v1911_v15, %v4809_v8  ;;  %1079 = vrot.lane.b32.xlu1 %v5058_v16, %s3787_s20 }
 0x28a   : > { %v1977_v42 = vsel %vm1958_vm8, %v1944_v47, %v4842_v14 }
 0x28b   : > { %v5075_v24 = vpop.permute.xlu1 %811  ;;  %v2010_v11 = vsel %vm1991_vm9, %v1977_v42, %v4869_v28  ;;  %v5088_v28 = vpop.permute.xlu0 %1201 }
 0x28c   : > { %3456 = vmatprep.mubr.msk.f32.mxu0 %vm2029_vm10, %v2010_v11  ;;  %v5128_v11 = vld [vmem:[#allocation2 + $0x170] sm:$0xff] }
 0x28d   : > { %v3599_v4 = vpop.eup %3598  ;;  %1587 = vrot.lane.b32.xlu1 %v4784_v44, %s3790_s23 }
 0x28e   : > { %v3601_v60 = vpop.eup %3600  ;;  %v2532_v8 = vadd.f32 1.0, %v3599_v4 }
 0x28f   : > { %v2531_v36 = vadd.f32 1.0, %v3601_v60  ;;  %v1320_v45 = vpop.permute.xlu1 %1319  ;;  %v5103_v32 = vpop.permute.xlu0 %1709 }
 0x290   : > { %3602 = vrcp.f32 %v2532_v8  ;;  %v1912_v17 = vsel %vm1892_vm6, %v1879_v35, %v1320_v45  ;;  %v5640_v45 = vld [vmem:[#allocation10_spill] sm:$0xff] }
 0x291   : > { %3604 = vrcp.f32 %v2531_v36  ;;  %825 = vrot.lane.b32.xlu1 %v4759_v2, %s3785_s18 }
 0x293   : > { %v5086_v14 = vpop.permute.xlu1 %939 }
 0x295   : > { %1333 = vrot.lane.b32.xlu1 %v4771_v63, %s3789_s22  ;;  %v3437_v46 = vpop.f32.mrb[4].mxu0 }
 0x296   : > { %v2367_v48 = vmul.f32 %v3437_v46, %v4876_v12  ;;  %v2216_v39 = vpop.f32.mrb[5].mxu0 }
 0x297   : > { %v2366_v3 = vmul.f32 %v4876_v12, %v2216_v39  ;;  %v1448_v58 = vpop.permute.xlu1 %1447 }
 0x298   : > { %v2406_v2 = vadd.f32 %v4883_v31, %v2367_v48  ;;  %v1945_v0 = vsel %vm1925_vm7, %v1912_v17, %v1448_v58  ;;  %v5643_v17 = vld [vmem:[#allocation13_spill] sm:$0xff] }
 0x299   : > { %v2405_v19 = vadd.f32 %v4883_v31, %v2366_v3  ;;  %827 = vrot.lane.b32.xlu1 %v4784_v44, %s3785_s18  ;;  %v1781_v44 = vsel %vm277_vm0, %v469_v56, %v810_v40 }
 0x29a   : > { %v3603_v63 = vpop.eup %3602  ;;  %v3280_v59 = vmul.f32 -1.442695, %v2406_v2  ;;  %v1814_v47 = vsel %vm1793_vm3, %v1781_v44, %v4789_v41 }
 0x29b   : > { %v3605_v43 = vpop.eup %3604  ;;  %v3279_v7 = vmul.f32 -1.442695, %v2405_v19  ;;  %v5107_v53 = vpop.permute.xlu1 %1067  ;;  %v2628_v26 = vmul.f32 %v3603_v63, %v2404_v33  ;;  %v1847_v4 = vsel %vm1826_vm4, %v1814_v47, %v4823_v13  ;;  %v5642_v63 = vld [vmem:[#allocation7_spill] sm:$0xff] }
 0x29c   : > { %v2627_v20 = vmul.f32 %v3605_v43, %v2403_v51  ;;  %3606 = vpow2.f32 %v3280_v59  ;;  %v5118_v33 = vpop.permute.xlu0 %1203 }
 0x29d   : > { %3608 = vpow2.f32 %v3279_v7  ;;  %1335 = vrot.lane.b32.xlu1 %v4795_v55, %s3789_s22 }
 0x29e   : > { %3484 = vmatprep.mubr.msk.f32.mxu1 %vm1859_vm5, %v2627_v20 }
 0x29f   : > { %v1576_v15 = vpop.permute.xlu1 %1575  ;;  %3485 = vmatmul.mubr.msk.f32.gmra.mrb[2].mxu1 %vm1859_vm5, %v2628_v26 }
 0x2a0   : > { %v1978_v51 = vsel %vm1958_vm8, %v1945_v0, %v1576_v15  ;;  %v5134_v8 = vpop.permute.xlu0 %1711  ;;  %v1782_v0 = vsel %vm277_vm0, %v5643_v17, %v5075_v24  ;;  %v471_v24 = vld [vmem:[#allocation2 + $0x108] sm:$0xff] }
 0x2a1   : > { %955 = vrot.lane.b32.xlu1 %v4795_v55, %s3786_s19  ;;  %v2011_v40 = vsel %vm1991_vm9, %v1978_v51, %v4918_v30  ;;  %v1880_v30 = vsel %vm1859_vm5, %v1847_v4, %v5640_v45 }
 0x2a2   : > { %3457 = vmatmul.mubr.msk.f32.gmra.mrb[18].mxu0 %vm2029_vm10, %v2011_v40 }
 0x2a3   : > { %v814_v42 = vpop.permute.xlu1 %813 }
 0x2a4   : > { %v5149_v18 = vpop.permute.xlu0 %949 }
 0x2a5   : > { %1463 = vrot.lane.b32.xlu1 %v5128_v11, %s3791_s29 }
 0x2a6   : > { %v3607_v60 = vpop.eup %3606 }
 0x2a7   : > { %v3609_v41 = vpop.eup %3608  ;;  %v2534_v36 = vadd.f32 1.0, %v3607_v60  ;;  %v1322_v55 = vpop.permute.xlu1 %1321  ;;  %v1783_v60 = vsel %vm277_vm0, %v471_v24, %v814_v42 }
 0x2a8   : > { %v2533_v46 = vadd.f32 1.0, %v3609_v41  ;;  %v1913_v48 = vsel %vm1892_vm6, %v1880_v30, %v1322_v55  ;;  %v5156_v10 = vpop.permute.xlu0 %1457  ;;  %v1816_v45 = vsel %vm1793_vm3, %v1783_v60, %v4935_v21  ;;  %v703_v60 = vld [vmem:[#allocation2 + $0x199] sm:$0xff] }
 0x2a9   : > { %3610 = vrcp.f32 %v2534_v36  ;;  %v1946_v39 = vsel %vm1925_vm7, %v1913_v48, %v4943_v61  ;;  %1083 = vrot.lane.b32.xlu1 %v5128_v11, %s3787_s20  ;;  %v1849_v48 = vsel %vm1826_vm4, %v1816_v45, %v4954_v9 }
 0x2aa   : > { %3612 = vrcp.f32 %v2533_v46  ;;  %v1979_v13 = vsel %vm1958_vm8, %v1946_v39, %v4969_v6  ;;  %v670_v46 = vld [vmem:[#allocation2 + $0x188] sm:$0xff] }
 0x2ab   : > { %v5145_v3 = vpop.permute.xlu1 %815  ;;  %v2012_v58 = vsel %vm1991_vm9, %v1979_v13, %v5003_v37 }
 0x2ac   : > { %3459 = vmatprep.mubr.msk.f32.mxu0 %vm2029_vm10, %v2012_v58  ;;  %v5165_v44 = vpop.permute.xlu0 %1077 }
 0x2ad   : > { %1591 = vrot.lane.b32.xlu1 %v5641_v5, %s3790_s23 }
 0x2af   : > { %v1324_v61 = vpop.permute.xlu1 %1323 }
 0x2b1   : > { %829 = vrot.lane.b32.xlu1 %v5642_v63, %s3785_s18 }
 0x2b3   : > { %v3611_v59 = vpop.eup %3610  ;;  %v5158_v6 = vpop.permute.xlu1 %943 }
 0x2b4   : > { %v3613_v43 = vpop.eup %3612  ;;  %v2630_v20 = vmul.f32 %v3611_v59, %v2406_v2 }
 0x2b5   : > { %v2629_v7 = vmul.f32 %v3613_v43, %v2405_v19  ;;  %1337 = vrot.lane.b32.xlu1 %v4856_v1, %s3789_s22  ;;  %v3440_v37 = vpop.f32.mrb[6].mxu0  ;;  %v1815_v1 = vsel %vm1793_vm3, %v1782_v0, %v5086_v14  ;;  %v5185_v14 = vpop.permute.xlu0 %1585  ;;  %v702_v43 = vld [vmem:[#allocation2 + $0x189] sm:$0xff]  ;;  %v671_v0 = vld [vmem:[#allocation2 + $0x198] sm:$0xff] }
 0x2b6   : > { %v2369_v26 = vmul.f32 %v3440_v37, %v4876_v12  ;;  %v2226_v56 = vpop.f32.mrb[7].mxu0  ;;  %v1848_v15 = vsel %vm1826_vm4, %v1815_v1, %v5107_v53 }
 0x2b7   : > { %v2368_v57 = vmul.f32 %v4876_v12, %v2226_v56  ;;  %v1452_v35 = vpop.permute.xlu1 %1451  ;;  %3487 = vmatprep.mubr.msk.f32.mxu1 %vm1859_vm5, %v2629_v7  ;;  %v1881_v4 = vsel %vm1859_vm5, %v1848_v15, %v4899_v25 }
 0x2b8   : > { %v2408_v19 = vadd.f32 %v4883_v31, %v2369_v26  ;;  %3488 = vmatmul.mubr.msk.f32.gmra.mrb[4].mxu1 %vm1859_vm5, %v2630_v20  ;;  %v1914_v41 = vsel %vm1892_vm6, %v1881_v4, %v1324_v61 }
 0x2b9   : > { %v2407_v2 = vadd.f32 %v4883_v31, %v2368_v57  ;;  %831 = vrot.lane.b32.xlu1 %v5641_v5, %s3785_s18  ;;  %v1947_v53 = vsel %vm1925_vm7, %v1914_v41, %v1452_v35  ;;  %v5198_v42 = vpop.permute.xlu0 %1205 }
 0x2ba   : > { %v3282_v51 = vmul.f32 -1.442695, %v2408_v19 }
 0x2bb   : > { %v3281_v47 = vmul.f32 -1.442695, %v2407_v2  ;;  %v5179_v40 = vpop.permute.xlu1 %1071 }
 0x2bc   : > { %3614 = vpow2.f32 %v3282_v51  ;;  %v5644_v51 = vld [vmem:[#allocation12_spill] sm:$0xff] }
 0x2bd   : > { %3616 = vpow2.f32 %v3281_v47  ;;  %1339 = vrot.lane.b32.xlu1 %v4890_v49, %s3789_s22  ;;  %v5209_v63 = vpop.permute.xlu0 %1713  ;;  %s3724_s22 = sshll.u32 %s3793_s28, 4  ;;  %s3725_s22 = int_to_ptr.vmem [resolvable:$false] %s3724_s22 }
 0x2be   : > { %p3727_p0 = scmp.lt.s32.totalorder %s5540_s16, %s3725_s22 }
 0x2bf   : > { %v1580_v36 = vpop.permute.xlu1 %1579 }
 0x2c0   : > { %v1980_v55 = vsel %vm1958_vm8, %v1947_v53, %v1580_v36 }
 0x2c1   : > { %959 = vrot.lane.b32.xlu1 %v4890_v49, %s3786_s19  ;;  %v2013_v25 = vsel %vm1991_vm9, %v1980_v55, %v5023_v62  ;;  %v1882_v49 = vsel %vm1859_vm5, %v1849_v48, %v4987_v38  ;;  %s5538_s19 = scalar_lea.hbm %s5587_s7, %s3347_s14 }
 0x2c2   : > { %3460 = vmatmul.mubr.msk.f32.gmra.mrb[20].mxu0 %vm2029_vm10, %v2013_v25  ;;  %v735_v25 = vld [vmem:[#allocation2 + $0x19a] sm:$0xff] }
 0x2c3   : > { %v818_v30 = vpop.permute.xlu1 %817 }
 0x2c5   : > { %1467 = vrot.lane.b32.xlu1 %v670_v46, %s3791_s29 }
 0x2c6   : > { %v3615_v39 = vpop.eup %3614 }
 0x2c7   : > { %v3617_v13 = vpop.eup %3616  ;;  %v2536_v21 = vadd.f32 1.0, %v3615_v39  ;;  %v1326_v58 = vpop.permute.xlu1 %1325 }
 0x2c8   : > { %v2535_v5 = vadd.f32 1.0, %v3617_v13  ;;  %v1915_v62 = vsel %vm1892_vm6, %v1882_v49, %v1326_v58 }
 0x2c9   : > { %3618 = vrcp.f32 %v2536_v21  ;;  %v1948_v61 = vsel %vm1925_vm7, %v1915_v62, %v5055_v27  ;;  %1087 = vrot.lane.b32.xlu1 %v670_v46, %s3787_s20  ;;  %v5219_v27 = vpop.permute.xlu0 %1207  ;;  %s3160_s20 = scalar_lea.sflag [#allocation4], %s269_s9 }
 0x2ca   : > { %3620 = vrcp.f32 %v2535_v5  ;;  %v1981_v9 = vsel %vm1958_vm8, %v1948_v61, %v5082_v50 }
 0x2cb   : > { %v5213_v59 = vpop.permute.xlu1 %819  ;;  %v2014_v38 = vsel %vm1991_vm9, %v1981_v9, %v5103_v32 }
 0x2cc   : > { %3462 = vmatprep.mubr.msk.f32.mxu0 %vm2029_vm10, %v2014_v38 }
 0x2cd   : > { %1595 = vrot.lane.b32.xlu1 %v702_v43, %s3790_s23  ;;  %v5226_v32 = vpop.permute.xlu0 %1715 }
 0x2cf   : > { %v1328_v7 = vpop.permute.xlu1 %1327 }
 0x2d1   : > { %1215 = vrot.lane.b32.xlu1 %v702_v43, %s3788_s21  ;;  %v5242_v36 = vpop.permute.xlu0 %953  ;;  %s3720_s21 = scalar_lea.vmem %s5540_s16, 128 }
 0x2d2   : > { %p3721_p11 = scmp.ne.s32.totalorder %s5540_s16, %s3720_s21 }
 0x2d3   : > { %v3619_v37 = vpop.eup %3618  ;;  %v5222_v20 = vpop.permute.xlu1 %947 }
 0x2d4   : > { %v3621_v26 = vpop.eup %3620  ;;  %v2632_v57 = vmul.f32 %v3619_v37, %v2408_v19  ;;  %p3722_p12 = pnand %p3721_p11, %p3872_p5 }
 0x2d5   : > { %v2631_v50 = vmul.f32 %v3621_v26, %v2407_v2  ;;  %1723 = vrot.lane.b32.xlu1 %v4967_v34, %s3792_s8  ;;  %v3443_v56 = vpop.f32.mrb[8].mxu0  ;;  %v1784_v2 = vsel %vm277_vm0, %v5644_v51, %v5145_v3  ;;  %v473_v3 = vld [vmem:[#allocation2 + $0x120] sm:$0xff]  ;;  %v5256_v13 = vpop.permute.xlu0 %1461 }
 0x2d6   : > { %v2371_v35 = vmul.f32 %v3443_v56, %v4876_v12  ;;  %v2236_v17 = vpop.f32.mrb[9].mxu0  ;;  %v1817_v34 = vsel %vm1793_vm3, %v1784_v2, %v5158_v6  ;;  %v1785_v6 = vsel %vm277_vm0, %v473_v3, %v818_v30  ;;  %p3723_p13 = pneg %p3722_p12 }
 0x2d7   : > { %v2370_v1 = vmul.f32 %v4876_v12, %v2236_v17  ;;  %v1456_v15 = vpop.permute.xlu1 %1455  ;;  %3490 = vmatprep.mubr.msk.f32.mxu1 %vm1859_vm5, %v2631_v50  ;;  %v1850_v24 = vsel %vm1826_vm4, %v1817_v34, %v5179_v40  ;;  %v1818_v39 = vsel %vm1793_vm3, %v1785_v6, %v5035_v29 }
 0x2d8   : > { %v2410_v47 = vadd.f32 %v4883_v31, %v2371_v35  ;;  %3491 = vmatmul.mubr.msk.f32.gmra.mrb[6].mxu1 %vm1859_vm5, %v2632_v57  ;;  %v1883_v55 = vsel %vm1859_vm5, %v1850_v24, %v5015_v52  ;;  %v1851_v21 = vsel %vm1826_vm4, %v1818_v39, %v5066_v23 }
 0x2d9   : > { %v2409_v19 = vadd.f32 %v4883_v31, %v2370_v1  ;;  %1469 = vrot.lane.b32.xlu1 %v671_v0, %s3791_s29  ;;  %v1916_v45 = vsel %vm1892_vm6, %v1883_v55, %v1328_v7  ;;  %v1884_v29 = vsel %vm1859_vm5, %v1851_v21, %v5088_v28  ;;  %v5263_v61 = vpop.permute.xlu0 %1081 }
 0x2da   : > { %v3284_v4 = vmul.f32 -1.442695, %v2410_v47  ;;  %v1949_v40 = vsel %vm1925_vm7, %v1916_v45, %v1456_v15 }
 0x2db   : > { %v3283_v41 = vmul.f32 -1.442695, %v2409_v19  ;;  %v1076_v53 = vpop.permute.xlu1 %1075 }
 0x2dc   : > { %3622 = vpow2.f32 %v3284_v4 }
 0x2dd   : > { %3624 = vpow2.f32 %v3283_v41  ;;  %1597 = vrot.lane.b32.xlu1 %v703_v60, %s3790_s23  ;;  %v1590_v28 = vpop.permute.xlu0 %1589  ;;  %v475_v41 = vld [vmem:[#allocation2 + $0x138] sm:$0xff]  ;;  %s3726_s23 = scalar_lea.vmem %s3725_s22, 256 }
 0x2de   : > { %p3728_p1 = scmp.lt.s32.totalorder %s3726_s23, %s3720_s21 }
 0x2df   : > { %v1584_v46 = vpop.permute.xlu1 %1583 }
 0x2e0   : > { %v1982_v48 = vsel %vm1958_vm8, %v1949_v40, %v1584_v46  ;;  %p3729_p2 = por %p3728_p1, %p3727_p0 }
 0x2e1   : > { %1725 = vrot.lane.b32.xlu1 %v735_v25, %s3792_s8  ;;  %v2015_v52 = vsel %vm1991_vm9, %v1982_v48, %v5134_v8  ;;  %v5277_v57 = vpop.permute.xlu0 %1209 }
 0x2e2   : > { %3463 = vmatmul.mubr.msk.f32.gmra.mrb[22].mxu0 %vm2029_vm10, %v2015_v52  ;;  %p3730_p3 = pnand %p3729_p2, %p3723_p13 }
 0x2e3   : > { %v822_v30 = vpop.permute.xlu1 %821 }
 0x2e5   : > { %v1718_v34 = vpop.permute.xlu0 %1717 }
 0x2e6   : > { %v3623_v58 = vpop.eup %3622 }
 0x2e7   : > { %v3625_v49 = vpop.eup %3624  ;;  %v2538_v5 = vadd.f32 1.0, %v3623_v58  ;;  %v1330_v62 = vpop.permute.xlu1 %1329 }
 0x2e8   : > { %v2537_v9 = vadd.f32 1.0, %v3625_v49  ;;  %v1917_v8 = vsel %vm1892_vm6, %v1884_v29, %v1330_v62 }
 0x2e9   : > { %3626 = vrcp.f32 %v2538_v5  ;;  %v1950_v38 = vsel %vm1925_vm7, %v1917_v8, %v5156_v10  ;;  %v5296_v6 = vpop.permute.xlu0 %1211 }
 0x2ea   : > { %3628 = vrcp.f32 %v2537_v9  ;;  %v1983_v23 = vsel %vm1958_vm8, %v1950_v38, %v5185_v14 }
 0x2eb   : > { %v5270_v43 = vpop.permute.xlu1 %823  ;;  %v2016_v7 = vsel %vm1991_vm9, %v1983_v23, %v5209_v63  ;;  %v1786_v63 = vsel %vm277_vm0, %v4912_v22, %v5213_v59  ;;  %v1787_v59 = vsel %vm277_vm0, %v475_v41, %v822_v30 }
 0x2ec   : > { %3465 = vmatprep.mubr.msk.f32.mxu0 %vm2029_vm10, %v2016_v7  ;;  %v1819_v2 = vsel %vm1793_vm3, %v1786_v63, %v5222_v20  ;;  %v1820_v45 = vsel %vm1793_vm3, %v1787_v59, %v5149_v18 }
 0x2ed   : > { %v1853_v40 = vsel %vm1826_vm4, %v1820_v45, %v5165_v44  ;;  %v1720_v48 = vpop.permute.xlu0 %1719 }
 0x2ee   : > { %v1886_v21 = vsel %vm1859_vm5, %v1853_v40, %v5198_v42 }
 0x2ef   : > { %v1332_v37 = vpop.permute.xlu1 %1331 }
 0x2f1   : > { %v5315_v62 = vpop.permute.xlu0 %957 }
 0x2f3   : > { %v3627_v26 = vpop.eup %3626  ;;  %v5275_v50 = vpop.permute.xlu1 %951 }
 0x2f4   : > { %v3629_v56 = vpop.eup %3628  ;;  %v2634_v17 = vmul.f32 %v3627_v26, %v2410_v47 }
 0x2f5   : > { %v2633_v10 = vmul.f32 %v3629_v56, %v2409_v19  ;;  %v3446_v35 = vpop.f32.mrb[10].mxu0  ;;  %v1852_v19 = vsel %vm1826_vm4, %v1819_v2, %v1076_v53  ;;  %v1466_v42 = vpop.permute.xlu0 %1465  ;;  %v477_v2 = vld [vmem:[#allocation2 + $0x150] sm:$0xff] }
 0x2f6   : > { %v2373_v14 = vmul.f32 %v3446_v35, %v4876_v12  ;;  %v2246_v0 = vpop.f32.mrb[11].mxu0  ;;  %v1885_v22 = vsel %vm1859_vm5, %v1852_v19, %v5118_v33  ;;  %v1788_v35 = vsel %vm277_vm0, %v4989_v54, %v5270_v43 }
 0x2f7   : > { %v2372_v1 = vmul.f32 %v4876_v12, %v2246_v0  ;;  %v1460_v15 = vpop.permute.xlu1 %1459  ;;  %3493 = vmatprep.mubr.msk.f32.mxu1 %vm1859_vm5, %v2633_v10  ;;  %v1918_v3 = vsel %vm1892_vm6, %v1885_v22, %v1332_v37 }
 0x2f8   : > { %v2412_v51 = vadd.f32 %v4883_v31, %v2373_v14  ;;  %3494 = vmatmul.mubr.msk.f32.gmra.mrb[8].mxu1 %vm1859_vm5, %v2634_v17  ;;  %v1951_v20 = vsel %vm1925_vm7, %v1918_v3, %v1460_v15  ;;  %v1821_v14 = vsel %vm1793_vm3, %v1788_v35, %v5275_v50 }
 0x2f9   : > { %v2411_v47 = vadd.f32 %v4883_v31, %v2372_v1  ;;  %v5323_v10 = vpop.permute.xlu0 %1085 }
 0x2fa   : > { %v3286_v24 = vmul.f32 -1.442695, %v2412_v51 }
 0x2fb   : > { %v3285_v4 = vmul.f32 -1.442695, %v2411_v47  ;;  %v1080_v60 = vpop.permute.xlu1 %1079 }
 0x2fc   : > { %3630 = vpow2.f32 %v3286_v24  ;;  %v1854_v1 = vsel %vm1826_vm4, %v1821_v14, %v1080_v60 }
 0x2fd   : > { %3632 = vpow2.f32 %v3285_v4  ;;  %v1887_v54 = vsel %vm1859_vm5, %v1854_v1, %v5219_v27  ;;  %v1594_v43 = vpop.permute.xlu0 %1593 }
 0x2ff   : > { %v1588_v55 = vpop.permute.xlu1 %1587 }
 0x300   : > { %v1984_v53 = vsel %vm1958_vm8, %v1951_v20, %v1588_v55 }
 0x301   : > { %v2017_v25 = vsel %vm1991_vm9, %v1984_v53, %v5226_v32  ;;  %v5346_v27 = vpop.permute.xlu0 %1213 }
 0x302   : > { %3466 = vmatmul.mubr.msk.f32.gmra.mrb[24].mxu0 %vm2029_vm10, %v2017_v25 }
 0x303   : > { %v826_v33 = vpop.permute.xlu1 %825 }
 0x306   : > { %v3631_v46 = vpop.eup %3630 }
 0x307   : > { %v3633_v39 = vpop.eup %3632  ;;  %v2540_v52 = vadd.f32 1.0, %v3631_v46  ;;  %v1334_v30 = vpop.permute.xlu1 %1333 }
 0x308   : > { %v2539_v58 = vadd.f32 1.0, %v3633_v39  ;;  %v1919_v18 = vsel %vm1892_vm6, %v1886_v21, %v1334_v30  ;;  %v5365_v30 = vld [vmem:[%s5586_s6] ss:$0 sm:$0xff] }
 0x309   : > { %3634 = vrcp.f32 %v2540_v52  ;;  %v1952_v32 = vsel %vm1925_vm7, %v1919_v18, %v5256_v13 }
 0x30a   : > { %3636 = vrcp.f32 %v2539_v58  ;;  %v1985_v49 = vsel %vm1958_vm8, %v1952_v32, %v1590_v28 }
 0x30b   : > { %v5312_v5 = vpop.permute.xlu1 %827  ;;  %v2018_v44 = vsel %vm1991_vm9, %v1985_v49, %v1718_v34 }
 0x30c   : > { %3468 = vmatprep.mubr.msk.f32.mxu0 %vm2029_vm10, %v2018_v44 }
 0x30f   : > { %v1336_v29 = vpop.permute.xlu1 %1335 }
 0x310   : > { %v1920_v34 = vsel %vm1892_vm6, %v1887_v54, %v1336_v29 }
 0x313   : > { %v3635_v9 = vpop.eup %3634  ;;  %v5318_v8 = vpop.permute.xlu1 %955 }
 0x314   : > { %v3637_v38 = vpop.eup %3636  ;;  %v2636_v13 = vmul.f32 %v3635_v9, %v2412_v51 }
 0x315   : > { %v2635_v23 = vmul.f32 %v3637_v38, %v2411_v47  ;;  %v3449_v7 = vpop.f32.mrb[12].mxu0  ;;  %v1789_v47 = vsel %vm277_vm0, %v477_v2, %v826_v33  ;;  %v1722_v33 = vpop.permute.xlu0 %1721 }
 0x316   : > { %v2375_v37 = vmul.f32 %v3449_v7, %v4876_v12  ;;  %v2256_v28 = vpop.f32.mrb[13].mxu0  ;;  %v1822_v4 = vsel %vm1793_vm3, %v1789_v47, %v5242_v36 }
 0x317   : > { %v2374_v26 = vmul.f32 %v4876_v12, %v2256_v28  ;;  %v1464_v56 = vpop.permute.xlu1 %1463  ;;  %3496 = vmatprep.mubr.msk.f32.mxu1 %vm1859_vm5, %v2635_v23  ;;  %v1855_v22 = vsel %vm1826_vm4, %v1822_v4, %v5263_v61 }
 0x318   : > { %v2414_v17 = vadd.f32 %v4883_v31, %v2375_v37  ;;  %3497 = vmatmul.mubr.msk.f32.gmra.mrb[10].mxu1 %vm1859_vm5, %v2636_v13  ;;  %v1953_v50 = vsel %vm1925_vm7, %v1920_v34, %v1464_v56  ;;  %v1888_v53 = vsel %vm1859_vm5, %v1855_v22, %v5277_v57  ;;  %v5360_v57 = vld [vmem:[%s5585_s5] ss:$0 sm:$0xff] }
 0x319   : > { %v2413_v0 = vadd.f32 %v4883_v31, %v2374_v26 }
 0x31a   : > { %v3288_v15 = vmul.f32 -1.442695, %v2414_v17 }
 0x31b   : > { %v3287_v63 = vmul.f32 -1.442695, %v2413_v0  ;;  %v5334_v51 = vpop.permute.xlu1 %1083 }
 0x31c   : > { %3638 = vpow2.f32 %v3288_v15 }
 0x31d   : > { %3640 = vpow2.f32 %v3287_v63 }
 0x31f   : > { %v1592_v19 = vpop.permute.xlu1 %1591 }
 0x320   : > { %v1986_v24 = vsel %vm1958_vm8, %v1953_v50, %v1592_v19 }
 0x321   : > { %v2019_v60 = vsel %vm1991_vm9, %v1986_v24, %v1720_v48 }
 0x322   : > { %3469 = vmatmul.mubr.msk.f32.gmra.mrb[26].mxu0 %vm2029_vm10, %v2019_v60 }
 0x323   : > { %v830_v41 = vpop.permute.xlu1 %829 }
 0x326   : > { %v3639_v59 = vpop.eup %3638 }
 0x327   : > { %v3641_v3 = vpop.eup %3640  ;;  %v2542_v20 = vadd.f32 1.0, %v3639_v59  ;;  %v1338_v55 = vpop.permute.xlu1 %1337 }
 0x328   : > { %v2541_v45 = vadd.f32 1.0, %v3641_v3  ;;  %v1921_v36 = vsel %vm1892_vm6, %v1888_v53, %v1338_v55 }
 0x329   : > { %3642 = vrcp.f32 %v2542_v20  ;;  %v1954_v25 = vsel %vm1925_vm7, %v1921_v36, %v1466_v42 }
 0x32a   : > { %3644 = vrcp.f32 %v2541_v45  ;;  %v1987_v40 = vsel %vm1958_vm8, %v1954_v25, %v1594_v43  ;;  %v479_v43 = vld [vmem:[#allocation2 + $0x168] sm:$0xff] }
 0x32b   : > { %v832_v46 = vpop.permute.xlu1 %831  ;;  %v2020_v61 = vsel %vm1991_vm9, %v1987_v40, %v1722_v33  ;;  %v1791_v34 = vsel %vm277_vm0, %v479_v43, %v830_v41 }
 0x32c   : > { %3471 = vmatprep.mubr.msk.f32.mxu0 %vm2029_vm10, %v2020_v61 }
 0x32f   : > { %v1340_v48 = vpop.permute.xlu1 %1339 }
 0x332   : > { %v3483_v39 = vpop.f32.mrb[0].mxu1 }
 0x333   : > { %v3643_v52 = vpop.eup %3642  ;;  %v960_v21 = vpop.permute.xlu1 %959  ;;  %v2988_v32 = vmul.f32 %v3483_v39, %v5360_v57 }
 0x334   : > { %v2821_v58 = vpop.f32.mrb[1].mxu1  ;;  %v3645_v18 = vpop.eup %3644  ;;  %v2638_v42 = vmul.f32 %v3643_v52, %v2414_v17 }
 0x335   : > { %v2987_v49 = vmul.f32 %v5360_v57, %v2821_v58  ;;  %v2637_v44 = vmul.f32 %v3645_v18, %v2413_v0  ;;  %v3452_v29 = vpop.f32.mrb[14].mxu0  ;;  %v3027_v37 = vadd.f32 %v5365_v30, %v2988_v32  ;;  %v1342_v0 = vpop.permute.xlu0 %1341 }
 0x336   : > { %v2377_v38 = vmul.f32 %v3452_v29, %v4876_v12  ;;  %v2266_v23 = vpop.f32.mrb[15].mxu0 }
 0x337   : > { %v3026_v9 = vadd.f32 %v5365_v30, %v2987_v49  ;;  %v2376_v7 = vmul.f32 %v4876_v12, %v2266_v23  ;;  %v1468_v13 = vpop.permute.xlu1 %1467  ;;  %3499 = vmatprep.mubr.msk.f32.mxu1 %vm1859_vm5, %v2637_v44  ;;  %v3059_v1 = vadd.f32 %v3027_v37, %v3027_v37  ;;  %v1790_v12 = vsel %vm277_vm0, %v5058_v16, %v5312_v5  ;;  %v5415_v49 = vld [vmem:[%s5582_s2] ss:$0 sm:$0xff] }
 0x338   : > { %v2416_v26 = vadd.f32 %v4883_v31, %v2377_v38  ;;  %3500 = vmatmul.mubr.msk.f32.gmra.mrb[12].mxu1 %vm1859_vm5, %v2638_v42  ;;  %v1823_v63 = vsel %vm1793_vm3, %v1790_v12, %v5318_v8  ;;  %v1792_v16 = vsel %vm277_vm0, %v5128_v11, %v832_v46 }
 0x339   : > { %v3058_v28 = vadd.f32 %v3026_v9, %v3026_v9  ;;  %v2415_v56 = vadd.f32 %v4883_v31, %v2376_v7  ;;  %v1856_v31 = vsel %vm1826_vm4, %v1823_v63, %v5334_v51  ;;  %v1344_v2 = vpop.permute.xlu0 %1343  ;;  %v1825_v51 = vsel %vm1793_vm3, %v1792_v16, %v960_v21  ;;  %v5424_v9 = vld [vmem:[%s5583_s3] ss:$0 sm:$0xff] }
 0x33a   : > { %v3290_v35 = vmul.f32 -1.442695, %v2416_v26  ;;  %v1889_v47 = vsel %vm1859_vm5, %v1856_v31, %v5296_v6  ;;  %v1824_v6 = vsel %vm1793_vm3, %v1791_v34, %v5315_v62 }
 0x33b   : > { %3090 = vxpose.xlu1.b32.start [1/16] (narrow) %v3058_v28, 8  ;;  %v3289_v17 = vmul.f32 -1.442695, %v2415_v56  ;;  %v1088_v14 = vpop.permute.xlu1 %1087  ;;  %v1922_v50 = vsel %vm1892_vm6, %v1889_v47, %v1340_v48  ;;  %v1857_v20 = vsel %vm1826_vm4, %v1824_v6, %v5323_v10 }
 0x33c   : > { %3646 = vpow2.f32 %v3290_v35  ;;  %v1955_v5 = vsel %vm1925_vm7, %v1922_v50, %v1468_v13  ;;  %v1858_v59 = vsel %vm1826_vm4, %v1825_v51, %v1088_v14  ;;  %v1890_v62 = vsel %vm1859_vm5, %v1857_v20, %v5346_v27 }
 0x33d   : > { %3648 = vpow2.f32 %v3289_v17  ;;  %v1472_v8 = vpop.permute.xlu0 %1471  ;;  %v1923_v33 = vsel %vm1892_vm6, %v1890_v62, %v1342_v0 }
 0x33f   : > { %3091 = vxpose.xlu1.b32.cont [2/16] (narrow) %v3059_v1, 8  ;;  %v1596_v15 = vpop.permute.xlu1 %1595 }
 0x340   : > { %v1988_v60 = vsel %vm1958_vm8, %v1955_v5, %v1596_v15 }
 0x341   : > { %v1600_v45 = vpop.permute.xlu0 %1599 }
 0x343   : > { %v1216_v54 = vpop.permute.xlu1 %1215 }
 0x344   : > { %v1891_v11 = vsel %vm1859_vm5, %v1858_v59, %v1216_v54 }
 0x345   : > { %v1924_v53 = vsel %vm1892_vm6, %v1891_v11, %v1344_v2  ;;  %v1728_v46 = vpop.permute.xlu0 %1727 }
 0x346   : > { %v3647_v19 = vpop.eup %3646  ;;  %v1957_v36 = vsel %vm1925_vm7, %v1924_v53, %v1472_v8 }
 0x347   : > { %v3649_v24 = vpop.eup %3648  ;;  %v2544_v4 = vadd.f32 1.0, %v3647_v19  ;;  %v1724_v22 = vpop.permute.xlu1 %1723  ;;  %v1990_v40 = vsel %vm1958_vm8, %v1957_v36, %v1600_v45 }
 0x348   : > { %v2543_v41 = vadd.f32 1.0, %v3649_v24  ;;  %v2021_v3 = vsel %vm1991_vm9, %v1988_v60, %v1724_v22  ;;  %v2023_v27 = vsel %vm1991_vm9, %v1990_v40, %v1728_v46 }
 0x349   : > { %3650 = vrcp.f32 %v2544_v4  ;;  %3472 = vmatmul.mubr.msk.f32.gmra.mrb[28].mxu0 %vm2029_vm10, %v2021_v3 }
 0x34a   : > { %3652 = vrcp.f32 %v2543_v41 }
 0x34b   : > { %v1470_v55 = vpop.permute.xlu1 %1469 }
 0x34c   : > { %v1956_v61 = vsel %vm1925_vm7, %v1923_v33, %v1470_v55 }
 0x34f   : > { %v1598_v25 = vpop.permute.xlu1 %1597 }
 0x350   : > { %v1989_v10 = vsel %vm1958_vm8, %v1956_v61, %v1598_v25 }
 0x353   : > { %v3651_v48 = vpop.eup %3650  ;;  %v1726_v39 = vpop.permute.xlu1 %1725 }
 0x354   : > { %v3653_v52 = vpop.eup %3652  ;;  %v2022_v21 = vsel %vm1991_vm9, %v1989_v10, %v1726_v39  ;;  %v2640_v32 = vmul.f32 %v3651_v48, %v2416_v26 }
 0x355   : > { %v2639_v58 = vmul.f32 %v3653_v52, %v2415_v56  ;;  %v3455_v18 = vpop.f32.mrb[16].mxu0  ;;  %3474 = vmatprep.mubr.msk.f32.mxu0 %vm2029_vm10, %v2022_v21 }
 0x356   : > { %v2379_v44 = vmul.f32 %v5415_v49, %v3455_v18  ;;  %v2276_v29 = vpop.f32.mrb[17].mxu0  ;;  %3475 = vmatmul.mubr.msk.f32.gmra.mrb[30].mxu0 %vm2029_vm10, %v2023_v27 }
 0x357   : > { %v2378_v42 = vmul.f32 %v5415_v49, %v2276_v29  ;;  %3502 = vmatprep.mubr.msk.f32.mxu1 %vm1859_vm5, %v2639_v58 }
 0x358   : > { %v2418_v38 = vadd.f32 %v5424_v9, %v2379_v44  ;;  %3503 = vmatmul.mubr.msk.f32.gmra.mrb[14].mxu1 %vm1859_vm5, %v2640_v32 }
 0x359   : > { %v2417_v23 = vadd.f32 %v5424_v9, %v2378_v42 }
 0x35a   : > { %v3292_v7 = vmul.f32 -1.442695, %v2418_v38 }
 0x35b   : > { %v3291_v13 = vmul.f32 -1.442695, %v2417_v23 }
 0x35c   : > { %3654 = vpow2.f32 %v3292_v7 }
 0x35d   : > { %3656 = vpow2.f32 %v3291_v13 }
 0x366   : > { %v3655_v37 = vpop.eup %3654 }
 0x367   : > { %v3657_v28 = vpop.eup %3656  ;;  %v2546_v26 = vadd.f32 1.0, %v3655_v37 }
 0x368   : > { %v2545_v56 = vadd.f32 1.0, %v3657_v28 }
 0x369   : > { %3658 = vrcp.f32 %v2546_v26 }
 0x36a   : > { %3660 = vrcp.f32 %v2545_v56 }
 0x372   : > { %v3486_v35 = vpop.f32.mrb[2].mxu1 }
 0x373   : > { %v3659_v17 = vpop.eup %3658  ;;  %v2831_v14 = vpop.f32.mrb[3].mxu1  ;;  %v2990_v1 = vmul.f32 %v3486_v35, %v5360_v57 }
 0x374   : > { %v3661_v0 = vpop.eup %3660  ;;  %v2989_v12 = vmul.f32 %v5360_v57, %v2831_v14  ;;  %v2642_v31 = vmul.f32 %v3659_v17, %v2418_v38 }
 0x375   : > { %v2641_v15 = vmul.f32 %v3661_v0, %v2417_v23  ;;  %v3458_v63 = vpop.f32.mrb[18].mxu0  ;;  %v3029_v34 = vadd.f32 %v5365_v30, %v2990_v1 }
 0x376   : > { %v3028_v2 = vadd.f32 %v5365_v30, %v2989_v12  ;;  %v2381_v54 = vmul.f32 %v5415_v49, %v3458_v63  ;;  %v2286_v43 = vpop.f32.mrb[19].mxu0 }
 0x377   : > { %v2380_v47 = vmul.f32 %v5415_v49, %v2286_v43  ;;  %3505 = vmatprep.mubr.msk.f32.mxu1 %vm1859_vm5, %v2641_v15  ;;  %v3061_v24 = vadd.f32 %v3029_v34, %v3029_v34 }
 0x378   : > { %v3060_v50 = vadd.f32 %v3028_v2, %v3028_v2  ;;  %v2420_v19 = vadd.f32 %v5424_v9, %v2381_v54  ;;  %3506 = vmatmul.mubr.msk.f32.gmra.mrb[16].mxu1 %vm1859_vm5, %v2642_v31 }
 0x379   : > { %v2419_v16 = vadd.f32 %v5424_v9, %v2380_v47 }
 0x37a   : > { %v3294_v5 = vmul.f32 -1.442695, %v2420_v19  ;;  %3092 = vxpose.xlu1.b32.cont [3/16] (narrow) %v3060_v50, 8 }
 0x37b   : > { %v3293_v8 = vmul.f32 -1.442695, %v2419_v16 }
 0x37c   : > { %3662 = vpow2.f32 %v3294_v5 }
 0x37d   : > { %3664 = vpow2.f32 %v3293_v8 }
 0x37e   : > { %3093 = vxpose.xlu1.b32.cont [4/16] (narrow) %v3061_v24, 8 }
 0x386   : > { %v3663_v51 = vpop.eup %3662 }
 0x387   : > { %v3665_v4 = vpop.eup %3664  ;;  %v2548_v60 = vadd.f32 1.0, %v3663_v51 }
 0x388   : > { %v2547_v22 = vadd.f32 1.0, %v3665_v4 }
 0x389   : > { %3666 = vrcp.f32 %v2548_v60 }
 0x38a   : > { %3668 = vrcp.f32 %v2547_v22 }
 0x38b   : > { %v3489_v6 = vpop.f32.mrb[4].mxu1 }
 0x38c   : > { %v2841_v41 = vpop.f32.mrb[5].mxu1  ;;  %v2992_v59 = vmul.f32 %v3489_v6, %v5360_v57 }
 0x38d   : > { %v2991_v3 = vmul.f32 %v5360_v57, %v2841_v41 }
 0x38e   : > { %v3031_v20 = vadd.f32 %v5365_v30, %v2992_v59 }
 0x38f   : > { %v3030_v11 = vadd.f32 %v5365_v30, %v2991_v3 }
 0x390   : > { %v3063_v36 = vadd.f32 %v3031_v20, %v3031_v20 }
 0x391   : > { %v3062_v55 = vadd.f32 %v3030_v11, %v3030_v11 }
 0x393   : > { %v3667_v53 = vpop.eup %3666  ;;  %3094 = vxpose.xlu1.b32.cont [5/16] (narrow) %v3062_v55, 8 }
 0x394   : > { %v3669_v45 = vpop.eup %3668  ;;  %v2644_v33 = vmul.f32 %v3667_v53, %v2420_v19 }
 0x395   : > { %v2643_v62 = vmul.f32 %v3669_v45, %v2419_v16  ;;  %v3461_v25 = vpop.f32.mrb[20].mxu0 }
 0x396   : > { %v2383_v40 = vmul.f32 %v5415_v49, %v3461_v25  ;;  %v2296_v46 = vpop.f32.mrb[21].mxu0 }
 0x397   : > { %v2382_v61 = vmul.f32 %v5415_v49, %v2296_v46  ;;  %3095 = vxpose.xlu1.b32.cont [6/16] (narrow) %v3063_v36, 8  ;;  %3508 = vmatprep.mubr.msk.f32.mxu1 %vm1859_vm5, %v2643_v62 }
 0x398   : > { %v2422_v48 = vadd.f32 %v5424_v9, %v2383_v40  ;;  %3509 = vmatmul.mubr.msk.f32.gmra.mrb[18].mxu1 %vm1859_vm5, %v2644_v33 }
 0x399   : > { %v2421_v10 = vadd.f32 %v5424_v9, %v2382_v61 }
 0x39a   : > { %v3296_v39 = vmul.f32 -1.442695, %v2422_v48 }
 0x39b   : > { %v3295_v52 = vmul.f32 -1.442695, %v2421_v10 }
 0x39c   : > { %3670 = vpow2.f32 %v3296_v39 }
 0x39d   : > { %3672 = vpow2.f32 %v3295_v52 }
 0x3a6   : > { %v3671_v21 = vpop.eup %3670 }
 0x3a7   : > { %v3673_v58 = vpop.eup %3672  ;;  %v2550_v27 = vadd.f32 1.0, %v3671_v21 }
 0x3a8   : > { %v2549_v18 = vadd.f32 1.0, %v3673_v58 }
 0x3a9   : > { %3674 = vrcp.f32 %v2550_v27 }
 0x3aa   : > { %3676 = vrcp.f32 %v2549_v18 }
 0x3ab   : > { %v3492_v32 = vpop.f32.mrb[6].mxu1 }
 0x3ac   : > { %v2851_v44 = vpop.f32.mrb[7].mxu1  ;;  %v2994_v29 = vmul.f32 %v3492_v32, %v5360_v57 }
 0x3ad   : > { %v2993_v42 = vmul.f32 %v5360_v57, %v2851_v44 }
 0x3ae   : > { %v3033_v23 = vadd.f32 %v5365_v30, %v2994_v29 }
 0x3af   : > { %v3032_v38 = vadd.f32 %v5365_v30, %v2993_v42 }
 0x3b0   : > { %v3065_v26 = vadd.f32 %v3033_v23, %v3033_v23 }
 0x3b1   : > { %v3064_v7 = vadd.f32 %v3032_v38, %v3032_v38 }
 0x3b3   : > { %v3675_v13 = vpop.eup %3674  ;;  %3096 = vxpose.xlu1.b32.cont [7/16] (narrow) %v3064_v7, 8 }
 0x3b4   : > { %v3677_v37 = vpop.eup %3676  ;;  %v2646_v35 = vmul.f32 %v3675_v13, %v2422_v48 }
 0x3b5   : > { %v2645_v28 = vmul.f32 %v3677_v37, %v2421_v10  ;;  %v3464_v56 = vpop.f32.mrb[22].mxu0 }
 0x3b6   : > { %v2385_v17 = vmul.f32 %v5415_v49, %v3464_v56  ;;  %v2306_v14 = vpop.f32.mrb[23].mxu0 }
 0x3b7   : > { %v2384_v0 = vmul.f32 %v5415_v49, %v2306_v14  ;;  %3097 = vxpose.xlu1.b32.cont [8/16] (narrow) %v3065_v26, 8  ;;  %3511 = vmatprep.mubr.msk.f32.mxu1 %vm1859_vm5, %v2645_v28 }
 0x3b8   : > { %v2424_v1 = vadd.f32 %v5424_v9, %v2385_v17  ;;  %3512 = vmatmul.mubr.msk.f32.gmra.mrb[20].mxu1 %vm1859_vm5, %v2646_v35 }
 0x3b9   : > { %v2423_v12 = vadd.f32 %v5424_v9, %v2384_v0 }
 0x3ba   : > { %v3298_v15 = vmul.f32 -1.442695, %v2424_v1 }
 0x3bb   : > { %v3297_v63 = vmul.f32 -1.442695, %v2423_v12 }
 0x3bc   : > { %3678 = vpow2.f32 %v3298_v15 }
 0x3bd   : > { %3680 = vpow2.f32 %v3297_v63 }
 0x3c6   : > { %v3679_v31 = vpop.eup %3678 }
 0x3c7   : > { %v3681_v2 = vpop.eup %3680  ;;  %v2552_v54 = vadd.f32 1.0, %v3679_v31 }
 0x3c8   : > { %v2551_v43 = vadd.f32 1.0, %v3681_v2 }
 0x3c9   : > { %3682 = vrcp.f32 %v2552_v54 }
 0x3ca   : > { %3684 = vrcp.f32 %v2551_v43 }
 0x3cb   : > { %v3495_v47 = vpop.f32.mrb[8].mxu1 }
 0x3cc   : > { %v2861_v34 = vpop.f32.mrb[9].mxu1  ;;  %v2996_v50 = vmul.f32 %v3495_v47, %v5360_v57 }
 0x3cd   : > { %v2995_v19 = vmul.f32 %v5360_v57, %v2861_v34 }
 0x3ce   : > { %v3035_v5 = vadd.f32 %v5365_v30, %v2996_v50 }
 0x3cf   : > { %v3034_v16 = vadd.f32 %v5365_v30, %v2995_v19 }
 0x3d0   : > { %v3067_v60 = vadd.f32 %v3035_v5, %v3035_v5 }
 0x3d1   : > { %v3066_v8 = vadd.f32 %v3034_v16, %v3034_v16 }
 0x3d3   : > { %v3683_v24 = vpop.eup %3682  ;;  %3098 = vxpose.xlu1.b32.cont [9/16] (narrow) %v3066_v8, 8 }
 0x3d4   : > { %v3685_v51 = vpop.eup %3684  ;;  %v2648_v6 = vmul.f32 %v3683_v24, %v2424_v1 }
 0x3d5   : > { %v2647_v4 = vmul.f32 %v3685_v51, %v2423_v12  ;;  %v3467_v22 = vpop.f32.mrb[24].mxu0 }
 0x3d6   : > { %v2387_v41 = vmul.f32 %v5415_v49, %v3467_v22  ;;  %v2316_v59 = vpop.f32.mrb[25].mxu0 }
 0x3d7   : > { %v2386_v3 = vmul.f32 %v5415_v49, %v2316_v59  ;;  %3099 = vxpose.xlu1.b32.cont [10/16] (narrow) %v3067_v60, 8  ;;  %3514 = vmatprep.mubr.msk.f32.mxu1 %vm1859_vm5, %v2647_v4 }
 0x3d8   : > { %v2426_v11 = vadd.f32 %v5424_v9, %v2387_v41  ;;  %3515 = vmatmul.mubr.msk.f32.gmra.mrb[22].mxu1 %vm1859_vm5, %v2648_v6 }
 0x3d9   : > { %v2425_v20 = vadd.f32 %v5424_v9, %v2386_v3 }
 0x3da   : > { %v3300_v55 = vmul.f32 -1.442695, %v2426_v11 }
 0x3db   : > { %v3299_v53 = vmul.f32 -1.442695, %v2425_v20 }
 0x3dc   : > { %3686 = vpow2.f32 %v3300_v55 }
 0x3dd   : > { %3688 = vpow2.f32 %v3299_v53 }
 0x3e6   : > { %v3687_v45 = vpop.eup %3686 }
 0x3e7   : > { %v3689_v62 = vpop.eup %3688  ;;  %v2554_v36 = vadd.f32 1.0, %v3687_v45 }
 0x3e8   : > { %v2553_v25 = vadd.f32 1.0, %v3689_v62 }
 0x3e9   : > { %3690 = vrcp.f32 %v2554_v36 }
 0x3ea   : > { %3692 = vrcp.f32 %v2553_v25 }
 0x3eb   : > { %v3498_v33 = vpop.f32.mrb[10].mxu1 }
 0x3ec   : > { %v2871_v40 = vpop.f32.mrb[11].mxu1  ;;  %v2998_v46 = vmul.f32 %v3498_v33, %v5360_v57 }
 0x3ed   : > { %v2997_v61 = vmul.f32 %v5360_v57, %v2871_v40 }
 0x3ee   : > { %v3037_v10 = vadd.f32 %v5365_v30, %v2998_v46 }
 0x3ef   : > { %v3036_v48 = vadd.f32 %v5365_v30, %v2997_v61 }
 0x3f0   : > { %v3069_v27 = vadd.f32 %v3037_v10, %v3037_v10 }
 0x3f1   : > { %v3068_v39 = vadd.f32 %v3036_v48, %v3036_v48 }
 0x3f3   : > { %v3691_v52 = vpop.eup %3690  ;;  %3100 = vxpose.xlu1.b32.cont [11/16] (narrow) %v3068_v39, 8 }
 0x3f4   : > { %v3693_v21 = vpop.eup %3692  ;;  %v2650_v32 = vmul.f32 %v3691_v52, %v2426_v11 }
 0x3f5   : > { %v2649_v58 = vmul.f32 %v3693_v21, %v2425_v20  ;;  %v3470_v18 = vpop.f32.mrb[26].mxu0 }
 0x3f6   : > { %v2389_v44 = vmul.f32 %v5415_v49, %v3470_v18  ;;  %v2326_v29 = vpop.f32.mrb[27].mxu0 }
 0x3f7   : > { %v2388_v42 = vmul.f32 %v5415_v49, %v2326_v29  ;;  %3101 = vxpose.xlu1.b32.cont [12/16] (narrow) %v3069_v27, 8  ;;  %3517 = vmatprep.mubr.msk.f32.mxu1 %vm1859_vm5, %v2649_v58 }
 0x3f8   : > { %v2428_v38 = vadd.f32 %v5424_v9, %v2389_v44  ;;  %3518 = vmatmul.mubr.msk.f32.gmra.mrb[24].mxu1 %vm1859_vm5, %v2650_v32 }
 0x3f9   : > { %v2427_v23 = vadd.f32 %v5424_v9, %v2388_v42 }
 0x3fa   : > { %v3302_v7 = vmul.f32 -1.442695, %v2428_v38 }
 0x3fb   : > { %v3301_v13 = vmul.f32 -1.442695, %v2427_v23 }
 0x3fc   : > { %3694 = vpow2.f32 %v3302_v7 }
 0x3fd   : > { %3696 = vpow2.f32 %v3301_v13 }
 0x406   : > { %v3695_v37 = vpop.eup %3694 }
 0x407   : > { %v3697_v28 = vpop.eup %3696  ;;  %v2556_v26 = vadd.f32 1.0, %v3695_v37 }
 0x408   : > { %v2555_v56 = vadd.f32 1.0, %v3697_v28 }
 0x409   : > { %3698 = vrcp.f32 %v2556_v26 }
 0x40a   : > { %3700 = vrcp.f32 %v2555_v56 }
 0x40b   : > { %v3501_v35 = vpop.f32.mrb[12].mxu1 }
 0x40c   : > { %v2881_v17 = vpop.f32.mrb[13].mxu1  ;;  %v3000_v14 = vmul.f32 %v3501_v35, %v5360_v57 }
 0x40d   : > { %v2999_v0 = vmul.f32 %v5360_v57, %v2881_v17 }
 0x40e   : > { %v3039_v12 = vadd.f32 %v5365_v30, %v3000_v14 }
 0x40f   : > { %v3038_v1 = vadd.f32 %v5365_v30, %v2999_v0 }
 0x410   : > { %v3071_v54 = vadd.f32 %v3039_v12, %v3039_v12 }
 0x411   : > { %v3070_v15 = vadd.f32 %v3038_v1, %v3038_v1 }
 0x413   : > { %v3699_v63 = vpop.eup %3698  ;;  %3102 = vxpose.xlu1.b32.cont [13/16] (narrow) %v3070_v15, 8 }
 0x414   : > { %v3701_v31 = vpop.eup %3700  ;;  %v2652_v43 = vmul.f32 %v3699_v63, %v2428_v38 }
 0x415   : > { %v2651_v2 = vmul.f32 %v3701_v31, %v2427_v23 }
 0x417   : > { %3103 = vxpose.xlu1.b32.cont [14/16] (narrow) %v3071_v54, 8  ;;  %3520 = vmatprep.mubr.msk.f32.mxu1 %vm1859_vm5, %v2651_v2 }
 0x418   : > { %3521 = vmatmul.mubr.msk.f32.gmra.mrb[26].mxu1 %vm1859_vm5, %v2652_v43 }
 0x41c   : > { %v3473_v47 = vpop.f32.mrb[28].mxu0 }
 0x41d   : > { %v2391_v34 = vmul.f32 %v5415_v49, %v3473_v47  ;;  %v2336_v50 = vpop.f32.mrb[29].mxu0 }
 0x41e   : > { %v2390_v19 = vmul.f32 %v5415_v49, %v2336_v50 }
 0x41f   : > { %v2430_v16 = vadd.f32 %v5424_v9, %v2391_v34 }
 0x420   : > { %v2429_v5 = vadd.f32 %v5424_v9, %v2390_v19 }
 0x421   : > { %v3304_v8 = vmul.f32 -1.442695, %v2430_v16 }
 0x422   : > { %v3303_v24 = vmul.f32 -1.442695, %v2429_v5 }
 0x423   : > { %3702 = vpow2.f32 %v3304_v8 }
 0x424   : > { %3704 = vpow2.f32 %v3303_v24 }
 0x429   : > { %v3476_v51 = vpop.f32.mrb[30].mxu0 }
 0x42a   : > { %v2393_v4 = vmul.f32 %v5415_v49, %v3476_v51  ;;  %v2346_v60 = vpop.f32.mrb[31].mxu0 }
 0x42b   : > { %v2392_v22 = vmul.f32 %v5415_v49, %v2346_v60  ;;  %v3504_v6 = vpop.f32.mrb[14].mxu1 }
 0x42c   : > { %v2432_v41 = vadd.f32 %v5424_v9, %v2393_v4  ;;  %v2891_v59 = vpop.f32.mrb[15].mxu1  ;;  %v3002_v20 = vmul.f32 %v3504_v6, %v5360_v57 }
 0x42d   : > { %v3703_v3 = vpop.eup %3702  ;;  %v2431_v11 = vadd.f32 %v5424_v9, %v2392_v22  ;;  %v3001_v55 = vmul.f32 %v5360_v57, %v2891_v59 }
 0x42e   : > { %v3705_v53 = vpop.eup %3704  ;;  %v2558_v45 = vadd.f32 1.0, %v3703_v3  ;;  %v3306_v62 = vmul.f32 -1.442695, %v2432_v41  ;;  %v3041_v49 = vadd.f32 %v5365_v30, %v3002_v20 }
 0x42f   : > { %v2557_v36 = vadd.f32 1.0, %v3705_v53  ;;  %v3305_v25 = vmul.f32 -1.442695, %v2431_v11  ;;  %v3040_v33 = vadd.f32 %v5365_v30, %v3001_v55 }
 0x430   : > { %3706 = vrcp.f32 %v2558_v45  ;;  %v3073_v9 = vadd.f32 %v3041_v49, %v3041_v49 }
 0x431   : > { %3708 = vrcp.f32 %v2557_v36  ;;  %v3072_v40 = vadd.f32 %v3040_v33, %v3040_v33 }
 0x432   : > { %3710 = vpow2.f32 %v3306_v62 }
 0x433   : > { %3712 = vpow2.f32 %v3305_v25  ;;  %3104 = vxpose.xlu1.b32.cont [15/16] (narrow) %v3072_v40, 8 }
 0x437   : > { %3105 = vxpose.xlu1.b32.end [16/16] (narrow) %v3073_v9, 8 }
 0x43a   : > { %v3707_v46 = vpop.eup %3706 }
 0x43b   : > { %v3709_v61 = vpop.eup %3708  ;;  %v2654_v52 = vmul.f32 %v3707_v46, %v2430_v16 }
 0x43c   : > { %v3711_v48 = vpop.eup %3710  ;;  %v2653_v10 = vmul.f32 %v3709_v61, %v2429_v5 }
 0x43d   : > { %v3713_v39 = vpop.eup %3712  ;;  %v2560_v21 = vadd.f32 1.0, %v3711_v48 }
 0x43e   : > { %v2559_v58 = vadd.f32 1.0, %v3713_v39  ;;  %3523 = vmatprep.mubr.msk.f32.mxu1 %vm1859_vm5, %v2653_v10 }
 0x43f   : > { %3714 = vrcp.f32 %v2560_v21  ;;  %3524 = vmatmul.mubr.msk.f32.gmra.mrb[28].mxu1 %vm1859_vm5, %v2654_v52 }
 0x440   : > { %3716 = vrcp.f32 %v2559_v58 }
 0x449   : > { %v3715_v27 = vpop.eup %3714 }
 0x44a   : > { %v3717_v18 = vpop.eup %3716  ;;  %v2656_v29 = vmul.f32 %v3715_v27, %v2432_v41 }
 0x44b   : > { %v2655_v32 = vmul.f32 %v3717_v18, %v2431_v11  ;;  %v3507_v44 = vpop.f32.mrb[16].mxu1 }
 0x44c   : > { %v2901_v42 = vpop.f32.mrb[17].mxu1  ;;  %v3004_v38 = vmul.f32 %v3507_v44, %v5360_v57 }
 0x44d   : > { %3526 = vmatprep.mubr.msk.f32.mxu1 %vm1859_vm5, %v2655_v32  ;;  %v3003_v23 = vmul.f32 %v5360_v57, %v2901_v42 }
 0x44e   : > { %3527 = vmatmul.mubr.msk.f32.gmra.mrb[30].mxu1 %vm1859_vm5, %v2656_v29  ;;  %v3043_v13 = vadd.f32 %v5365_v30, %v3004_v38 }
 0x44f   : > { %v3042_v7 = vadd.f32 %v5365_v30, %v3003_v23 }
 0x450   : > { %v3075_v28 = vadd.f32 %v3043_v13, %v3043_v13 }
 0x451   : > { %v3074_v37 = vadd.f32 %v3042_v7, %v3042_v7 }
 0x453   : > { %3122 = vxpose.xlu0.b32.start [1/16] (narrow) %v3074_v37, 8 }
 0x457   : > { %3123 = vxpose.xlu0.b32.cont [2/16] (narrow) %v3075_v28, 8 }
 0x46b   : > { %v3510_v26 = vpop.f32.mrb[18].mxu1 }
 0x46c   : > { %v2911_v56 = vpop.f32.mrb[19].mxu1  ;;  %v3006_v35 = vmul.f32 %v3510_v26, %v5360_v57 }
 0x46d   : > { %v3005_v17 = vmul.f32 %v5360_v57, %v2911_v56 }
 0x46e   : > { %v3045_v0 = vadd.f32 %v5365_v30, %v3006_v35 }
 0x46f   : > { %v3044_v14 = vadd.f32 %v5365_v30, %v3005_v17 }
 0x470   : > { %v3077_v12 = vadd.f32 %v3045_v0, %v3045_v0 }
 0x471   : > { %v3076_v1 = vadd.f32 %v3044_v14, %v3044_v14 }
 0x473   : > { %3124 = vxpose.xlu0.b32.cont [3/16] (narrow) %v3076_v1, 8 }
 0x477   : > { %3125 = vxpose.xlu0.b32.cont [4/16] (narrow) %v3077_v12, 8 }
 0x47b   : > { %v3106_v38 = vpop.trf.xlu1 }
 0x48b   : > { %v3513_v15 = vpop.f32.mrb[20].mxu1 }
 0x48c   : > { %v2921_v63 = vpop.f32.mrb[21].mxu1  ;;  %v3008_v31 = vmul.f32 %v3513_v15, %v5360_v57 }
 0x48d   : > { %v3007_v2 = vmul.f32 %v5360_v57, %v2921_v63 }
 0x48e   : > { %v3047_v43 = vadd.f32 %v5365_v30, %v3008_v31 }
 0x48f   : > { %v3046_v54 = vadd.f32 %v5365_v30, %v3007_v2 }
 0x490   : > { %v3079_v34 = vadd.f32 %v3047_v43, %v3047_v43 }
 0x491   : > { %v3078_v47 = vadd.f32 %v3046_v54, %v3046_v54 }
 0x493   : > { %3126 = vxpose.xlu0.b32.cont [5/16] (narrow) %v3078_v47, 8 }
 0x497   : > { %3127 = vxpose.xlu0.b32.cont [6/16] (narrow) %v3079_v34, 8 }
 0x4ab   : > { %v3516_v50 = vpop.f32.mrb[22].mxu1 }
 0x4ac   : > { %v2931_v19 = vpop.f32.mrb[23].mxu1  ;;  %v3010_v16 = vmul.f32 %v3516_v50, %v5360_v57 }
 0x4ad   : > { %v3009_v5 = vmul.f32 %v5360_v57, %v2931_v19 }
 0x4ae   : > { %v3049_v24 = vadd.f32 %v5365_v30, %v3010_v16 }
 0x4af   : > { %v3048_v8 = vadd.f32 %v5365_v30, %v3009_v5 }
 0x4b0   : > { %v3081_v4 = vadd.f32 %v3049_v24, %v3049_v24 }
 0x4b1   : > { %v3080_v51 = vadd.f32 %v3048_v8, %v3048_v8 }
 0x4b3   : > { %3128 = vxpose.xlu0.b32.cont [7/16] (narrow) %v3080_v51, 8 }
 0x4b7   : > { %3129 = vxpose.xlu0.b32.cont [8/16] (narrow) %v3081_v4, 8 }
 0x4cb   : > { %v3519_v60 = vpop.f32.mrb[24].mxu1 }
 0x4cc   : > { %v2941_v22 = vpop.f32.mrb[25].mxu1  ;;  %v3012_v6 = vmul.f32 %v3519_v60, %v5360_v57 }
 0x4cd   : > { %v3011_v41 = vmul.f32 %v5360_v57, %v2941_v22 }
 0x4ce   : > { %v3051_v3 = vadd.f32 %v5365_v30, %v3012_v6 }
 0x4cf   : > { %v3050_v59 = vadd.f32 %v5365_v30, %v3011_v41 }
 0x4d0   : > { %v3083_v20 = vadd.f32 %v3051_v3, %v3051_v3 }
 0x4d1   : > { %v3082_v11 = vadd.f32 %v3050_v59, %v3050_v59 }
 0x4d3   : > { %3130 = vxpose.xlu0.b32.cont [9/16] (narrow) %v3082_v11, 8 }
 0x4d7   : > { %3131 = vxpose.xlu0.b32.cont [10/16] (narrow) %v3083_v20, 8 }
 0x4eb   : > { %v3522_v55 = vpop.f32.mrb[26].mxu1 }
 0x4ec   : > { %v2951_v53 = vpop.f32.mrb[27].mxu1  ;;  %v3014_v45 = vmul.f32 %v3522_v55, %v5360_v57 }
 0x4ed   : > { %v3013_v62 = vmul.f32 %v5360_v57, %v2951_v53 }
 0x4ee   : > { %v3053_v25 = vadd.f32 %v5365_v30, %v3014_v45 }
 0x4ef   : > { %v3052_v36 = vadd.f32 %v5365_v30, %v3013_v62 }
 0x4f0   : > { %v3085_v49 = vadd.f32 %v3053_v25, %v3053_v25 }
 0x4f1   : > { %v3084_v33 = vadd.f32 %v3052_v36, %v3052_v36 }
 0x4f3   : > { %3132 = vxpose.xlu0.b32.cont [11/16] (narrow) %v3084_v33, 8 }
 0x4f7   : > { %3133 = vxpose.xlu0.b32.cont [12/16] (narrow) %v3085_v49, 8 }
 0x512   : > { %v3525_v40 = vpop.f32.mrb[28].mxu1 }
 0x513   : > { %v2961_v9 = vpop.f32.mrb[29].mxu1  ;;  %v3016_v46 = vmul.f32 %v3525_v40, %v5360_v57 }
 0x514   : > { %v3015_v61 = vmul.f32 %v5360_v57, %v2961_v9 }
 0x515   : > { %v3055_v10 = vadd.f32 %v5365_v30, %v3016_v46 }
 0x516   : > { %v3054_v48 = vadd.f32 %v5365_v30, %v3015_v61 }
 0x517   : > { %v3087_v52 = vadd.f32 %v3055_v10, %v3055_v10 }
 0x518   : > { %v3086_v39 = vadd.f32 %v3054_v48, %v3054_v48 }
 0x51a   : > { %3134 = vxpose.xlu0.b32.cont [13/16] (narrow) %v3086_v39, 8 }
 0x51e   : > { %3135 = vxpose.xlu0.b32.cont [14/16] (narrow) %v3087_v52, 8 }
 0x521   : > { %v3528_v21 = vpop.f32.mrb[30].mxu1 }
 0x522   : > { %v2971_v58 = vpop.f32.mrb[31].mxu1  ;;  %v3018_v27 = vmul.f32 %v3528_v21, %v5360_v57 }
 0x523   : > { %v3017_v18 = vmul.f32 %v5360_v57, %v2971_v58 }
 0x524   : > { %v3057_v44 = vadd.f32 %v5365_v30, %v3018_v27 }
 0x525   : > { %v3056_v32 = vadd.f32 %v5365_v30, %v3017_v18 }
 0x526   : > { %v3089_v42 = vadd.f32 %v3057_v44, %v3057_v44 }
 0x527   : > { %v3088_v29 = vadd.f32 %v3056_v32, %v3056_v32 }
 0x529   : > { %3136 = vxpose.xlu0.b32.cont [15/16] (narrow) %v3088_v29, 8 }
 0x52d   : > { %3137 = vxpose.xlu0.b32.end [16/16] (narrow) %v3089_v42, 8 }
 0x571   : > { %v3138_v23 = vpop.trf.xlu0 }
 0x572   : > { %v3156_v7 = vcombine.low %v3106_v38, %v3138_v23 }
 0x574   : > { %3158 = vst [vmem:[%s271_s15] sm:$0xff] %v3156_v7 }
 0x575   : > { %3733 = shalt.err (!%p3730_p3)
}
 0x576   : > { %s3734_s29 = scalar_lea.hbm %s5538_s19, 128  ;;  %s3738_s13 = scalar_lea.hbm %s5587_s7, 256 }
 0x577   : > { %p3735_p4 = scmp.ne.s32.totalorder %s5538_s19, %s3734_s29  ;;  %p3739_p9 = scmp.lt.u32.totalorder %s5538_s19, %s5587_s7 }
 0x578   : > { %p3740_p10 = scmp.lt.u32.totalorder %s3738_s13, %s3734_s29  ;;  %p3742_p12 = scmp.lt.u32.totalorder %s3734_s29, %s5538_s19 }
 0x579   : > { %p3736_p7 = pnand %p3735_p4, %p3872_p5 }
 0x57a   : > { %p3741_p11 = por %p3740_p10, %p3739_p9 }
 0x57b   : > { %p3737_p8 = pneg %p3736_p7 }
 0x57c   : > { %p3743_p13 = por %p3742_p12, %p3741_p11 }
 0x57e   : > { %p3744_p0 = pnand %p3743_p13, %p3737_p8 }
 0x580   : > { %3747 = shalt.err (!%p3744_p0)
}
 0x581   : > { %3541 = dma.vmem_to_hbm [thread:$0]  (%p3872_p5), %s5540_s16, 128, %s5538_s19, %s3160_s20  }
 0x582 PF: > { %p3547_p1 = scmp.ge.s32.totalorder %s3782_s27, 2  ;;  %s3186_s17 = sand.u32 1, %s3770_s24  }
 0x583   : > { %s3187_s18 = scalar_lea.sflag [#allocation4], %s3186_s17 }
 0x584   : > { %p3544_p2 = pnand %p3547_p1, %p3876_p6 }
 0x586   : > { %3765 = dma.done.wait (!%p3544_p2), %s3187_s18, 128  }
 0x587   : > { %3767 = vsyncadd (!%p3544_p2), %s3187_s18, 4294967168  ;;  %p17_p3 = scmp.ge.s32.totalorder %s3859_s30, 4   ;;  %s5645_s24 = smov %s3774_s25 }
 0x588   : > { %s5646_s25 = smov %s3778_s26  ;;  %s5647_s26 = smov %s3870_s10 }
 0x589   : > { %s5648_s27 = smov %s3859_s30  ;;  %19 = sbr.rel (!%p17_p3) target bundleno = 3 (0x3), region = 99 }
 0x590   :  { %3192 = vsyncpa [#allocation4], 1 }
 0x591   :  { %3194 = vsyncpa [#allocation4 + $0x1], 1 }

</bundles_post_ra>
